<compile_context>
chip_gen: v7x
topology: tpu7x:2x2x1
jax: 0.10.0
libtpu: 0.0.40
codegen_flags: <defaults>
</compile_context>

<pallas_src>
import functools

import jax
import jax.numpy as jnp
from jax import lax
from jax.experimental import pallas as pl
from jax.experimental.pallas import tpu as pltpu


# --------------------------------------------------------------------------- #
# helpers
# --------------------------------------------------------------------------- #
def _round_up(x: int, m: int) -> int:
    return ((x + m - 1) // m) * m


def _pad2d(w, rows, cols):
    return jnp.pad(w, ((0, rows - w.shape[0]), (0, cols - w.shape[1])))


def _pad_gate_blocked(w, rows_out, h, h_out):
    """Pad a fused-gate matrix (rows, 4*h) -> (rows_out, 4*h_out).

    Keeps the PyTorch [i, f, g, o] block structure so in-kernel gate slices at
    multiples of h_out still address the right gate.  Zero padding is inert:
    padded hidden units get gates (0.5, 0.5, 0, 0.5) and, with zero-initialized
    padded state columns (guaranteed by the wrapper), stay exactly 0 forever.
    """
    blocks = [
        _pad2d(w[:, k * h:(k + 1) * h], rows_out, h_out) for k in range(4)
    ]
    return jnp.concatenate(blocks, axis=1)


def _const_spec(shape, single_buffer):
    """BlockSpec for a grid-invariant operand (block index always 0)."""
    n = len(shape)
    if single_buffer and hasattr(pl, "Buffered"):
        return pl.BlockSpec(shape, lambda c, _n=n: (0,) * _n,
                            pipeline_mode=pl.Buffered(1))
    return pl.BlockSpec(shape, lambda c, _n=n: (0,) * _n)


def _estimate_vmem_bytes(rows, d_obs, h_pad, b_pad, w_bytes):
    weights = (d_obs * h_pad + 2 * h_pad * 4 * h_pad) * w_bytes   # wp, wih, whh
    biases = (h_pad + 4 * h_pad) * 4                              # bp, b (f32)
    state_in = 2 * b_pad * h_pad * 4                              # h0, c0
    obs_blk = 2 * rows * d_obs * 4                                # double-buffered
    xg_scratch = rows * 4 * h_pad * 4                             # f32 scratch
    outs = 2 * 2 * b_pad * h_pad * 4                              # hout/cout
    return weights + biases + state_in + obs_blk + xg_scratch + outs


# --------------------------------------------------------------------------- #
# fused recurrence kernel: per-chunk input projection + chunked LSTM steps
# --------------------------------------------------------------------------- #
def _lstm_recurrence_kernel(
    # inputs
    obs_ref,     # (t_chunk*B_pad, D_obs)   this chunk, time-major flattened
    wp_ref,      # (D_obs, H_pad)           w_dtype
    bp_ref,      # (1, H_pad)               f32
    wih_ref,     # (H_pad, 4*H_pad)         w_dtype (gate-blocked)
    b_ref,       # (1, 4*H_pad)             f32     (b_ih + b_hh, gate-blocked)
    whh_ref,     # (H_pad, 4*H_pad)         w_dtype (gate-blocked)
    h0_ref,      # (B_pad, H_pad)           f32
    c0_ref,      # (B_pad, H_pad)           f32
    # outputs (constant out_spec -> resident accumulators across chunks)
    hout_ref,    # (B_pad, H_pad) f32
    cout_ref,    # (B_pad, H_pad) f32
    # scratch
    xg_sc,       # (t_chunk*B_pad, 4*H_pad) f32
    *,
    t_chunk: int,
    b_pad: int,
    h_pad: int,
    seq_len: int,
    seq_pad: int,
):
    chunk = pl.program_id(0)
    H = h_pad

    @pl.when(chunk == 0)
    def _init():
        hout_ref[...] = h0_ref[...]
        cout_ref[...] = c0_ref[...]

    # Fused input projection for the whole chunk: one big GEMM chain.  This is
    # the only obs-dependent work; it has no dependence on the recurrence.
    x = jnp.dot(obs_ref[...].astype(wp_ref.dtype), wp_ref[...],
                preferred_element_type=jnp.float32) + bp_ref[...]
    x = jnp.maximum(x, 0.0)
    xg_sc[...] = jnp.dot(x.astype(wih_ref.dtype), wih_ref[...],
                         preferred_element_type=jnp.float32) + b_ref[...]

    need_mask = seq_pad != seq_len  # trace-time constant

    def step(t, carry):
        h, c = carry
        row0 = pl.multiple_of(t * b_pad, 8)
        xg = xg_sc[pl.ds(row0, b_pad), :]                   # (B_pad, 4*H_pad)
        gates = xg + jnp.dot(h.astype(whh_ref.dtype), whh_ref[...],
                             preferred_element_type=jnp.float32)
        # PyTorch gate order [i, f, g, o]; slices are 128-lane aligned.
        i_g = jax.nn.sigmoid(gates[:, 0 * H:1 * H])
        f_g = jax.nn.sigmoid(gates[:, 1 * H:2 * H])
        g_g = jnp.tanh(gates[:, 2 * H:3 * H])
        o_g = jax.nn.sigmoid(gates[:, 3 * H:4 * H])
        c_new = f_g * c + i_g * g_g
        h_new = o_g * jnp.tanh(c_new)
        if need_mask:
            valid = (chunk * t_chunk + t) < seq_len
            h_new = jnp.where(valid, h_new, h)
            c_new = jnp.where(valid, c_new, c)
        return h_new, c_new

    h, c = lax.fori_loop(0, t_chunk, step, (hout_ref[...], cout_ref[...]),
                         unroll=True)
    hout_ref[...] = h
    cout_ref[...] = c


# --------------------------------------------------------------------------- #
# tiny mu head (only consumes the final hidden state)
# --------------------------------------------------------------------------- #
def _mu_head_kernel(h_ref, wmu_ref, bmu_ref, mu_ref, *, max_action, unbounded):
    mu = jnp.dot(h_ref[...].astype(wmu_ref.dtype), wmu_ref[...],
                 preferred_element_type=jnp.float32) + bmu_ref[...]
    if not unbounded:
        mu = max_action * jnp.tanh(mu)
    mu_ref[...] = mu


# --------------------------------------------------------------------------- #
# wrapper
# --------------------------------------------------------------------------- #
def recurrent_actor_prob_forward(obs, params, state=None, *, max_action=1.0,
                                 unbounded=False, use_bf16_matmul=True,
                                 t_chunk=None, single_buffer_weights=True):
    """obs: (B, S, D_obs) or (B, D_obs) float32 (batch-first, PyTorch convention).

    use_bf16_matmul (default True): bf16 matmul weights/operands (native for
    v5e/v6e/v7x MXUs); accumulation, biases, activations and h/c state stay f32.
    """
    obs = jnp.asarray(obs, jnp.float32)
    if obs.ndim == 2:
        obs = obs[:, None, :]                               # unsqueeze(-2)
    B, S, D_obs = obs.shape
    H = params["whh"].shape[0]
    A = params["wmu"].shape[1]

    # Alignment padding: sublane (8) for batch, lane (128) for hidden/action.
    B_pad = _round_up(B, 8)
    H_pad = _round_up(H, 128)
    A_pad = _round_up(A, 128)
    if t_chunk is None:
        t_chunk = min(S, 16)                                # timesteps per grid step
    S_pad = _round_up(S, t_chunk)
    num_chunks = S_pad // t_chunk
    rows = t_chunk * B_pad                                  # obs/xg rows per chunk

    w_dtype = jnp.bfloat16 if use_bf16_matmul else jnp.float32

    wp = _pad2d(params["wp"], D_obs, H_pad).astype(w_dtype)
    bp = _pad2d(params["bp"], 1, H_pad)
    wih = _pad_gate_blocked(params["wih"], H_pad, H, H_pad).astype(w_dtype)
    whh = _pad_gate_blocked(params["whh"], H_pad, H, H_pad).astype(w_dtype)
    b = _pad_gate_blocked(params["b"], 1, H, H_pad)
    wmu = _pad2d(params["wmu"], H_pad, A_pad).astype(w_dtype)
    bmu = _pad2d(params["bmu"], 1, A_pad)

    if state is None:
        h0 = jnp.zeros((B_pad, H_pad), jnp.float32)
        c0 = jnp.zeros((B_pad, H_pad), jnp.float32)
    else:
        # state stored as (B, num_layers=1, H) -> squeeze layer axis, pad.
        # _pad2d guarantees pad rows/columns are zero (keeps gate padding inert).
        h0 = _pad2d(state["hidden"][:, 0, :].astype(jnp.float32), B_pad, H_pad)
        c0 = _pad2d(state["cell"][:, 0, :].astype(jnp.float32), B_pad, H_pad)

    # Time-major, padded, flattened to a lane/sublane-friendly 2-D slab.
    obs_tm = jnp.transpose(obs, (1, 0, 2))                  # (S, B, D_obs)
    obs_tm = jnp.pad(obs_tm, ((0, S_pad - S), (0, B_pad - B), (0, 0)))
    obs_flat = obs_tm.reshape(S_pad * B_pad, D_obs)

    kernel = functools.partial(
        _lstm_recurrence_kernel,
        t_chunk=t_chunk, b_pad=B_pad, h_pad=H_pad, seq_len=S, seq_pad=S_pad)

    est = _estimate_vmem_bytes(rows, D_obs, H_pad, B_pad,
                               2 if use_bf16_matmul else 4)
    vmem_limit = int(min(64 * 2**20, max(32 * 2**20, 2 * est)))

    def _run_recurrence(single_buffer):
        return pl.pallas_call(
            kernel,
            out_shape=(jax.ShapeDtypeStruct((B_pad, H_pad), jnp.float32),
                       jax.ShapeDtypeStruct((B_pad, H_pad), jnp.float32)),
            grid=(num_chunks,),
            in_specs=[
                pl.BlockSpec((rows, D_obs), lambda c: (c, 0)),     # obs chunk
                _const_spec((D_obs, H_pad), single_buffer),        # wp
                _const_spec((1, H_pad), single_buffer),            # bp
                _const_spec((H_pad, 4 * H_pad), single_buffer),    # wih
                _const_spec((1, 4 * H_pad), single_buffer),        # b
                _const_spec((H_pad, 4 * H_pad), single_buffer),    # whh
                _const_spec((B_pad, H_pad), single_buffer),        # h0
                _const_spec((B_pad, H_pad), single_buffer),        # c0
            ],
            out_specs=(
                pl.BlockSpec((B_pad, H_pad), lambda c: (0, 0)),    # hidden
                pl.BlockSpec((B_pad, H_pad), lambda c: (0, 0)),    # cell
            ),
            scratch_shapes=[pltpu.VMEM((rows, 4 * H_pad), jnp.float32)],
            compiler_params=pltpu.CompilerParams(
                dimension_semantics=("arbitrary",),
                vmem_limit_bytes=vmem_limit),
        )(obs_flat, wp, bp, wih, b, whh, h0, c0)

    if single_buffer_weights:
        try:
            hout, cout = _run_recurrence(True)
        except Exception:
            # Fallback for jax builds where pl.Buffered(1) is rejected by the
            # TPU pipeline; semantics are identical (just double-buffered).
            hout, cout = _run_recurrence(False)
    else:
        hout, cout = _run_recurrence(False)

    # mu head: tiny single-block pallas_call consuming the final hidden state.
    mu_pad = pl.pallas_call(
        functools.partial(_mu_head_kernel, max_action=float(max_action),
                          unbounded=bool(unbounded)),
        out_shape=jax.ShapeDtypeStruct((B_pad, A_pad), jnp.float32),
    )(hout, wmu, bmu)

    # sigma has no recurrence dependence -> plain XLA in the wrapper
    # (conditioned_sigma=False path: exp(sigma_param) broadcast to mu.shape).
    sigma = jnp.exp(jnp.broadcast_to(
        jnp.asarray(params["sigma_param"], jnp.float32), (B, A)))

    # Un-pad / reshape in the wrapper (free XLA layout plumbing).
    mu = mu_pad[:B, :A]
    hidden = hout[:B, :H][:, None, :]                       # (B, 1, H)
    cell = cout[:B, :H][:, None, :]
    return (mu, sigma), {"hidden": hidden, "cell": cell}


# --------------------------------------------------------------------------- #
# pure-JAX reference (lax.scan) for correctness checking
# --------------------------------------------------------------------------- #
def _reference_forward(obs, params, h0, c0, max_action):
    H = params["whh"].shape[0]
    obs_tm = jnp.transpose(obs, (1, 0, 2))

    def step(carry, x_t):
        h, c = carry
        x = jnp.maximum(x_t @ params["wp"] + params["bp"], 0.0)
        gates = x @ params["wih"] + h @ params["whh"] + params["b"]
        i_g = jax.nn.sigmoid(gates[:, 0 * H:1 * H])
        f_g = jax.nn.sigmoid(gates[:, 1 * H:2 * H])
        g_g = jnp.tanh(gates[:, 2 * H:3 * H])
        o_g = jax.nn.sigmoid(gates[:, 3 * H:4 * H])
        c = f_g * c + i_g * g_g
        h = o_g * jnp.tanh(c)
        return (h, c), None

    (h, c), _ = lax.scan(step, (h0, c0), obs_tm)
    mu = max_action * jnp.tanh(h @ params["wmu"] + params["bmu"])
    sigma = jnp.exp(params["sigma_param"] + jnp.zeros_like(mu))
    return mu, sigma, h, c


def init_params(key, d_obs, hidden, action_dim):
    ks = jax.random.split(key, 8)
    s = 0.1
    return {
        "wp": s * jax.random.normal(ks[0], (d_obs, hidden), jnp.float32),
        "bp": s * jax.random.normal(ks[1], (1, hidden), jnp.float32),
        "wih": s * jax.random.normal(ks[2], (hidden, 4 * hidden), jnp.float32),
        "whh": s * jax.random.normal(ks[3], (hidden, 4 * hidden), jnp.float32),
        "b": s * jax.random.normal(ks[4], (1, 4 * hidden), jnp.float32),
        "wmu": s * jax.random.normal(ks[5], (hidden, action_dim), jnp.float32),
        "bmu": s * jax.random.normal(ks[6], (1, action_dim), jnp.float32),
        # nn.Parameter(torch.zeros(output_dim, 1)) -> stored row-wise (1, A)
        "sigma_param": jnp.zeros((1, action_dim), jnp.float32),
    }


if __name__ == "__main__":
    B, S, D_OBS, HIDDEN, ACTION_DIM = 2, 8, 16, 32, 4
    MAX_ACTION = 1.0

    key = jax.random.PRNGKey(0)
    k_obs, k_obs2, k_par = jax.random.split(key, 3)
    obs = jax.random.normal(k_obs, (B, S, D_OBS), jnp.float32)
    params = init_params(k_par, D_OBS, HIDDEN, ACTION_DIM)

    # --- exact (f32-matmul) path, no initial state ---------------------------
    (mu, sigma), new_state = recurrent_actor_prob_forward(
        obs, params, state=None, max_action=MAX_ACTION, use_bf16_matmul=False)
    jax.block_until_ready((mu, sigma, new_state["hidden"], new_state["cell"]))

    h0 = jnp.zeros((B, HIDDEN), jnp.float32)
    c0 = jnp.zeros((B, HIDDEN), jnp.float32)
    mu_ref, sigma_ref, h_ref, c_ref = _reference_forward(
        obs, params, h0, c0, MAX_ACTION)
    assert mu.shape == (B, ACTION_DIM) and sigma.shape == (B, ACTION_DIM)
    assert new_state["hidden"].shape == (B, 1, HIDDEN)
    assert new_state["cell"].shape == (B, 1, HIDDEN)
    assert jnp.allclose(mu, mu_ref, atol=1e-5, rtol=1e-4)
    assert jnp.allclose(sigma, sigma_ref, atol=1e-5, rtol=1e-4)
    assert jnp.allclose(new_state["hidden"][:, 0, :], h_ref, atol=1e-5, rtol=1e-4)
    assert jnp.allclose(new_state["cell"][:, 0, :], c_ref, atol=1e-5, rtol=1e-4)

    # --- state carry-over path (f32) ------------------------------------------
    obs2 = jax.random.normal(k_obs2, (B, S, D_OBS), jnp.float32)
    (mu2, sigma2), state2 = recurrent_actor_prob_forward(
        obs2, params, state=new_state, max_action=MAX_ACTION,
        use_bf16_matmul=False)
    jax.block_until_ready((mu2, sigma2))
    mu2_ref, sigma2_ref, h2_ref, c2_ref = _reference_forward(
        obs2, params, h_ref, c_ref, MAX_ACTION)
    assert jnp.allclose(mu2, mu2_ref, atol=1e-5, rtol=1e-4)
    assert jnp.allclose(state2["hidden"][:, 0, :], h2_ref, atol=1e-5, rtol=1e-4)
    assert jnp.allclose(state2["cell"][:, 0, :], c2_ref, atol=1e-5, rtol=1e-4)

    # --- default path (bf16 matmul operands, f32 state): loose tolerance -----
    (mu_bf, sigma_bf), st_bf = recurrent_actor_prob_forward(
        obs, params, state=None, max_action=MAX_ACTION)
    jax.block_until_ready((mu_bf, sigma_bf, st_bf["hidden"], st_bf["cell"]))
    assert jnp.allclose(mu_bf, mu_ref, atol=5e-2, rtol=5e-2)
    assert jnp.allclose(sigma_bf, sigma_ref, atol=5e-2, rtol=5e-2)

    # --- 2-D obs path (unsqueezed to seq=1) -----------------------------------
    obs1 = obs[:, 0, :]                                      # (B, D_OBS)
    (mu1, sigma1), st1 = recurrent_actor_prob_forward(
        obs1, params, state=None, max_action=MAX_ACTION, use_bf16_matmul=False)
    jax.block_until_ready((mu1, sigma1))
    mu1_ref, sigma1_ref, h1_ref, c1_ref = _reference_forward(
        obs1[:, None, :], params, h0, c0, MAX_ACTION)
    assert jnp.allclose(mu1, mu1_ref, atol=1e-5, rtol=1e-4)
    assert jnp.allclose(st1["hidden"][:, 0, :], h1_ref, atol=1e-5, rtol=1e-4)

    print("KERNEL_OK")
</pallas_src>

<mosaic_0001>
module attributes {stable_mosaic.version = 11 : i64} {
  func.func @_lstm_recurrence_kernel(%arg0: i32, %arg1: memref<64x16xf32, #tpu.memory_space<vmem>>, %arg2: memref<16x128xf32, #tpu.memory_space<vmem>>, %arg3: memref<1x128xf32, #tpu.memory_space<vmem>>, %arg4: memref<128x512xf32, #tpu.memory_space<vmem>>, %arg5: memref<1x512xf32, #tpu.memory_space<vmem>>, %arg6: memref<128x512xf32, #tpu.memory_space<vmem>>, %arg7: memref<8x128xf32, #tpu.memory_space<vmem>>, %arg8: memref<8x128xf32, #tpu.memory_space<vmem>>, %arg9: memref<8x128xf32, #tpu.memory_space<vmem>>, %arg10: memref<8x128xf32, #tpu.memory_space<vmem>>, %arg11: memref<64x512xf32, #tpu.memory_space<vmem>>) attributes {dimension_semantics = [#tpu.dimension_semantics<arbitrary>], iteration_bounds = array<i64: 1>, scalar_prefetch = 0 : i64, scratch_operands = 1 : i64, tpu.core_type = #tpu.core_type<tc>, window_params = [{transform_indices = @transform_0, window_bounds = array<i64: 64, 16>}, {pipeline_mode = #tpu.pipeline_mode<synchronous>, transform_indices = @transform_1, window_bounds = array<i64: 16, 128>}, {pipeline_mode = #tpu.pipeline_mode<synchronous>, transform_indices = @transform_2, window_bounds = array<i64: 1, 128>}, {pipeline_mode = #tpu.pipeline_mode<synchronous>, transform_indices = @transform_3, window_bounds = array<i64: 128, 512>}, {pipeline_mode = #tpu.pipeline_mode<synchronous>, transform_indices = @transform_4, window_bounds = array<i64: 1, 512>}, {pipeline_mode = #tpu.pipeline_mode<synchronous>, transform_indices = @transform_5, window_bounds = array<i64: 128, 512>}, {pipeline_mode = #tpu.pipeline_mode<synchronous>, transform_indices = @transform_6, window_bounds = array<i64: 8, 128>}, {pipeline_mode = #tpu.pipeline_mode<synchronous>, transform_indices = @transform_7, window_bounds = array<i64: 8, 128>}, {pipeline_mode = #tpu.pipeline_mode<synchronous>, transform_indices = @transform_8, window_bounds = array<i64: 8, 128>}, {pipeline_mode = #tpu.pipeline_mode<synchronous>, transform_indices = @transform_9, window_bounds = array<i64: 8, 128>}]} {
    %c0_i32 = arith.constant 0 : i32
    %0 = arith.cmpi eq, %arg0, %c0_i32 : i32
    %1 = arith.extui %0 : i1 to i32
    %c0_i32_0 = arith.constant 0 : i32
    %2 = arith.cmpi ne, %1, %c0_i32_0 : i32
    scf.if %2 {
      %c0_87 = arith.constant 0 : index
      %c0_88 = arith.constant 0 : index
      %277 = vector.load %arg7[%c0_87, %c0_88] : memref<8x128xf32, #tpu.memory_space<vmem>>, vector<8x128xf32>
      %c0_89 = arith.constant 0 : index
      %c0_90 = arith.constant 0 : index
      %278 = vector.load %arg9[%c0_89, %c0_90] : memref<8x128xf32, #tpu.memory_space<vmem>>, vector<8x128xf32>
      tpu.vector_store %arg9[%c0_89, %c0_90], %277 {strides = array<i32>} : memref<8x128xf32, #tpu.memory_space<vmem>>, vector<8x128xf32>,
      %c0_91 = arith.constant 0 : index
      %c0_92 = arith.constant 0 : index
      %279 = vector.load %arg8[%c0_91, %c0_92] : memref<8x128xf32, #tpu.memory_space<vmem>>, vector<8x128xf32>
      %c0_93 = arith.constant 0 : index
      %c0_94 = arith.constant 0 : index
      %280 = vector.load %arg10[%c0_93, %c0_94] : memref<8x128xf32, #tpu.memory_space<vmem>>, vector<8x128xf32>
      tpu.vector_store %arg10[%c0_93, %c0_94], %279 {strides = array<i32>} : memref<8x128xf32, #tpu.memory_space<vmem>>, vector<8x128xf32>,
    } else {
    }
    %c0 = arith.constant 0 : index
    %c0_1 = arith.constant 0 : index
    %3 = vector.load %arg1[%c0, %c0_1] : memref<64x16xf32, #tpu.memory_space<vmem>>, vector<64x16xf32>
    %c0_2 = arith.constant 0 : index
    %c0_3 = arith.constant 0 : index
    %4 = vector.load %arg2[%c0_2, %c0_3] : memref<16x128xf32, #tpu.memory_space<vmem>>, vector<16x128xf32>
    %cst = arith.constant dense<0.000000e+00> : vector<64x128xf32>
    %5 = tpu.matmul %3, %4, %cst {dimension_numbers = #tpu.dot_dimension_numbers<[1], [0], [0], [1], [0, 0, 1, 1], [], []>} : vector<64x16xf32>, vector<16x128xf32>, vector<64x128xf32> -> vector<64x128xf32>
    %c0_4 = arith.constant 0 : index
    %c0_5 = arith.constant 0 : index
    %6 = vector.load %arg3[%c0_4, %c0_5] : memref<1x128xf32, #tpu.memory_space<vmem>>, vector<1x128xf32>
    %7 = vector.broadcast %6 : vector<1x128xf32> to vector<64x128xf32>
    %8 = arith.addf %5, %7 : vector<64x128xf32>
    %cst_6 = arith.constant 0.000000e+00 : f32
    %9 = vector.broadcast %cst_6 : f32 to vector<64x128xf32>
    %10 = arith.maximumf %8, %9 : vector<64x128xf32>
    %c0_7 = arith.constant 0 : index
    %c0_8 = arith.constant 0 : index
    %11 = vector.load %arg4[%c0_7, %c0_8] : memref<128x512xf32, #tpu.memory_space<vmem>>, vector<128x512xf32>
    %cst_9 = arith.constant dense<0.000000e+00> : vector<64x512xf32>
    %12 = tpu.matmul %10, %11, %cst_9 {dimension_numbers = #tpu.dot_dimension_numbers<[1], [0], [0], [1], [0, 0, 1, 1], [], []>} : vector<64x128xf32>, vector<128x512xf32>, vector<64x512xf32> -> vector<64x512xf32>
    %c0_10 = arith.constant 0 : index
    %c0_11 = arith.constant 0 : index
    %13 = vector.load %arg5[%c0_10, %c0_11] : memref<1x512xf32, #tpu.memory_space<vmem>>, vector<1x512xf32>
    %14 = vector.broadcast %13 : vector<1x512xf32> to vector<64x512xf32>
    %15 = arith.addf %12, %14 : vector<64x512xf32>
    %c0_12 = arith.constant 0 : index
    %c0_13 = arith.constant 0 : index
    %16 = vector.load %arg11[%c0_12, %c0_13] : memref<64x512xf32, #tpu.memory_space<vmem>>, vector<64x512xf32>
    tpu.vector_store %arg11[%c0_12, %c0_13], %15 {strides = array<i32>} : memref<64x512xf32, #tpu.memory_space<vmem>>, vector<64x512xf32>,
    %c0_14 = arith.constant 0 : index
    %c0_15 = arith.constant 0 : index
    %17 = vector.load %arg9[%c0_14, %c0_15] : memref<8x128xf32, #tpu.memory_space<vmem>>, vector<8x128xf32>
    %c0_16 = arith.constant 0 : index
    %c0_17 = arith.constant 0 : index
    %18 = vector.load %arg10[%c0_16, %c0_17] : memref<8x128xf32, #tpu.memory_space<vmem>>, vector<8x128xf32>
    %c0_i32_18 = arith.constant 0 : i32
    %c8_i32 = arith.constant 8 : i32
    %19 = arith.muli %c0_i32_18, %c8_i32 : i32
    %20 = tpu.assume_multiple %19, 8 : i32
    %21 = arith.index_cast %20 : i32 to index
    %c0_19 = arith.constant 0 : index
    %22 = vector.load %arg11[%21, %c0_19] : memref<64x512xf32, #tpu.memory_space<vmem>>, vector<8x512xf32>
    %c0_20 = arith.constant 0 : index
    %c0_21 = arith.constant 0 : index
    %23 = vector.load %arg6[%c0_20, %c0_21] : memref<128x512xf32, #tpu.memory_space<vmem>>, vector<128x512xf32>
    %cst_22 = arith.constant dense<0.000000e+00> : vector<8x512xf32>
    %24 = tpu.matmul %17, %23, %cst_22 {dimension_numbers = #tpu.dot_dimension_numbers<[1], [0], [0], [1], [0, 0, 1, 1], [], []>} : vector<8x128xf32>, vector<128x512xf32>, vector<8x512xf32> -> vector<8x512xf32>
    %25 = arith.addf %22, %24 : vector<8x512xf32>
    %26 = vector.extract_strided_slice %25 {offsets = [0, 0], sizes = [8, 128], strides = [1, 1]} : vector<8x512xf32> to vector<8x128xf32>
    %27 = arith.negf %26 : vector<8x128xf32>
    %28 = math.exp %27 : vector<8x128xf32>
    %cst_23 = arith.constant 1.000000e+00 : f32
    %29 = vector.broadcast %cst_23 : f32 to vector<8x128xf32>
    %30 = arith.addf %29, %28 : vector<8x128xf32>
    %31 = arith.divf %29, %30 : vector<8x128xf32>
    %32 = vector.extract_strided_slice %25 {offsets = [0, 128], sizes = [8, 128], strides = [1, 1]} : vector<8x512xf32> to vector<8x128xf32>
    %33 = arith.negf %32 : vector<8x128xf32>
    %34 = math.exp %33 : vector<8x128xf32>
    %cst_24 = arith.constant 1.000000e+00 : f32
    %35 = vector.broadcast %cst_24 : f32 to vector<8x128xf32>
    %36 = arith.addf %35, %34 : vector<8x128xf32>
    %37 = arith.divf %35, %36 : vector<8x128xf32>
    %38 = vector.extract_strided_slice %25 {offsets = [0, 256], sizes = [8, 128], strides = [1, 1]} : vector<8x512xf32> to vector<8x128xf32>
    %39 = math.tanh %38 : vector<8x128xf32>
    %40 = vector.extract_strided_slice %25 {offsets = [0, 384], sizes = [8, 128], strides = [1, 1]} : vector<8x512xf32> to vector<8x128xf32>
    %41 = arith.negf %40 : vector<8x128xf32>
    %42 = math.exp %41 : vector<8x128xf32>
    %cst_25 = arith.constant 1.000000e+00 : f32
    %43 = vector.broadcast %cst_25 : f32 to vector<8x128xf32>
    %44 = arith.addf %43, %42 : vector<8x128xf32>
    %45 = arith.divf %43, %44 : vector<8x128xf32>
    %46 = arith.mulf %37, %18 : vector<8x128xf32>
    %47 = arith.mulf %31, %39 : vector<8x128xf32>
    %48 = arith.addf %46, %47 : vector<8x128xf32>
    %49 = math.tanh %48 : vector<8x128xf32>
    %50 = arith.mulf %45, %49 : vector<8x128xf32>
    %c1_i32 = arith.constant 1 : i32
    %c8_i32_26 = arith.constant 8 : i32
    %51 = arith.muli %c1_i32, %c8_i32_26 : i32
    %52 = tpu.assume_multiple %51, 8 : i32
    %53 = arith.index_cast %52 : i32 to index
    %c0_27 = arith.constant 0 : index
    %54 = vector.load %arg11[%53, %c0_27] : memref<64x512xf32, #tpu.memory_space<vmem>>, vector<8x512xf32>
    %c0_28 = arith.constant 0 : index
    %c0_29 = arith.constant 0 : index
    %55 = vector.load %arg6[%c0_28, %c0_29] : memref<128x512xf32, #tpu.memory_space<vmem>>, vector<128x512xf32>
    %cst_30 = arith.constant dense<0.000000e+00> : vector<8x512xf32>
    %56 = tpu.matmul %50, %55, %cst_30 {dimension_numbers = #tpu.dot_dimension_numbers<[1], [0], [0], [1], [0, 0, 1, 1], [], []>} : vector<8x128xf32>, vector<128x512xf32>, vector<8x512xf32> -> vector<8x512xf32>
    %57 = arith.addf %54, %56 : vector<8x512xf32>
    %58 = vector.extract_strided_slice %57 {offsets = [0, 0], sizes = [8, 128], strides = [1, 1]} : vector<8x512xf32> to vector<8x128xf32>
    %59 = arith.negf %58 : vector<8x128xf32>
    %60 = math.exp %59 : vector<8x128xf32>
    %cst_31 = arith.constant 1.000000e+00 : f32
    %61 = vector.broadcast %cst_31 : f32 to vector<8x128xf32>
    %62 = arith.addf %61, %60 : vector<8x128xf32>
    %63 = arith.divf %61, %62 : vector<8x128xf32>
    %64 = vector.extract_strided_slice %57 {offsets = [0, 128], sizes = [8, 128], strides = [1, 1]} : vector<8x512xf32> to vector<8x128xf32>
    %65 = arith.negf %64 : vector<8x128xf32>
    %66 = math.exp %65 : vector<8x128xf32>
    %cst_32 = arith.constant 1.000000e+00 : f32
    %67 = vector.broadcast %cst_32 : f32 to vector<8x128xf32>
    %68 = arith.addf %67, %66 : vector<8x128xf32>
    %69 = arith.divf %67, %68 : vector<8x128xf32>
    %70 = vector.extract_strided_slice %57 {offsets = [0, 256], sizes = [8, 128], strides = [1, 1]} : vector<8x512xf32> to vector<8x128xf32>
    %71 = math.tanh %70 : vector<8x128xf32>
    %72 = vector.extract_strided_slice %57 {offsets = [0, 384], sizes = [8, 128], strides = [1, 1]} : vector<8x512xf32> to vector<8x128xf32>
    %73 = arith.negf %72 : vector<8x128xf32>
    %74 = math.exp %73 : vector<8x128xf32>
    %cst_33 = arith.constant 1.000000e+00 : f32
    %75 = vector.broadcast %cst_33 : f32 to vector<8x128xf32>
    %76 = arith.addf %75, %74 : vector<8x128xf32>
    %77 = arith.divf %75, %76 : vector<8x128xf32>
    %78 = arith.mulf %69, %48 : vector<8x128xf32>
    %79 = arith.mulf %63, %71 : vector<8x128xf32>
    %80 = arith.addf %78, %79 : vector<8x128xf32>
    %81 = math.tanh %80 : vector<8x128xf32>
    %82 = arith.mulf %77, %81 : vector<8x128xf32>
    %c2_i32 = arith.constant 2 : i32
    %c8_i32_34 = arith.constant 8 : i32
    %83 = arith.muli %c2_i32, %c8_i32_34 : i32
    %84 = tpu.assume_multiple %83, 8 : i32
    %85 = arith.index_cast %84 : i32 to index
    %c0_35 = arith.constant 0 : index
    %86 = vector.load %arg11[%85, %c0_35] : memref<64x512xf32, #tpu.memory_space<vmem>>, vector<8x512xf32>
    %c0_36 = arith.constant 0 : index
    %c0_37 = arith.constant 0 : index
    %87 = vector.load %arg6[%c0_36, %c0_37] : memref<128x512xf32, #tpu.memory_space<vmem>>, vector<128x512xf32>
    %cst_38 = arith.constant dense<0.000000e+00> : vector<8x512xf32>
    %88 = tpu.matmul %82, %87, %cst_38 {dimension_numbers = #tpu.dot_dimension_numbers<[1], [0], [0], [1], [0, 0, 1, 1], [], []>} : vector<8x128xf32>, vector<128x512xf32>, vector<8x512xf32> -> vector<8x512xf32>
    %89 = arith.addf %86, %88 : vector<8x512xf32>
    %90 = vector.extract_strided_slice %89 {offsets = [0, 0], sizes = [8, 128], strides = [1, 1]} : vector<8x512xf32> to vector<8x128xf32>
    %91 = arith.negf %90 : vector<8x128xf32>
    %92 = math.exp %91 : vector<8x128xf32>
    %cst_39 = arith.constant 1.000000e+00 : f32
    %93 = vector.broadcast %cst_39 : f32 to vector<8x128xf32>
    %94 = arith.addf %93, %92 : vector<8x128xf32>
    %95 = arith.divf %93, %94 : vector<8x128xf32>
    %96 = vector.extract_strided_slice %89 {offsets = [0, 128], sizes = [8, 128], strides = [1, 1]} : vector<8x512xf32> to vector<8x128xf32>
    %97 = arith.negf %96 : vector<8x128xf32>
    %98 = math.exp %97 : vector<8x128xf32>
    %cst_40 = arith.constant 1.000000e+00 : f32
    %99 = vector.broadcast %cst_40 : f32 to vector<8x128xf32>
    %100 = arith.addf %99, %98 : vector<8x128xf32>
    %101 = arith.divf %99, %100 : vector<8x128xf32>
    %102 = vector.extract_strided_slice %89 {offsets = [0, 256], sizes = [8, 128], strides = [1, 1]} : vector<8x512xf32> to vector<8x128xf32>
    %103 = math.tanh %102 : vector<8x128xf32>
    %104 = vector.extract_strided_slice %89 {offsets = [0, 384], sizes = [8, 128], strides = [1, 1]} : vector<8x512xf32> to vector<8x128xf32>
    %105 = arith.negf %104 : vector<8x128xf32>
    %106 = math.exp %105 : vector<8x128xf32>
    %cst_41 = arith.constant 1.000000e+00 : f32
    %107 = vector.broadcast %cst_41 : f32 to vector<8x128xf32>
    %108 = arith.addf %107, %106 : vector<8x128xf32>
    %109 = arith.divf %107, %108 : vector<8x128xf32>
    %110 = arith.mulf %101, %80 : vector<8x128xf32>
    %111 = arith.mulf %95, %103 : vector<8x128xf32>
    %112 = arith.addf %110, %111 : vector<8x128xf32>
    %113 = math.tanh %112 : vector<8x128xf32>
    %114 = arith.mulf %109, %113 : vector<8x128xf32>
    %c3_i32 = arith.constant 3 : i32
    %c8_i32_42 = arith.constant 8 : i32
    %115 = arith.muli %c3_i32, %c8_i32_42 : i32
    %116 = tpu.assume_multiple %115, 8 : i32
    %117 = arith.index_cast %116 : i32 to index
    %c0_43 = arith.constant 0 : index
    %118 = vector.load %arg11[%117, %c0_43] : memref<64x512xf32, #tpu.memory_space<vmem>>, vector<8x512xf32>
    %c0_44 = arith.constant 0 : index
    %c0_45 = arith.constant 0 : index
    %119 = vector.load %arg6[%c0_44, %c0_45] : memref<128x512xf32, #tpu.memory_space<vmem>>, vector<128x512xf32>
    %cst_46 = arith.constant dense<0.000000e+00> : vector<8x512xf32>
    %120 = tpu.matmul %114, %119, %cst_46 {dimension_numbers = #tpu.dot_dimension_numbers<[1], [0], [0], [1], [0, 0, 1, 1], [], []>} : vector<8x128xf32>, vector<128x512xf32>, vector<8x512xf32> -> vector<8x512xf32>
    %121 = arith.addf %118, %120 : vector<8x512xf32>
    %122 = vector.extract_strided_slice %121 {offsets = [0, 0], sizes = [8, 128], strides = [1, 1]} : vector<8x512xf32> to vector<8x128xf32>
    %123 = arith.negf %122 : vector<8x128xf32>
    %124 = math.exp %123 : vector<8x128xf32>
    %cst_47 = arith.constant 1.000000e+00 : f32
    %125 = vector.broadcast %cst_47 : f32 to vector<8x128xf32>
    %126 = arith.addf %125, %124 : vector<8x128xf32>
    %127 = arith.divf %125, %126 : vector<8x128xf32>
    %128 = vector.extract_strided_slice %121 {offsets = [0, 128], sizes = [8, 128], strides = [1, 1]} : vector<8x512xf32> to vector<8x128xf32>
    %129 = arith.negf %128 : vector<8x128xf32>
    %130 = math.exp %129 : vector<8x128xf32>
    %cst_48 = arith.constant 1.000000e+00 : f32
    %131 = vector.broadcast %cst_48 : f32 to vector<8x128xf32>
    %132 = arith.addf %131, %130 : vector<8x128xf32>
    %133 = arith.divf %131, %132 : vector<8x128xf32>
    %134 = vector.extract_strided_slice %121 {offsets = [0, 256], sizes = [8, 128], strides = [1, 1]} : vector<8x512xf32> to vector<8x128xf32>
    %135 = math.tanh %134 : vector<8x128xf32>
    %136 = vector.extract_strided_slice %121 {offsets = [0, 384], sizes = [8, 128], strides = [1, 1]} : vector<8x512xf32> to vector<8x128xf32>
    %137 = arith.negf %136 : vector<8x128xf32>
    %138 = math.exp %137 : vector<8x128xf32>
    %cst_49 = arith.constant 1.000000e+00 : f32
    %139 = vector.broadcast %cst_49 : f32 to vector<8x128xf32>
    %140 = arith.addf %139, %138 : vector<8x128xf32>
    %141 = arith.divf %139, %140 : vector<8x128xf32>
    %142 = arith.mulf %133, %112 : vector<8x128xf32>
    %143 = arith.mulf %127, %135 : vector<8x128xf32>
    %144 = arith.addf %142, %143 : vector<8x128xf32>
    %145 = math.tanh %144 : vector<8x128xf32>
    %146 = arith.mulf %141, %145 : vector<8x128xf32>
    %c4_i32 = arith.constant 4 : i32
    %c8_i32_50 = arith.constant 8 : i32
    %147 = arith.muli %c4_i32, %c8_i32_50 : i32
    %148 = tpu.assume_multiple %147, 8 : i32
    %149 = arith.index_cast %148 : i32 to index
    %c0_51 = arith.constant 0 : index
    %150 = vector.load %arg11[%149, %c0_51] : memref<64x512xf32, #tpu.memory_space<vmem>>, vector<8x512xf32>
    %c0_52 = arith.constant 0 : index
    %c0_53 = arith.constant 0 : index
    %151 = vector.load %arg6[%c0_52, %c0_53] : memref<128x512xf32, #tpu.memory_space<vmem>>, vector<128x512xf32>
    %cst_54 = arith.constant dense<0.000000e+00> : vector<8x512xf32>
    %152 = tpu.matmul %146, %151, %cst_54 {dimension_numbers = #tpu.dot_dimension_numbers<[1], [0], [0], [1], [0, 0, 1, 1], [], []>} : vector<8x128xf32>, vector<128x512xf32>, vector<8x512xf32> -> vector<8x512xf32>
    %153 = arith.addf %150, %152 : vector<8x512xf32>
    %154 = vector.extract_strided_slice %153 {offsets = [0, 0], sizes = [8, 128], strides = [1, 1]} : vector<8x512xf32> to vector<8x128xf32>
    %155 = arith.negf %154 : vector<8x128xf32>
    %156 = math.exp %155 : vector<8x128xf32>
    %cst_55 = arith.constant 1.000000e+00 : f32
    %157 = vector.broadcast %cst_55 : f32 to vector<8x128xf32>
    %158 = arith.addf %157, %156 : vector<8x128xf32>
    %159 = arith.divf %157, %158 : vector<8x128xf32>
    %160 = vector.extract_strided_slice %153 {offsets = [0, 128], sizes = [8, 128], strides = [1, 1]} : vector<8x512xf32> to vector<8x128xf32>
    %161 = arith.negf %160 : vector<8x128xf32>
    %162 = math.exp %161 : vector<8x128xf32>
    %cst_56 = arith.constant 1.000000e+00 : f32
    %163 = vector.broadcast %cst_56 : f32 to vector<8x128xf32>
    %164 = arith.addf %163, %162 : vector<8x128xf32>
    %165 = arith.divf %163, %164 : vector<8x128xf32>
    %166 = vector.extract_strided_slice %153 {offsets = [0, 256], sizes = [8, 128], strides = [1, 1]} : vector<8x512xf32> to vector<8x128xf32>
    %167 = math.tanh %166 : vector<8x128xf32>
    %168 = vector.extract_strided_slice %153 {offsets = [0, 384], sizes = [8, 128], strides = [1, 1]} : vector<8x512xf32> to vector<8x128xf32>
    %169 = arith.negf %168 : vector<8x128xf32>
    %170 = math.exp %169 : vector<8x128xf32>
    %cst_57 = arith.constant 1.000000e+00 : f32
    %171 = vector.broadcast %cst_57 : f32 to vector<8x128xf32>
    %172 = arith.addf %171, %170 : vector<8x128xf32>
    %173 = arith.divf %171, %172 : vector<8x128xf32>
    %174 = arith.mulf %165, %144 : vector<8x128xf32>
    %175 = arith.mulf %159, %167 : vector<8x128xf32>
    %176 = arith.addf %174, %175 : vector<8x128xf32>
    %177 = math.tanh %176 : vector<8x128xf32>
    %178 = arith.mulf %173, %177 : vector<8x128xf32>
    %c5_i32 = arith.constant 5 : i32
    %c8_i32_58 = arith.constant 8 : i32
    %179 = arith.muli %c5_i32, %c8_i32_58 : i32
    %180 = tpu.assume_multiple %179, 8 : i32
    %181 = arith.index_cast %180 : i32 to index
    %c0_59 = arith.constant 0 : index
    %182 = vector.load %arg11[%181, %c0_59] : memref<64x512xf32, #tpu.memory_space<vmem>>, vector<8x512xf32>
    %c0_60 = arith.constant 0 : index
    %c0_61 = arith.constant 0 : index
    %183 = vector.load %arg6[%c0_60, %c0_61] : memref<128x512xf32, #tpu.memory_space<vmem>>, vector<128x512xf32>
    %cst_62 = arith.constant dense<0.000000e+00> : vector<8x512xf32>
    %184 = tpu.matmul %178, %183, %cst_62 {dimension_numbers = #tpu.dot_dimension_numbers<[1], [0], [0], [1], [0, 0, 1, 1], [], []>} : vector<8x128xf32>, vector<128x512xf32>, vector<8x512xf32> -> vector<8x512xf32>
    %185 = arith.addf %182, %184 : vector<8x512xf32>
    %186 = vector.extract_strided_slice %185 {offsets = [0, 0], sizes = [8, 128], strides = [1, 1]} : vector<8x512xf32> to vector<8x128xf32>
    %187 = arith.negf %186 : vector<8x128xf32>
    %188 = math.exp %187 : vector<8x128xf32>
    %cst_63 = arith.constant 1.000000e+00 : f32
    %189 = vector.broadcast %cst_63 : f32 to vector<8x128xf32>
    %190 = arith.addf %189, %188 : vector<8x128xf32>
    %191 = arith.divf %189, %190 : vector<8x128xf32>
    %192 = vector.extract_strided_slice %185 {offsets = [0, 128], sizes = [8, 128], strides = [1, 1]} : vector<8x512xf32> to vector<8x128xf32>
    %193 = arith.negf %192 : vector<8x128xf32>
    %194 = math.exp %193 : vector<8x128xf32>
    %cst_64 = arith.constant 1.000000e+00 : f32
    %195 = vector.broadcast %cst_64 : f32 to vector<8x128xf32>
    %196 = arith.addf %195, %194 : vector<8x128xf32>
    %197 = arith.divf %195, %196 : vector<8x128xf32>
    %198 = vector.extract_strided_slice %185 {offsets = [0, 256], sizes = [8, 128], strides = [1, 1]} : vector<8x512xf32> to vector<8x128xf32>
    %199 = math.tanh %198 : vector<8x128xf32>
    %200 = vector.extract_strided_slice %185 {offsets = [0, 384], sizes = [8, 128], strides = [1, 1]} : vector<8x512xf32> to vector<8x128xf32>
    %201 = arith.negf %200 : vector<8x128xf32>
    %202 = math.exp %201 : vector<8x128xf32>
    %cst_65 = arith.constant 1.000000e+00 : f32
    %203 = vector.broadcast %cst_65 : f32 to vector<8x128xf32>
    %204 = arith.addf %203, %202 : vector<8x128xf32>
    %205 = arith.divf %203, %204 : vector<8x128xf32>
    %206 = arith.mulf %197, %176 : vector<8x128xf32>
    %207 = arith.mulf %191, %199 : vector<8x128xf32>
    %208 = arith.addf %206, %207 : vector<8x128xf32>
    %209 = math.tanh %208 : vector<8x128xf32>
    %210 = arith.mulf %205, %209 : vector<8x128xf32>
    %c6_i32 = arith.constant 6 : i32
    %c8_i32_66 = arith.constant 8 : i32
    %211 = arith.muli %c6_i32, %c8_i32_66 : i32
    %212 = tpu.assume_multiple %211, 8 : i32
    %213 = arith.index_cast %212 : i32 to index
    %c0_67 = arith.constant 0 : index
    %214 = vector.load %arg11[%213, %c0_67] : memref<64x512xf32, #tpu.memory_space<vmem>>, vector<8x512xf32>
    %c0_68 = arith.constant 0 : index
    %c0_69 = arith.constant 0 : index
    %215 = vector.load %arg6[%c0_68, %c0_69] : memref<128x512xf32, #tpu.memory_space<vmem>>, vector<128x512xf32>
    %cst_70 = arith.constant dense<0.000000e+00> : vector<8x512xf32>
    %216 = tpu.matmul %210, %215, %cst_70 {dimension_numbers = #tpu.dot_dimension_numbers<[1], [0], [0], [1], [0, 0, 1, 1], [], []>} : vector<8x128xf32>, vector<128x512xf32>, vector<8x512xf32> -> vector<8x512xf32>
    %217 = arith.addf %214, %216 : vector<8x512xf32>
    %218 = vector.extract_strided_slice %217 {offsets = [0, 0], sizes = [8, 128], strides = [1, 1]} : vector<8x512xf32> to vector<8x128xf32>
    %219 = arith.negf %218 : vector<8x128xf32>
    %220 = math.exp %219 : vector<8x128xf32>
    %cst_71 = arith.constant 1.000000e+00 : f32
    %221 = vector.broadcast %cst_71 : f32 to vector<8x128xf32>
    %222 = arith.addf %221, %220 : vector<8x128xf32>
    %223 = arith.divf %221, %222 : vector<8x128xf32>
    %224 = vector.extract_strided_slice %217 {offsets = [0, 128], sizes = [8, 128], strides = [1, 1]} : vector<8x512xf32> to vector<8x128xf32>
    %225 = arith.negf %224 : vector<8x128xf32>
    %226 = math.exp %225 : vector<8x128xf32>
    %cst_72 = arith.constant 1.000000e+00 : f32
    %227 = vector.broadcast %cst_72 : f32 to vector<8x128xf32>
    %228 = arith.addf %227, %226 : vector<8x128xf32>
    %229 = arith.divf %227, %228 : vector<8x128xf32>
    %230 = vector.extract_strided_slice %217 {offsets = [0, 256], sizes = [8, 128], strides = [1, 1]} : vector<8x512xf32> to vector<8x128xf32>
    %231 = math.tanh %230 : vector<8x128xf32>
    %232 = vector.extract_strided_slice %217 {offsets = [0, 384], sizes = [8, 128], strides = [1, 1]} : vector<8x512xf32> to vector<8x128xf32>
    %233 = arith.negf %232 : vector<8x128xf32>
    %234 = math.exp %233 : vector<8x128xf32>
    %cst_73 = arith.constant 1.000000e+00 : f32
    %235 = vector.broadcast %cst_73 : f32 to vector<8x128xf32>
    %236 = arith.addf %235, %234 : vector<8x128xf32>
    %237 = arith.divf %235, %236 : vector<8x128xf32>
    %238 = arith.mulf %229, %208 : vector<8x128xf32>
    %239 = arith.mulf %223, %231 : vector<8x128xf32>
    %240 = arith.addf %238, %239 : vector<8x128xf32>
    %241 = math.tanh %240 : vector<8x128xf32>
    %242 = arith.mulf %237, %241 : vector<8x128xf32>
    %c7_i32 = arith.constant 7 : i32
    %c8_i32_74 = arith.constant 8 : i32
    %243 = arith.muli %c7_i32, %c8_i32_74 : i32
    %244 = tpu.assume_multiple %243, 8 : i32
    %245 = arith.index_cast %244 : i32 to index
    %c0_75 = arith.constant 0 : index
    %246 = vector.load %arg11[%245, %c0_75] : memref<64x512xf32, #tpu.memory_space<vmem>>, vector<8x512xf32>
    %c0_76 = arith.constant 0 : index
    %c0_77 = arith.constant 0 : index
    %247 = vector.load %arg6[%c0_76, %c0_77] : memref<128x512xf32, #tpu.memory_space<vmem>>, vector<128x512xf32>
    %cst_78 = arith.constant dense<0.000000e+00> : vector<8x512xf32>
    %248 = tpu.matmul %242, %247, %cst_78 {dimension_numbers = #tpu.dot_dimension_numbers<[1], [0], [0], [1], [0, 0, 1, 1], [], []>} : vector<8x128xf32>, vector<128x512xf32>, vector<8x512xf32> -> vector<8x512xf32>
    %249 = arith.addf %246, %248 : vector<8x512xf32>
    %250 = vector.extract_strided_slice %249 {offsets = [0, 0], sizes = [8, 128], strides = [1, 1]} : vector<8x512xf32> to vector<8x128xf32>
    %251 = arith.negf %250 : vector<8x128xf32>
    %252 = math.exp %251 : vector<8x128xf32>
    %cst_79 = arith.constant 1.000000e+00 : f32
    %253 = vector.broadcast %cst_79 : f32 to vector<8x128xf32>
    %254 = arith.addf %253, %252 : vector<8x128xf32>
    %255 = arith.divf %253, %254 : vector<8x128xf32>
    %256 = vector.extract_strided_slice %249 {offsets = [0, 128], sizes = [8, 128], strides = [1, 1]} : vector<8x512xf32> to vector<8x128xf32>
    %257 = arith.negf %256 : vector<8x128xf32>
    %258 = math.exp %257 : vector<8x128xf32>
    %cst_80 = arith.constant 1.000000e+00 : f32
    %259 = vector.broadcast %cst_80 : f32 to vector<8x128xf32>
    %260 = arith.addf %259, %258 : vector<8x128xf32>
    %261 = arith.divf %259, %260 : vector<8x128xf32>
    %262 = vector.extract_strided_slice %249 {offsets = [0, 256], sizes = [8, 128], strides = [1, 1]} : vector<8x512xf32> to vector<8x128xf32>
    %263 = math.tanh %262 : vector<8x128xf32>
    %264 = vector.extract_strided_slice %249 {offsets = [0, 384], sizes = [8, 128], strides = [1, 1]} : vector<8x512xf32> to vector<8x128xf32>
    %265 = arith.negf %264 : vector<8x128xf32>
    %266 = math.exp %265 : vector<8x128xf32>
    %cst_81 = arith.constant 1.000000e+00 : f32
    %267 = vector.broadcast %cst_81 : f32 to vector<8x128xf32>
    %268 = arith.addf %267, %266 : vector<8x128xf32>
    %269 = arith.divf %267, %268 : vector<8x128xf32>
    %270 = arith.mulf %261, %240 : vector<8x128xf32>
    %271 = arith.mulf %255, %263 : vector<8x128xf32>
    %272 = arith.addf %270, %271 : vector<8x128xf32>
    %273 = math.tanh %272 : vector<8x128xf32>
    %274 = arith.mulf %269, %273 : vector<8x128xf32>
    %c8_i32_82 = arith.constant 8 : i32
    %c0_83 = arith.constant 0 : index
    %c0_84 = arith.constant 0 : index
    %275 = vector.load %arg9[%c0_83, %c0_84] : memref<8x128xf32, #tpu.memory_space<vmem>>, vector<8x128xf32>
    tpu.vector_store %arg9[%c0_83, %c0_84], %274 {strides = array<i32>} : memref<8x128xf32, #tpu.memory_space<vmem>>, vector<8x128xf32>,
    %c0_85 = arith.constant 0 : index
    %c0_86 = arith.constant 0 : index
    %276 = vector.load %arg10[%c0_85, %c0_86] : memref<8x128xf32, #tpu.memory_space<vmem>>, vector<8x128xf32>
    tpu.vector_store %arg10[%c0_85, %c0_86], %272 {strides = array<i32>} : memref<8x128xf32, #tpu.memory_space<vmem>>, vector<8x128xf32>,
    return
  }
  func.func @transform_0(%arg0: i32) -> (i32, i32) {
    %c0_i32 = arith.constant 0 : i32
    %c0_i32_0 = arith.constant 0 : i32
    return %arg0, %c0_i32 : i32, i32
  }
  func.func @transform_1(%arg0: i32) -> (i32, i32) {
    %c0_i32 = arith.constant 0 : i32
    %c0_i32_0 = arith.constant 0 : i32
    %c0_i32_1 = arith.constant 0 : i32
    return %c0_i32, %c0_i32_0 : i32, i32
  }
  func.func @transform_2(%arg0: i32) -> (i32, i32) {
    %c0_i32 = arith.constant 0 : i32
    %c0_i32_0 = arith.constant 0 : i32
    %c0_i32_1 = arith.constant 0 : i32
    return %c0_i32, %c0_i32_0 : i32, i32
  }
  func.func @transform_3(%arg0: i32) -> (i32, i32) {
    %c0_i32 = arith.constant 0 : i32
    %c0_i32_0 = arith.constant 0 : i32
    %c0_i32_1 = arith.constant 0 : i32
    return %c0_i32, %c0_i32_0 : i32, i32
  }
  func.func @transform_4(%arg0: i32) -> (i32, i32) {
    %c0_i32 = arith.constant 0 : i32
    %c0_i32_0 = arith.constant 0 : i32
    %c0_i32_1 = arith.constant 0 : i32
    return %c0_i32, %c0_i32_0 : i32, i32
  }
  func.func @transform_5(%arg0: i32) -> (i32, i32) {
    %c0_i32 = arith.constant 0 : i32
    %c0_i32_0 = arith.constant 0 : i32
    %c0_i32_1 = arith.constant 0 : i32
    return %c0_i32, %c0_i32_0 : i32, i32
  }
  func.func @transform_6(%arg0: i32) -> (i32, i32) {
    %c0_i32 = arith.constant 0 : i32
    %c0_i32_0 = arith.constant 0 : i32
    %c0_i32_1 = arith.constant 0 : i32
    return %c0_i32, %c0_i32_0 : i32, i32
  }
  func.func @transform_7(%arg0: i32) -> (i32, i32) {
    %c0_i32 = arith.constant 0 : i32
    %c0_i32_0 = arith.constant 0 : i32
    %c0_i32_1 = arith.constant 0 : i32
    return %c0_i32, %c0_i32_0 : i32, i32
  }
  func.func @transform_8(%arg0: i32) -> (i32, i32) {
    %c0_i32 = arith.constant 0 : i32
    %c0_i32_0 = arith.constant 0 : i32
    %c0_i32_1 = arith.constant 0 : i32
    return %c0_i32, %c0_i32_0 : i32, i32
  }
  func.func @transform_9(%arg0: i32) -> (i32, i32) {
    %c0_i32 = arith.constant 0 : i32
    %c0_i32_0 = arith.constant 0 : i32
    %c0_i32_1 = arith.constant 0 : i32
    return %c0_i32, %c0_i32_0 : i32, i32
  }
}

module attributes {stable_mosaic.version = 11 : i64} {
  func.func @_lstm_recurrence_kernel(%arg0: i32, %arg1: memref<64x16xf32, #tpu.memory_space<vmem>>, %arg2: memref<16x128xf32, #tpu.memory_space<vmem>>, %arg3: memref<1x128xf32, #tpu.memory_space<vmem>>, %arg4: memref<128x512xf32, #tpu.memory_space<vmem>>, %arg5: memref<1x512xf32, #tpu.memory_space<vmem>>, %arg6: memref<128x512xf32, #tpu.memory_space<vmem>>, %arg7: memref<8x128xf32, #tpu.memory_space<vmem>>, %arg8: memref<8x128xf32, #tpu.memory_space<vmem>>, %arg9: memref<8x128xf32, #tpu.memory_space<vmem>>, %arg10: memref<8x128xf32, #tpu.memory_space<vmem>>, %arg11: memref<64x512xf32, #tpu.memory_space<vmem>>) attributes {dimension_semantics = [#tpu.dimension_semantics<arbitrary>], iteration_bounds = array<i64: 1>, scalar_prefetch = 0 : i64, scratch_operands = 1 : i64, tpu.core_type = #tpu.core_type<tc>, window_params = [{transform_indices = @transform_0, window_bounds = array<i64: 64, 16>}, {pipeline_mode = #tpu.pipeline_mode<synchronous>, transform_indices = @transform_1, window_bounds = array<i64: 16, 128>}, {pipeline_mode = #tpu.pipeline_mode<synchronous>, transform_indices = @transform_2, window_bounds = array<i64: 1, 128>}, {pipeline_mode = #tpu.pipeline_mode<synchronous>, transform_indices = @transform_3, window_bounds = array<i64: 128, 512>}, {pipeline_mode = #tpu.pipeline_mode<synchronous>, transform_indices = @transform_4, window_bounds = array<i64: 1, 512>}, {pipeline_mode = #tpu.pipeline_mode<synchronous>, transform_indices = @transform_5, window_bounds = array<i64: 128, 512>}, {pipeline_mode = #tpu.pipeline_mode<synchronous>, transform_indices = @transform_6, window_bounds = array<i64: 8, 128>}, {pipeline_mode = #tpu.pipeline_mode<synchronous>, transform_indices = @transform_7, window_bounds = array<i64: 8, 128>}, {pipeline_mode = #tpu.pipeline_mode<synchronous>, transform_indices = @transform_8, window_bounds = array<i64: 8, 128>}, {pipeline_mode = #tpu.pipeline_mode<synchronous>, transform_indices = @transform_9, window_bounds = array<i64: 8, 128>}]} {
    %c0_i32 = arith.constant 0 : i32
    %0 = arith.cmpi eq, %arg0, %c0_i32 : i32
    %1 = arith.extui %0 : i1 to i32
    %c0_i32_0 = arith.constant 0 : i32
    %2 = arith.cmpi ne, %1, %c0_i32_0 : i32
    scf.if %2 {
      %c0_87 = arith.constant 0 : index
      %c0_88 = arith.constant 0 : index
      %277 = vector.load %arg7[%c0_87, %c0_88] : memref<8x128xf32, #tpu.memory_space<vmem>>, vector<8x128xf32>
      %c0_89 = arith.constant 0 : index
      %c0_90 = arith.constant 0 : index
      %278 = vector.load %arg9[%c0_89, %c0_90] : memref<8x128xf32, #tpu.memory_space<vmem>>, vector<8x128xf32>
      tpu.vector_store %arg9[%c0_89, %c0_90], %277 {strides = array<i32>} : memref<8x128xf32, #tpu.memory_space<vmem>>, vector<8x128xf32>,
      %c0_91 = arith.constant 0 : index
      %c0_92 = arith.constant 0 : index
      %279 = vector.load %arg8[%c0_91, %c0_92] : memref<8x128xf32, #tpu.memory_space<vmem>>, vector<8x128xf32>
      %c0_93 = arith.constant 0 : index
      %c0_94 = arith.constant 0 : index
      %280 = vector.load %arg10[%c0_93, %c0_94] : memref<8x128xf32, #tpu.memory_space<vmem>>, vector<8x128xf32>
      tpu.vector_store %arg10[%c0_93, %c0_94], %279 {strides = array<i32>} : memref<8x128xf32, #tpu.memory_space<vmem>>, vector<8x128xf32>,
    } else {
    }
    %c0 = arith.constant 0 : index
    %c0_1 = arith.constant 0 : index
    %3 = vector.load %arg1[%c0, %c0_1] : memref<64x16xf32, #tpu.memory_space<vmem>>, vector<64x16xf32>
    %c0_2 = arith.constant 0 : index
    %c0_3 = arith.constant 0 : index
    %4 = vector.load %arg2[%c0_2, %c0_3] : memref<16x128xf32, #tpu.memory_space<vmem>>, vector<16x128xf32>
    %cst = arith.constant dense<0.000000e+00> : vector<64x128xf32>
    %5 = tpu.matmul %3, %4, %cst {dimension_numbers = #tpu.dot_dimension_numbers<[1], [0], [0], [1], [0, 0, 1, 1], [], []>} : vector<64x16xf32>, vector<16x128xf32>, vector<64x128xf32> -> vector<64x128xf32>
    %c0_4 = arith.constant 0 : index
    %c0_5 = arith.constant 0 : index
    %6 = vector.load %arg3[%c0_4, %c0_5] : memref<1x128xf32, #tpu.memory_space<vmem>>, vector<1x128xf32>
    %7 = vector.broadcast %6 : vector<1x128xf32> to vector<64x128xf32>
    %8 = arith.addf %5, %7 : vector<64x128xf32>
    %cst_6 = arith.constant 0.000000e+00 : f32
    %9 = vector.broadcast %cst_6 : f32 to vector<64x128xf32>
    %10 = arith.maximumf %8, %9 : vector<64x128xf32>
    %c0_7 = arith.constant 0 : index
    %c0_8 = arith.constant 0 : index
    %11 = vector.load %arg4[%c0_7, %c0_8] : memref<128x512xf32, #tpu.memory_space<vmem>>, vector<128x512xf32>
    %cst_9 = arith.constant dense<0.000000e+00> : vector<64x512xf32>
    %12 = tpu.matmul %10, %11, %cst_9 {dimension_numbers = #tpu.dot_dimension_numbers<[1], [0], [0], [1], [0, 0, 1, 1], [], []>} : vector<64x128xf32>, vector<128x512xf32>, vector<64x512xf32> -> vector<64x512xf32>
    %c0_10 = arith.constant 0 : index
    %c0_11 = arith.constant 0 : index
    %13 = vector.load %arg5[%c0_10, %c0_11] : memref<1x512xf32, #tpu.memory_space<vmem>>, vector<1x512xf32>
    %14 = vector.broadcast %13 : vector<1x512xf32> to vector<64x512xf32>
    %15 = arith.addf %12, %14 : vector<64x512xf32>
    %c0_12 = arith.constant 0 : index
    %c0_13 = arith.constant 0 : index
    %16 = vector.load %arg11[%c0_12, %c0_13] : memref<64x512xf32, #tpu.memory_space<vmem>>, vector<64x512xf32>
    tpu.vector_store %arg11[%c0_12, %c0_13], %15 {strides = array<i32>} : memref<64x512xf32, #tpu.memory_space<vmem>>, vector<64x512xf32>,
    %c0_14 = arith.constant 0 : index
    %c0_15 = arith.constant 0 : index
    %17 = vector.load %arg9[%c0_14, %c0_15] : memref<8x128xf32, #tpu.memory_space<vmem>>, vector<8x128xf32>
    %c0_16 = arith.constant 0 : index
    %c0_17 = arith.constant 0 : index
    %18 = vector.load %arg10[%c0_16, %c0_17] : memref<8x128xf32, #tpu.memory_space<vmem>>, vector<8x128xf32>
    %c0_i32_18 = arith.constant 0 : i32
    %c8_i32 = arith.constant 8 : i32
    %19 = arith.muli %c0_i32_18, %c8_i32 : i32
    %20 = tpu.assume_multiple %19, 8 : i32
    %21 = arith.index_cast %20 : i32 to index
    %c0_19 = arith.constant 0 : index
    %22 = vector.load %arg11[%21, %c0_19] : memref<64x512xf32, #tpu.memory_space<vmem>>, vector<8x512xf32>
    %c0_20 = arith.constant 0 : index
    %c0_21 = arith.constant 0 : index
    %23 = vector.load %arg6[%c0_20, %c0_21] : memref<128x512xf32, #tpu.memory_space<vmem>>, vector<128x512xf32>
    %cst_22 = arith.constant dense<0.000000e+00> : vector<8x512xf32>
    %24 = tpu.matmul %17, %23, %cst_22 {dimension_numbers = #tpu.dot_dimension_numbers<[1], [0], [0], [1], [0, 0, 1, 1], [], []>} : vector<8x128xf32>, vector<128x512xf32>, vector<8x512xf32> -> vector<8x512xf32>
    %25 = arith.addf %22, %24 : vector<8x512xf32>
    %26 = vector.extract_strided_slice %25 {offsets = [0, 0], sizes = [8, 128], strides = [1, 1]} : vector<8x512xf32> to vector<8x128xf32>
    %27 = arith.negf %26 : vector<8x128xf32>
    %28 = math.exp %27 : vector<8x128xf32>
    %cst_23 = arith.constant 1.000000e+00 : f32
    %29 = vector.broadcast %cst_23 : f32 to vector<8x128xf32>
    %30 = arith.addf %29, %28 : vector<8x128xf32>
    %31 = arith.divf %29, %30 : vector<8x128xf32>
    %32 = vector.extract_strided_slice %25 {offsets = [0, 128], sizes = [8, 128], strides = [1, 1]} : vector<8x512xf32> to vector<8x128xf32>
    %33 = arith.negf %32 : vector<8x128xf32>
    %34 = math.exp %33 : vector<8x128xf32>
    %cst_24 = arith.constant 1.000000e+00 : f32
    %35 = vector.broadcast %cst_24 : f32 to vector<8x128xf32>
    %36 = arith.addf %35, %34 : vector<8x128xf32>
    %37 = arith.divf %35, %36 : vector<8x128xf32>
    %38 = vector.extract_strided_slice %25 {offsets = [0, 256], sizes = [8, 128], strides = [1, 1]} : vector<8x512xf32> to vector<8x128xf32>
    %39 = math.tanh %38 : vector<8x128xf32>
    %40 = vector.extract_strided_slice %25 {offsets = [0, 384], sizes = [8, 128], strides = [1, 1]} : vector<8x512xf32> to vector<8x128xf32>
    %41 = arith.negf %40 : vector<8x128xf32>
    %42 = math.exp %41 : vector<8x128xf32>
    %cst_25 = arith.constant 1.000000e+00 : f32
    %43 = vector.broadcast %cst_25 : f32 to vector<8x128xf32>
    %44 = arith.addf %43, %42 : vector<8x128xf32>
    %45 = arith.divf %43, %44 : vector<8x128xf32>
    %46 = arith.mulf %37, %18 : vector<8x128xf32>
    %47 = arith.mulf %31, %39 : vector<8x128xf32>
    %48 = arith.addf %46, %47 : vector<8x128xf32>
    %49 = math.tanh %48 : vector<8x128xf32>
    %50 = arith.mulf %45, %49 : vector<8x128xf32>
    %c1_i32 = arith.constant 1 : i32
    %c8_i32_26 = arith.constant 8 : i32
    %51 = arith.muli %c1_i32, %c8_i32_26 : i32
    %52 = tpu.assume_multiple %51, 8 : i32
    %53 = arith.index_cast %52 : i32 to index
    %c0_27 = arith.constant 0 : index
    %54 = vector.load %arg11[%53, %c0_27] : memref<64x512xf32, #tpu.memory_space<vmem>>, vector<8x512xf32>
    %c0_28 = arith.constant 0 : index
    %c0_29 = arith.constant 0 : index
    %55 = vector.load %arg6[%c0_28, %c0_29] : memref<128x512xf32, #tpu.memory_space<vmem>>, vector<128x512xf32>
    %cst_30 = arith.constant dense<0.000000e+00> : vector<8x512xf32>
    %56 = tpu.matmul %50, %55, %cst_30 {dimension_numbers = #tpu.dot_dimension_numbers<[1], [0], [0], [1], [0, 0, 1, 1], [], []>} : vector<8x128xf32>, vector<128x512xf32>, vector<8x512xf32> -> vector<8x512xf32>
    %57 = arith.addf %54, %56 : vector<8x512xf32>
    %58 = vector.extract_strided_slice %57 {offsets = [0, 0], sizes = [8, 128], strides = [1, 1]} : vector<8x512xf32> to vector<8x128xf32>
    %59 = arith.negf %58 : vector<8x128xf32>
    %60 = math.exp %59 : vector<8x128xf32>
    %cst_31 = arith.constant 1.000000e+00 : f32
    %61 = vector.broadcast %cst_31 : f32 to vector<8x128xf32>
    %62 = arith.addf %61, %60 : vector<8x128xf32>
    %63 = arith.divf %61, %62 : vector<8x128xf32>
    %64 = vector.extract_strided_slice %57 {offsets = [0, 128], sizes = [8, 128], strides = [1, 1]} : vector<8x512xf32> to vector<8x128xf32>
    %65 = arith.negf %64 : vector<8x128xf32>
    %66 = math.exp %65 : vector<8x128xf32>
    %cst_32 = arith.constant 1.000000e+00 : f32
    %67 = vector.broadcast %cst_32 : f32 to vector<8x128xf32>
    %68 = arith.addf %67, %66 : vector<8x128xf32>
    %69 = arith.divf %67, %68 : vector<8x128xf32>
    %70 = vector.extract_strided_slice %57 {offsets = [0, 256], sizes = [8, 128], strides = [1, 1]} : vector<8x512xf32> to vector<8x128xf32>
    %71 = math.tanh %70 : vector<8x128xf32>
    %72 = vector.extract_strided_slice %57 {offsets = [0, 384], sizes = [8, 128], strides = [1, 1]} : vector<8x512xf32> to vector<8x128xf32>
    %73 = arith.negf %72 : vector<8x128xf32>
    %74 = math.exp %73 : vector<8x128xf32>
    %cst_33 = arith.constant 1.000000e+00 : f32
    %75 = vector.broadcast %cst_33 : f32 to vector<8x128xf32>
    %76 = arith.addf %75, %74 : vector<8x128xf32>
    %77 = arith.divf %75, %76 : vector<8x128xf32>
    %78 = arith.mulf %69, %48 : vector<8x128xf32>
    %79 = arith.mulf %63, %71 : vector<8x128xf32>
    %80 = arith.addf %78, %79 : vector<8x128xf32>
    %81 = math.tanh %80 : vector<8x128xf32>
    %82 = arith.mulf %77, %81 : vector<8x128xf32>
    %c2_i32 = arith.constant 2 : i32
    %c8_i32_34 = arith.constant 8 : i32
    %83 = arith.muli %c2_i32, %c8_i32_34 : i32
    %84 = tpu.assume_multiple %83, 8 : i32
    %85 = arith.index_cast %84 : i32 to index
    %c0_35 = arith.constant 0 : index
    %86 = vector.load %arg11[%85, %c0_35] : memref<64x512xf32, #tpu.memory_space<vmem>>, vector<8x512xf32>
    %c0_36 = arith.constant 0 : index
    %c0_37 = arith.constant 0 : index
    %87 = vector.load %arg6[%c0_36, %c0_37] : memref<128x512xf32, #tpu.memory_space<vmem>>, vector<128x512xf32>
    %cst_38 = arith.constant dense<0.000000e+00> : vector<8x512xf32>
    %88 = tpu.matmul %82, %87, %cst_38 {dimension_numbers = #tpu.dot_dimension_numbers<[1], [0], [0], [1], [0, 0, 1, 1], [], []>} : vector<8x128xf32>, vector<128x512xf32>, vector<8x512xf32> -> vector<8x512xf32>
    %89 = arith.addf %86, %88 : vector<8x512xf32>
    %90 = vector.extract_strided_slice %89 {offsets = [0, 0], sizes = [8, 128], strides = [1, 1]} : vector<8x512xf32> to vector<8x128xf32>
    %91 = arith.negf %90 : vector<8x128xf32>
    %92 = math.exp %91 : vector<8x128xf32>
    %cst_39 = arith.constant 1.000000e+00 : f32
    %93 = vector.broadcast %cst_39 : f32 to vector<8x128xf32>
    %94 = arith.addf %93, %92 : vector<8x128xf32>
    %95 = arith.divf %93, %94 : vector<8x128xf32>
    %96 = vector.extract_strided_slice %89 {offsets = [0, 128], sizes = [8, 128], strides = [1, 1]} : vector<8x512xf32> to vector<8x128xf32>
    %97 = arith.negf %96 : vector<8x128xf32>
    %98 = math.exp %97 : vector<8x128xf32>
    %cst_40 = arith.constant 1.000000e+00 : f32
    %99 = vector.broadcast %cst_40 : f32 to vector<8x128xf32>
    %100 = arith.addf %99, %98 : vector<8x128xf32>
    %101 = arith.divf %99, %100 : vector<8x128xf32>
    %102 = vector.extract_strided_slice %89 {offsets = [0, 256], sizes = [8, 128], strides = [1, 1]} : vector<8x512xf32> to vector<8x128xf32>
    %103 = math.tanh %102 : vector<8x128xf32>
    %104 = vector.extract_strided_slice %89 {offsets = [0, 384], sizes = [8, 128], strides = [1, 1]} : vector<8x512xf32> to vector<8x128xf32>
    %105 = arith.negf %104 : vector<8x128xf32>
    %106 = math.exp %105 : vector<8x128xf32>
    %cst_41 = arith.constant 1.000000e+00 : f32
    %107 = vector.broadcast %cst_41 : f32 to vector<8x128xf32>
    %108 = arith.addf %107, %106 : vector<8x128xf32>
    %109 = arith.divf %107, %108 : vector<8x128xf32>
    %110 = arith.mulf %101, %80 : vector<8x128xf32>
    %111 = arith.mulf %95, %103 : vector<8x128xf32>
    %112 = arith.addf %110, %111 : vector<8x128xf32>
    %113 = math.tanh %112 : vector<8x128xf32>
    %114 = arith.mulf %109, %113 : vector<8x128xf32>
    %c3_i32 = arith.constant 3 : i32
    %c8_i32_42 = arith.constant 8 : i32
    %115 = arith.muli %c3_i32, %c8_i32_42 : i32
    %116 = tpu.assume_multiple %115, 8 : i32
    %117 = arith.index_cast %116 : i32 to index
    %c0_43 = arith.constant 0 : index
    %118 = vector.load %arg11[%117, %c0_43] : memref<64x512xf32, #tpu.memory_space<vmem>>, vector<8x512xf32>
    %c0_44 = arith.constant 0 : index
    %c0_45 = arith.constant 0 : index
    %119 = vector.load %arg6[%c0_44, %c0_45] : memref<128x512xf32, #tpu.memory_space<vmem>>, vector<128x512xf32>
    %cst_46 = arith.constant dense<0.000000e+00> : vector<8x512xf32>
    %120 = tpu.matmul %114, %119, %cst_46 {dimension_numbers = #tpu.dot_dimension_numbers<[1], [0], [0], [1], [0, 0, 1, 1], [], []>} : vector<8x128xf32>, vector<128x512xf32>, vector<8x512xf32> -> vector<8x512xf32>
    %121 = arith.addf %118, %120 : vector<8x512xf32>
    %122 = vector.extract_strided_slice %121 {offsets = [0, 0], sizes = [8, 128], strides = [1, 1]} : vector<8x512xf32> to vector<8x128xf32>
    %123 = arith.negf %122 : vector<8x128xf32>
    %124 = math.exp %123 : vector<8x128xf32>
    %cst_47 = arith.constant 1.000000e+00 : f32
    %125 = vector.broadcast %cst_47 : f32 to vector<8x128xf32>
    %126 = arith.addf %125, %124 : vector<8x128xf32>
    %127 = arith.divf %125, %126 : vector<8x128xf32>
    %128 = vector.extract_strided_slice %121 {offsets = [0, 128], sizes = [8, 128], strides = [1, 1]} : vector<8x512xf32> to vector<8x128xf32>
    %129 = arith.negf %128 : vector<8x128xf32>
    %130 = math.exp %129 : vector<8x128xf32>
    %cst_48 = arith.constant 1.000000e+00 : f32
    %131 = vector.broadcast %cst_48 : f32 to vector<8x128xf32>
    %132 = arith.addf %131, %130 : vector<8x128xf32>
    %133 = arith.divf %131, %132 : vector<8x128xf32>
    %134 = vector.extract_strided_slice %121 {offsets = [0, 256], sizes = [8, 128], strides = [1, 1]} : vector<8x512xf32> to vector<8x128xf32>
    %135 = math.tanh %134 : vector<8x128xf32>
    %136 = vector.extract_strided_slice %121 {offsets = [0, 384], sizes = [8, 128], strides = [1, 1]} : vector<8x512xf32> to vector<8x128xf32>
    %137 = arith.negf %136 : vector<8x128xf32>
    %138 = math.exp %137 : vector<8x128xf32>
    %cst_49 = arith.constant 1.000000e+00 : f32
    %139 = vector.broadcast %cst_49 : f32 to vector<8x128xf32>
    %140 = arith.addf %139, %138 : vector<8x128xf32>
    %141 = arith.divf %139, %140 : vector<8x128xf32>
    %142 = arith.mulf %133, %112 : vector<8x128xf32>
    %143 = arith.mulf %127, %135 : vector<8x128xf32>
    %144 = arith.addf %142, %143 : vector<8x128xf32>
    %145 = math.tanh %144 : vector<8x128xf32>
    %146 = arith.mulf %141, %145 : vector<8x128xf32>
    %c4_i32 = arith.constant 4 : i32
    %c8_i32_50 = arith.constant 8 : i32
    %147 = arith.muli %c4_i32, %c8_i32_50 : i32
    %148 = tpu.assume_multiple %147, 8 : i32
    %149 = arith.index_cast %148 : i32 to index
    %c0_51 = arith.constant 0 : index
    %150 = vector.load %arg11[%149, %c0_51] : memref<64x512xf32, #tpu.memory_space<vmem>>, vector<8x512xf32>
    %c0_52 = arith.constant 0 : index
    %c0_53 = arith.constant 0 : index
    %151 = vector.load %arg6[%c0_52, %c0_53] : memref<128x512xf32, #tpu.memory_space<vmem>>, vector<128x512xf32>
    %cst_54 = arith.constant dense<0.000000e+00> : vector<8x512xf32>
    %152 = tpu.matmul %146, %151, %cst_54 {dimension_numbers = #tpu.dot_dimension_numbers<[1], [0], [0], [1], [0, 0, 1, 1], [], []>} : vector<8x128xf32>, vector<128x512xf32>, vector<8x512xf32> -> vector<8x512xf32>
    %153 = arith.addf %150, %152 : vector<8x512xf32>
    %154 = vector.extract_strided_slice %153 {offsets = [0, 0], sizes = [8, 128], strides = [1, 1]} : vector<8x512xf32> to vector<8x128xf32>
    %155 = arith.negf %154 : vector<8x128xf32>
    %156 = math.exp %155 : vector<8x128xf32>
    %cst_55 = arith.constant 1.000000e+00 : f32
    %157 = vector.broadcast %cst_55 : f32 to vector<8x128xf32>
    %158 = arith.addf %157, %156 : vector<8x128xf32>
    %159 = arith.divf %157, %158 : vector<8x128xf32>
    %160 = vector.extract_strided_slice %153 {offsets = [0, 128], sizes = [8, 128], strides = [1, 1]} : vector<8x512xf32> to vector<8x128xf32>
    %161 = arith.negf %160 : vector<8x128xf32>
    %162 = math.exp %161 : vector<8x128xf32>
    %cst_56 = arith.constant 1.000000e+00 : f32
    %163 = vector.broadcast %cst_56 : f32 to vector<8x128xf32>
    %164 = arith.addf %163, %162 : vector<8x128xf32>
    %165 = arith.divf %163, %164 : vector<8x128xf32>
    %166 = vector.extract_strided_slice %153 {offsets = [0, 256], sizes = [8, 128], strides = [1, 1]} : vector<8x512xf32> to vector<8x128xf32>
    %167 = math.tanh %166 : vector<8x128xf32>
    %168 = vector.extract_strided_slice %153 {offsets = [0, 384], sizes = [8, 128], strides = [1, 1]} : vector<8x512xf32> to vector<8x128xf32>
    %169 = arith.negf %168 : vector<8x128xf32>
    %170 = math.exp %169 : vector<8x128xf32>
    %cst_57 = arith.constant 1.000000e+00 : f32
    %171 = vector.broadcast %cst_57 : f32 to vector<8x128xf32>
    %172 = arith.addf %171, %170 : vector<8x128xf32>
    %173 = arith.divf %171, %172 : vector<8x128xf32>
    %174 = arith.mulf %165, %144 : vector<8x128xf32>
    %175 = arith.mulf %159, %167 : vector<8x128xf32>
    %176 = arith.addf %174, %175 : vector<8x128xf32>
    %177 = math.tanh %176 : vector<8x128xf32>
    %178 = arith.mulf %173, %177 : vector<8x128xf32>
    %c5_i32 = arith.constant 5 : i32
    %c8_i32_58 = arith.constant 8 : i32
    %179 = arith.muli %c5_i32, %c8_i32_58 : i32
    %180 = tpu.assume_multiple %179, 8 : i32
    %181 = arith.index_cast %180 : i32 to index
    %c0_59 = arith.constant 0 : index
    %182 = vector.load %arg11[%181, %c0_59] : memref<64x512xf32, #tpu.memory_space<vmem>>, vector<8x512xf32>
    %c0_60 = arith.constant 0 : index
    %c0_61 = arith.constant 0 : index
    %183 = vector.load %arg6[%c0_60, %c0_61] : memref<128x512xf32, #tpu.memory_space<vmem>>, vector<128x512xf32>
    %cst_62 = arith.constant dense<0.000000e+00> : vector<8x512xf32>
    %184 = tpu.matmul %178, %183, %cst_62 {dimension_numbers = #tpu.dot_dimension_numbers<[1], [0], [0], [1], [0, 0, 1, 1], [], []>} : vector<8x128xf32>, vector<128x512xf32>, vector<8x512xf32> -> vector<8x512xf32>
    %185 = arith.addf %182, %184 : vector<8x512xf32>
    %186 = vector.extract_strided_slice %185 {offsets = [0, 0], sizes = [8, 128], strides = [1, 1]} : vector<8x512xf32> to vector<8x128xf32>
    %187 = arith.negf %186 : vector<8x128xf32>
    %188 = math.exp %187 : vector<8x128xf32>
    %cst_63 = arith.constant 1.000000e+00 : f32
    %189 = vector.broadcast %cst_63 : f32 to vector<8x128xf32>
    %190 = arith.addf %189, %188 : vector<8x128xf32>
    %191 = arith.divf %189, %190 : vector<8x128xf32>
    %192 = vector.extract_strided_slice %185 {offsets = [0, 128], sizes = [8, 128], strides = [1, 1]} : vector<8x512xf32> to vector<8x128xf32>
    %193 = arith.negf %192 : vector<8x128xf32>
    %194 = math.exp %193 : vector<8x128xf32>
    %cst_64 = arith.constant 1.000000e+00 : f32
    %195 = vector.broadcast %cst_64 : f32 to vector<8x128xf32>
    %196 = arith.addf %195, %194 : vector<8x128xf32>
    %197 = arith.divf %195, %196 : vector<8x128xf32>
    %198 = vector.extract_strided_slice %185 {offsets = [0, 256], sizes = [8, 128], strides = [1, 1]} : vector<8x512xf32> to vector<8x128xf32>
    %199 = math.tanh %198 : vector<8x128xf32>
    %200 = vector.extract_strided_slice %185 {offsets = [0, 384], sizes = [8, 128], strides = [1, 1]} : vector<8x512xf32> to vector<8x128xf32>
    %201 = arith.negf %200 : vector<8x128xf32>
    %202 = math.exp %201 : vector<8x128xf32>
    %cst_65 = arith.constant 1.000000e+00 : f32
    %203 = vector.broadcast %cst_65 : f32 to vector<8x128xf32>
    %204 = arith.addf %203, %202 : vector<8x128xf32>
    %205 = arith.divf %203, %204 : vector<8x128xf32>
    %206 = arith.mulf %197, %176 : vector<8x128xf32>
    %207 = arith.mulf %191, %199 : vector<8x128xf32>
    %208 = arith.addf %206, %207 : vector<8x128xf32>
    %209 = math.tanh %208 : vector<8x128xf32>
    %210 = arith.mulf %205, %209 : vector<8x128xf32>
    %c6_i32 = arith.constant 6 : i32
    %c8_i32_66 = arith.constant 8 : i32
    %211 = arith.muli %c6_i32, %c8_i32_66 : i32
    %212 = tpu.assume_multiple %211, 8 : i32
    %213 = arith.index_cast %212 : i32 to index
    %c0_67 = arith.constant 0 : index
    %214 = vector.load %arg11[%213, %c0_67] : memref<64x512xf32, #tpu.memory_space<vmem>>, vector<8x512xf32>
    %c0_68 = arith.constant 0 : index
    %c0_69 = arith.constant 0 : index
    %215 = vector.load %arg6[%c0_68, %c0_69] : memref<128x512xf32, #tpu.memory_space<vmem>>, vector<128x512xf32>
    %cst_70 = arith.constant dense<0.000000e+00> : vector<8x512xf32>
    %216 = tpu.matmul %210, %215, %cst_70 {dimension_numbers = #tpu.dot_dimension_numbers<[1], [0], [0], [1], [0, 0, 1, 1], [], []>} : vector<8x128xf32>, vector<128x512xf32>, vector<8x512xf32> -> vector<8x512xf32>
    %217 = arith.addf %214, %216 : vector<8x512xf32>
    %218 = vector.extract_strided_slice %217 {offsets = [0, 0], sizes = [8, 128], strides = [1, 1]} : vector<8x512xf32> to vector<8x128xf32>
    %219 = arith.negf %218 : vector<8x128xf32>
    %220 = math.exp %219 : vector<8x128xf32>
    %cst_71 = arith.constant 1.000000e+00 : f32
    %221 = vector.broadcast %cst_71 : f32 to vector<8x128xf32>
    %222 = arith.addf %221, %220 : vector<8x128xf32>
    %223 = arith.divf %221, %222 : vector<8x128xf32>
    %224 = vector.extract_strided_slice %217 {offsets = [0, 128], sizes = [8, 128], strides = [1, 1]} : vector<8x512xf32> to vector<8x128xf32>
    %225 = arith.negf %224 : vector<8x128xf32>
    %226 = math.exp %225 : vector<8x128xf32>
    %cst_72 = arith.constant 1.000000e+00 : f32
    %227 = vector.broadcast %cst_72 : f32 to vector<8x128xf32>
    %228 = arith.addf %227, %226 : vector<8x128xf32>
    %229 = arith.divf %227, %228 : vector<8x128xf32>
    %230 = vector.extract_strided_slice %217 {offsets = [0, 256], sizes = [8, 128], strides = [1, 1]} : vector<8x512xf32> to vector<8x128xf32>
    %231 = math.tanh %230 : vector<8x128xf32>
    %232 = vector.extract_strided_slice %217 {offsets = [0, 384], sizes = [8, 128], strides = [1, 1]} : vector<8x512xf32> to vector<8x128xf32>
    %233 = arith.negf %232 : vector<8x128xf32>
    %234 = math.exp %233 : vector<8x128xf32>
    %cst_73 = arith.constant 1.000000e+00 : f32
    %235 = vector.broadcast %cst_73 : f32 to vector<8x128xf32>
    %236 = arith.addf %235, %234 : vector<8x128xf32>
    %237 = arith.divf %235, %236 : vector<8x128xf32>
    %238 = arith.mulf %229, %208 : vector<8x128xf32>
    %239 = arith.mulf %223, %231 : vector<8x128xf32>
    %240 = arith.addf %238, %239 : vector<8x128xf32>
    %241 = math.tanh %240 : vector<8x128xf32>
    %242 = arith.mulf %237, %241 : vector<8x128xf32>
    %c7_i32 = arith.constant 7 : i32
    %c8_i32_74 = arith.constant 8 : i32
    %243 = arith.muli %c7_i32, %c8_i32_74 : i32
    %244 = tpu.assume_multiple %243, 8 : i32
    %245 = arith.index_cast %244 : i32 to index
    %c0_75 = arith.constant 0 : index
    %246 = vector.load %arg11[%245, %c0_75] : memref<64x512xf32, #tpu.memory_space<vmem>>, vector<8x512xf32>
    %c0_76 = arith.constant 0 : index
    %c0_77 = arith.constant 0 : index
    %247 = vector.load %arg6[%c0_76, %c0_77] : memref<128x512xf32, #tpu.memory_space<vmem>>, vector<128x512xf32>
    %cst_78 = arith.constant dense<0.000000e+00> : vector<8x512xf32>
    %248 = tpu.matmul %242, %247, %cst_78 {dimension_numbers = #tpu.dot_dimension_numbers<[1], [0], [0], [1], [0, 0, 1, 1], [], []>} : vector<8x128xf32>, vector<128x512xf32>, vector<8x512xf32> -> vector<8x512xf32>
    %249 = arith.addf %246, %248 : vector<8x512xf32>
    %250 = vector.extract_strided_slice %249 {offsets = [0, 0], sizes = [8, 128], strides = [1, 1]} : vector<8x512xf32> to vector<8x128xf32>
    %251 = arith.negf %250 : vector<8x128xf32>
    %252 = math.exp %251 : vector<8x128xf32>
    %cst_79 = arith.constant 1.000000e+00 : f32
    %253 = vector.broadcast %cst_79 : f32 to vector<8x128xf32>
    %254 = arith.addf %253, %252 : vector<8x128xf32>
    %255 = arith.divf %253, %254 : vector<8x128xf32>
    %256 = vector.extract_strided_slice %249 {offsets = [0, 128], sizes = [8, 128], strides = [1, 1]} : vector<8x512xf32> to vector<8x128xf32>
    %257 = arith.negf %256 : vector<8x128xf32>
    %258 = math.exp %257 : vector<8x128xf32>
    %cst_80 = arith.constant 1.000000e+00 : f32
    %259 = vector.broadcast %cst_80 : f32 to vector<8x128xf32>
    %260 = arith.addf %259, %258 : vector<8x128xf32>
    %261 = arith.divf %259, %260 : vector<8x128xf32>
    %262 = vector.extract_strided_slice %249 {offsets = [0, 256], sizes = [8, 128], strides = [1, 1]} : vector<8x512xf32> to vector<8x128xf32>
    %263 = math.tanh %262 : vector<8x128xf32>
    %264 = vector.extract_strided_slice %249 {offsets = [0, 384], sizes = [8, 128], strides = [1, 1]} : vector<8x512xf32> to vector<8x128xf32>
    %265 = arith.negf %264 : vector<8x128xf32>
    %266 = math.exp %265 : vector<8x128xf32>
    %cst_81 = arith.constant 1.000000e+00 : f32
    %267 = vector.broadcast %cst_81 : f32 to vector<8x128xf32>
    %268 = arith.addf %267, %266 : vector<8x128xf32>
    %269 = arith.divf %267, %268 : vector<8x128xf32>
    %270 = arith.mulf %261, %240 : vector<8x128xf32>
    %271 = arith.mulf %255, %263 : vector<8x128xf32>
    %272 = arith.addf %270, %271 : vector<8x128xf32>
    %273 = math.tanh %272 : vector<8x128xf32>
    %274 = arith.mulf %269, %273 : vector<8x128xf32>
    %c8_i32_82 = arith.constant 8 : i32
    %c0_83 = arith.constant 0 : index
    %c0_84 = arith.constant 0 : index
    %275 = vector.load %arg9[%c0_83, %c0_84] : memref<8x128xf32, #tpu.memory_space<vmem>>, vector<8x128xf32>
    tpu.vector_store %arg9[%c0_83, %c0_84], %274 {strides = array<i32>} : memref<8x128xf32, #tpu.memory_space<vmem>>, vector<8x128xf32>,
    %c0_85 = arith.constant 0 : index
    %c0_86 = arith.constant 0 : index
    %276 = vector.load %arg10[%c0_85, %c0_86] : memref<8x128xf32, #tpu.memory_space<vmem>>, vector<8x128xf32>
    tpu.vector_store %arg10[%c0_85, %c0_86], %272 {strides = array<i32>} : memref<8x128xf32, #tpu.memory_space<vmem>>, vector<8x128xf32>,
    return
  }
  func.func @transform_0(%arg0: i32) -> (i32, i32) {
    %c0_i32 = arith.constant 0 : i32
    %c0_i32_0 = arith.constant 0 : i32
    return %arg0, %c0_i32 : i32, i32
  }
  func.func @transform_1(%arg0: i32) -> (i32, i32) {
    %c0_i32 = arith.constant 0 : i32
    %c0_i32_0 = arith.constant 0 : i32
    %c0_i32_1 = arith.constant 0 : i32
    return %c0_i32, %c0_i32_0 : i32, i32
  }
  func.func @transform_2(%arg0: i32) -> (i32, i32) {
    %c0_i32 = arith.constant 0 : i32
    %c0_i32_0 = arith.constant 0 : i32
    %c0_i32_1 = arith.constant 0 : i32
    return %c0_i32, %c0_i32_0 : i32, i32
  }
  func.func @transform_3(%arg0: i32) -> (i32, i32) {
    %c0_i32 = arith.constant 0 : i32
    %c0_i32_0 = arith.constant 0 : i32
    %c0_i32_1 = arith.constant 0 : i32
    return %c0_i32, %c0_i32_0 : i32, i32
  }
  func.func @transform_4(%arg0: i32) -> (i32, i32) {
    %c0_i32 = arith.constant 0 : i32
    %c0_i32_0 = arith.constant 0 : i32
    %c0_i32_1 = arith.constant 0 : i32
    return %c0_i32, %c0_i32_0 : i32, i32
  }
  func.func @transform_5(%arg0: i32) -> (i32, i32) {
    %c0_i32 = arith.constant 0 : i32
    %c0_i32_0 = arith.constant 0 : i32
    %c0_i32_1 = arith.constant 0 : i32
    return %c0_i32, %c0_i32_0 : i32, i32
  }
  func.func @transform_6(%arg0: i32) -> (i32, i32) {
    %c0_i32 = arith.constant 0 : i32
    %c0_i32_0 = arith.constant 0 : i32
    %c0_i32_1 = arith.constant 0 : i32
    return %c0_i32, %c0_i32_0 : i32, i32
  }
  func.func @transform_7(%arg0: i32) -> (i32, i32) {
    %c0_i32 = arith.constant 0 : i32
    %c0_i32_0 = arith.constant 0 : i32
    %c0_i32_1 = arith.constant 0 : i32
    return %c0_i32, %c0_i32_0 : i32, i32
  }
  func.func @transform_8(%arg0: i32) -> (i32, i32) {
    %c0_i32 = arith.constant 0 : i32
    %c0_i32_0 = arith.constant 0 : i32
    %c0_i32_1 = arith.constant 0 : i32
    return %c0_i32, %c0_i32_0 : i32, i32
  }
  func.func @transform_9(%arg0: i32) -> (i32, i32) {
    %c0_i32 = arith.constant 0 : i32
    %c0_i32_0 = arith.constant 0 : i32
    %c0_i32_1 = arith.constant 0 : i32
    return %c0_i32, %c0_i32_0 : i32, i32
  }
}

</mosaic_0001>

<bundles_post_ra>
// kernel: tpu_custom_call.1
= control target key start
LH: loop header
LB: loop body
LE: loop exit
PB: predicated region body
PF: predicated region fallthrough
CT: control target
= control target key end

     0   :  { %15 = vsyncpa [#allocation4], 0  ;;  %s3610_s0 = inlined_call_operand.vmem [shape: f32[64,16], index: 0, kind: input, shape index: {}]   ;;  %s3611_s1 = inlined_call_operand.vmem [shape: f32[16,128], index: 1, kind: input, shape index: {}]   ;;  %s3612_s2 = inlined_call_operand.vmem [shape: f32[1,128], index: 2, kind: input, shape index: {}]   ;;  %s3613_s3 = inlined_call_operand.hbm [shape: f32[128,512], index: 3, kind: input, shape index: {}]   ;;  %s3614_s4 = inlined_call_operand.vmem [shape: f32[1,512], index: 4, kind: input, shape index: {}]   ;;  %s3615_s5 = inlined_call_operand.hbm [shape: f32[128,512], index: 5, kind: input, shape index: {}]   ;;  %s3616_s6 = inlined_call_operand.vmem [shape: f32[8,128], index: 6, kind: input, shape index: {}]   ;;  %s3617_s7 = inlined_call_operand.vmem [shape: f32[8,128], index: 7, kind: input, shape index: {}]   ;;  %s3618_s8 = inlined_call_operand.hbm [shape: f32[8,128], index: 8, kind: output, shape index: {0}]   ;;  %s3619_s9 = inlined_call_operand.hbm [shape: f32[8,128], index: 9, kind: output, shape index: {1}]  }
   0x1   :  { %16 = vsyncpa [#allocation7], 0 }
   0x2   :  { %17 = vsyncpa [#allocation5], 0 }
   0x3   :  { %18 = vsyncpa [#allocation10], 0  ;;  %s3023_s30 = smov [#allocation3]   ;;  %s2927_s13 = scalar_lea.hbm %s3613_s3, 8192 }
   0x4   :  { %s30_s10 = sshll.u32 %s3023_s30, 4  ;;  %p2928_p0 = scmp.ne.s32.totalorder %s3613_s3, %s2927_s13  ;;  %s31_s10 = int_to_ptr.vmem [resolvable:$true] %s30_s10 }
   0x5   :  { %p2931_p1 = scmp.lt.u32.totalorder %s2927_s13, %s3613_s3 }
   0x7   :  { %p2933_p2 = pnand %p2931_p1, %p2928_p0 }
   0x9   :  { %2936 = shalt.err (!%p2933_p2)
}
   0xa   :  { %s2937_s18 = scalar_lea.vmem %s31_s10, 8192  ;;  %p2942_p4 = scmp.lt.s32.totalorder %s31_s10, %s31_s10 }
   0xb   :  { %p2938_p3 = scmp.ne.s32.totalorder %s31_s10, %s2937_s18  ;;  %p2943_p5 = scmp.lt.s32.totalorder %s2937_s18, %s2937_s18 }
   0xd   :  { %p2944_p6 = por %p2943_p5, %p2942_p4 }
   0xf   :  { %p2945_p7 = pnand %p2944_p6, %p2938_p3 }
  0x11   :  { %2948 = shalt.err (!%p2945_p7)
}
  0x12   :  { %s3024_s19 = smov 512   ;;  %s3025_s20 = smov 32  }
  0x13   :  { %36 = dma.hbm_to_vmem [thread:$0]  %s3613_s3, 8192, %s31_s10, [#allocation4], %s3024_s19, %s3024_s19, %s3025_s20  }
  0x14   :  { %s3026_s23 = smov [#allocation6]   ;;  %s2949_s27 = scalar_lea.hbm %s3615_s5, 8192 }
  0x15   :  { %s44_s24 = sshll.u32 %s3026_s23, 4  ;;  %p2950_p8 = scmp.ne.s32.totalorder %s3615_s5, %s2949_s27  ;;  %s45_s24 = int_to_ptr.vmem [resolvable:$true] %s44_s24 }
  0x16   :  { %p2953_p9 = scmp.lt.u32.totalorder %s2949_s27, %s3615_s5 }
  0x18   :  { %p2955_p10 = pnand %p2953_p9, %p2950_p8 }
  0x1a   :  { %2958 = shalt.err (!%p2955_p10)
}
  0x1b   :  { %s2959_s12 = scalar_lea.vmem %s45_s24, 8192  ;;  %p2964_p12 = scmp.lt.s32.totalorder %s45_s24, %s45_s24 }
  0x1c   :  { %p2960_p11 = scmp.ne.s32.totalorder %s45_s24, %s2959_s12  ;;  %p2965_p13 = scmp.lt.s32.totalorder %s2959_s12, %s2959_s12 }
  0x1e   :  { %p2966_p0 = por %p2965_p13, %p2964_p12 }
  0x20   :  { %p2967_p1 = pnand %p2966_p0, %p2960_p11 }
  0x22   :  { %2970 = shalt.err (!%p2967_p1)
}
  0x23   :  { %50 = dma.hbm_to_vmem [thread:$0]  %s3615_s5, 8192, %s45_s24, [#allocation7], %s3024_s19, %s3024_s19, %s3025_s20  }
  0x24   :  { %3015 = dma.done.wait [#allocation4], 8192  }
  0x25   :  { %3016 = vsyncadd [#allocation4], 4294959104 }
  0x26   :  { %3017 = dma.done.wait [#allocation7], 8192  }
  0x27   :  { %3018 = vsyncadd [#allocation7], 4294959104  ;;  %vm86_vm0 = vcmask 130048   ;;  %v77_v0 = vld [vmem:[%s3611_s1] sm:$0xff]  ;;  %v78_v1 = vld [vmem:[%s3611_s1 + $0x8] sm:$0xff] }
  0x28   :  { %v69_v2 = vld [vmem:[%s3610_s0] sm:$0xff]  ;;  %v2148_v3 = vpack.c.bf16 %v78_v1, %v77_v0  ;;  %v70_v4 = vld [vmem:[%s3610_s0 + $0x8] sm:$0xff]  ;;  %v71_v5 = vld [vmem:[%s3610_s0 + $0x10] sm:$0xff] }
  0x29   :  { %2136 = vmatprep.mubr.msk.f32.mxu0 %vm86_vm0, %v69_v2  ;;  %v225_v6 = vld [vmem:[#allocation3 + $0x8] sm:$0xff]  ;;  %v224_v9 = vld [vmem:[#allocation3] sm:$0xff]  ;;  %v227_v11 = vld [vmem:[#allocation3 + $0x18] sm:$0xff] }
  0x2a   :  { %2149 = vmatprep.subr.bf16.mxu0 %v2148_v3  ;;  %v229_v7 = vld [vmem:[#allocation3 + $0x28] sm:$0xff]  ;;  %v228_v10 = vld [vmem:[#allocation3 + $0x20] sm:$0xff]  ;;  %v231_v13 = vld [vmem:[#allocation3 + $0x38] sm:$0xff] }
  0x2b   :  { %2151 = vmatpush3.bf16.msra.mxu0 %v2148_v3  ;;  %v2152_v8 = vpack.c.bf16 %v229_v7, %v225_v6  ;;  %v2154_v12 = vpack.c.bf16 %v228_v10, %v224_v9  ;;  %v226_v14 = vld [vmem:[#allocation3 + $0x10] sm:$0xff]  ;;  %v72_v16 = vld [vmem:[%s3610_s0 + $0x18] sm:$0xff]  ;;  %v2184_v17 = vpack.c.bf16 %v231_v13, %v227_v11  ;;  %v233_v19 = vld [vmem:[#allocation3 + $0x48] sm:$0xff] }
  0x2c   :  { %v230_v15 = vld [vmem:[#allocation3 + $0x30] sm:$0xff]  ;;  %v237_v20 = vld [vmem:[#allocation3 + $0x68] sm:$0xff]  ;;  %v232_v21 = vld [vmem:[#allocation3 + $0x40] sm:$0xff] }
  0x2d   :  { %2153 = vmatprep.subr.bf16.mxu1 %v2152_v8  ;;  %v2186_v18 = vpack.c.bf16 %v230_v15, %v226_v14  ;;  %v73_v22 = vld [vmem:[%s3610_s0 + $0x20] sm:$0xff]  ;;  %v2156_v23 = vpack.c.bf16 %v237_v20, %v233_v19  ;;  %v235_v25 = vld [vmem:[#allocation3 + $0x58] sm:$0xff]  ;;  %2185 = vmatprep.subr.bf16.mxu0 %v2184_v17  ;;  %v234_v29 = vld [vmem:[#allocation3 + $0x50] sm:$0xff] }
  0x2e   :  { %2137 = vmatmul.mubr.msk.f32.vlgmr.msra.gmra.mrb[0].mxu0 %vm86_vm0, %v70_v4  ;;  %2155 = vmatpush1.bf16.msra.mxu1 %v2154_v12  ;;  %v236_v24 = vld [vmem:[#allocation3 + $0x60] sm:$0xff]  ;;  %v239_v26 = vld [vmem:[#allocation3 + $0x78] sm:$0xff]  ;;  %v238_v30 = vld [vmem:[#allocation3 + $0x70] sm:$0xff] }
  0x2f   :  { %2139 = vmatprep.mubr.msk.f32.mxu0 %vm86_vm0, %v71_v5  ;;  %v2158_v27 = vpack.c.bf16 %v236_v24, %v232_v21  ;;  %v2188_v28 = vpack.c.bf16 %v239_v26, %v235_v25  ;;  %v241_v31 = vld [vmem:[#allocation3 + $0x88] sm:$0xff]  ;;  %2187 = vmatpush1.bf16.msra.mxu0 %v2186_v18  ;;  %v2190_v32 = vpack.c.bf16 %v238_v30, %v234_v29  ;;  %v240_v34 = vld [vmem:[#allocation3 + $0x80] sm:$0xff]  ;;  %v243_v38 = vld [vmem:[#allocation3 + $0x98] sm:$0xff] }
  0x30   :  { %2157 = vmatprep.subr.bf16.mxu1 %v2156_v23  ;;  %v245_v33 = vld [vmem:[#allocation3 + $0xa8] sm:$0xff]  ;;  %v244_v35 = vld [vmem:[#allocation3 + $0xa0] sm:$0xff]  ;;  %v247_v39 = vld [vmem:[#allocation3 + $0xb8] sm:$0xff] }
  0x31   :  { %v74_v36 = vld [vmem:[%s3610_s0 + $0x28] sm:$0xff]  ;;  %2189 = vmatprep.subr.bf16.mxu0 %v2188_v28  ;;  %v2160_v37 = vpack.c.bf16 %v245_v33, %v241_v31  ;;  %v242_v40 = vld [vmem:[#allocation3 + $0x90] sm:$0xff]  ;;  %v2162_v41 = vpack.c.bf16 %v244_v35, %v240_v34  ;;  %v2192_v42 = vpack.c.bf16 %v247_v39, %v243_v38  ;;  %v248_v47 = vld [vmem:[#allocation3 + $0xc0] sm:$0xff] }
  0x32   :  { %2140 = vmatmul.mubr.msk.f32.gmra.mrb[2].mxu0 %vm86_vm0, %v72_v16  ;;  %2159 = vmatpush1.bf16.msra.mxu1 %v2158_v27  ;;  %v246_v43 = vld [vmem:[#allocation3 + $0xb0] sm:$0xff]  ;;  %v249_v44 = vld [vmem:[#allocation3 + $0xc8] sm:$0xff]  ;;  %v252_v48 = vld [vmem:[#allocation3 + $0xe0] sm:$0xff] }
  0x33   :  { %v253_v45 = vld [vmem:[#allocation3 + $0xe8] sm:$0xff]  ;;  %2142 = vmatprep.mubr.msk.f32.mxu0 %vm86_vm0, %v73_v22  ;;  %2161 = vmatprep.subr.bf16.mxu1 %v2160_v37  ;;  %v251_v49 = vld [vmem:[#allocation3 + $0xd8] sm:$0xff]  ;;  %v75_v50 = vld [vmem:[%s3610_s0 + $0x30] sm:$0xff]  ;;  %v2194_v51 = vpack.c.bf16 %v246_v43, %v242_v40  ;;  %v2166_v58 = vpack.c.bf16 %v252_v48, %v248_v47  ;;  %v3027_v48 = vmov 0.0  }
  0x34   :  { %v2164_v46 = vpack.c.bf16 %v253_v45, %v249_v44  ;;  %2191 = vmatpush1.bf16.msra.mxu0 %v2190_v32  ;;  %v255_v52 = vld [vmem:[#allocation3 + $0xf8] sm:$0xff]  ;;  %v250_v53 = vld [vmem:[#allocation3 + $0xd0] sm:$0xff]  ;;  %v257_v56 = vld [vmem:[#allocation3 + $0x108] sm:$0xff]  ;;  %374 = vmatprep.mubr.f32.mxu1 %v3027_v48 }
  0x35   :  { %2193 = vmatprep.subr.bf16.mxu0 %v2192_v42  ;;  %v2196_v54 = vpack.c.bf16 %v255_v52, %v251_v49  ;;  %v254_v55 = vld [vmem:[#allocation3 + $0xf0] sm:$0xff]  ;;  %v261_v57 = vld [vmem:[#allocation3 + $0x128] sm:$0xff]  ;;  %v259_v59 = vld [vmem:[#allocation3 + $0x118] sm:$0xff] }
  0x36   :  { %2143 = vmatmul.mubr.msk.f32.gmra.mrb[4].mxu0 %vm86_vm0, %v74_v36  ;;  %2163 = vmatpush1.bf16.msra.mxu1 %v2162_v41  ;;  %v263_v60 = vld [vmem:[#allocation3 + $0x138] sm:$0xff]  ;;  %v2168_v62 = vpack.c.bf16 %v261_v57, %v257_v56  ;;  %v256_v63 = vld [vmem:[#allocation3 + $0x100] sm:$0xff]  ;;  %v2198_v1 = vpack.c.bf16 %v254_v55, %v250_v53  ;;  %v265_v2 = vld [vmem:[#allocation3 + $0x148] sm:$0xff] }
  0x37   :  { %2145 = vmatprep.mubr.msk.f32.mxu0 %vm86_vm0, %v75_v50  ;;  %v76_v61 = vld [vmem:[%s3610_s0 + $0x38] sm:$0xff]  ;;  %2165 = vmatprep.subr.bf16.mxu1 %v2164_v46  ;;  %v260_v0 = vld [vmem:[#allocation3 + $0x120] sm:$0xff]  ;;  %v269_v3 = vld [vmem:[#allocation3 + $0x168] sm:$0xff]  ;;  %v2200_v4 = vpack.c.bf16 %v263_v60, %v259_v59 }
  0x38   :  { %2195 = vmatpush1.bf16.msra.mxu0 %v2194_v51  ;;  %v258_v5 = vld [vmem:[#allocation3 + $0x110] sm:$0xff]  ;;  %v2170_v7 = vpack.c.bf16 %v260_v0, %v256_v63  ;;  %v267_v8 = vld [vmem:[#allocation3 + $0x158] sm:$0xff]  ;;  %v2172_v10 = vpack.c.bf16 %v269_v3, %v265_v2  ;;  %v264_v11 = vld [vmem:[#allocation3 + $0x140] sm:$0xff] }
  0x39   :  { %2197 = vmatprep.subr.bf16.mxu0 %v2196_v54  ;;  %v262_v6 = vld [vmem:[#allocation3 + $0x130] sm:$0xff]  ;;  %v271_v9 = vld [vmem:[#allocation3 + $0x178] sm:$0xff]  ;;  %v268_v12 = vld [vmem:[#allocation3 + $0x160] sm:$0xff] }
  0x3a   :  { %2146 = vmatmul.mubr.msk.f32.gmra.mrb[6].mxu0 %vm86_vm0, %v76_v61  ;;  %2167 = vmatpush1.bf16.msra.mxu1 %v2166_v58  ;;  %v2202_v13 = vpack.c.bf16 %v262_v6, %v258_v5  ;;  %v273_v14 = vld [vmem:[#allocation3 + $0x188] sm:$0xff]  ;;  %v2204_v16 = vpack.c.bf16 %v271_v9, %v267_v8  ;;  %v266_v17 = vld [vmem:[#allocation3 + $0x150] sm:$0xff]  ;;  %v2174_v19 = vpack.c.bf16 %v268_v12, %v264_v11  ;;  %v275_v20 = vld [vmem:[#allocation3 + $0x198] sm:$0xff] }
  0x3b   :  { %2169 = vmatprep.subr.bf16.mxu1 %v2168_v62  ;;  %v277_v15 = vld [vmem:[#allocation3 + $0x1a8] sm:$0xff]  ;;  %v270_v18 = vld [vmem:[#allocation3 + $0x170] sm:$0xff]  ;;  %v279_v21 = vld [vmem:[#allocation3 + $0x1b8] sm:$0xff]  ;;  %487 = vmatprep.mubr.f32.mxu0 %v3027_v48 }
  0x3c   :  { %2199 = vmatpush1.bf16.msra.mxu0 %v2198_v1  ;;  %v2176_v22 = vpack.c.bf16 %v277_v15, %v273_v14  ;;  %v272_v23 = vld [vmem:[#allocation3 + $0x180] sm:$0xff]  ;;  %v2206_v25 = vpack.c.bf16 %v270_v18, %v266_v17  ;;  %v2208_v26 = vpack.c.bf16 %v279_v21, %v275_v20  ;;  %v274_v27 = vld [vmem:[#allocation3 + $0x190] sm:$0xff]  ;;  %v281_v31 = vld [vmem:[#allocation3 + $0x1c8] sm:$0xff] }
  0x3d   :  { %2201 = vmatprep.subr.bf16.mxu0 %v2200_v4  ;;  %v276_v24 = vld [vmem:[#allocation3 + $0x1a0] sm:$0xff]  ;;  %v278_v28 = vld [vmem:[#allocation3 + $0x1b0] sm:$0xff]  ;;  %v285_v32 = vld [vmem:[#allocation3 + $0x1e8] sm:$0xff] }
  0x3e   :  { %2171 = vmatpush1.bf16.msra.mxu1 %v2170_v7  ;;  %v2178_v29 = vpack.c.bf16 %v276_v24, %v272_v23  ;;  %v2210_v30 = vpack.c.bf16 %v278_v28, %v274_v27  ;;  %v283_v33 = vld [vmem:[#allocation3 + $0x1d8] sm:$0xff]  ;;  %v2180_v34 = vpack.c.bf16 %v285_v32, %v281_v31  ;;  %v280_v35 = vld [vmem:[#allocation3 + $0x1c0] sm:$0xff]  ;;  %v282_v39 = vld [vmem:[#allocation3 + $0x1d0] sm:$0xff] }
  0x3f   :  { %2173 = vmatprep.subr.bf16.mxu1 %v2172_v10  ;;  %v284_v36 = vld [vmem:[#allocation3 + $0x1e0] sm:$0xff]  ;;  %v287_v38 = vld [vmem:[#allocation3 + $0x1f8] sm:$0xff]  ;;  %v286_v40 = vld [vmem:[#allocation3 + $0x1f0] sm:$0xff] }
  0x40   :  { %2203 = vmatpush1.bf16.msra.mxu0 %v2202_v13  ;;  %v2182_v37 = vpack.c.bf16 %v284_v36, %v280_v35  ;;  %v2212_v41 = vpack.c.bf16 %v287_v38, %v283_v33  ;;  %v2214_v42 = vpack.c.bf16 %v286_v40, %v282_v39  ;;  %v578_v43 = vld [vmem:[#allocation6 + $0x8] sm:$0xff]  ;;  %v580_v45 = vld [vmem:[#allocation6 + $0x18] sm:$0xff]  ;;  %v3153_v50 = vld [vmem:[%s3612_s2] ss:$0 sm:$0xff] }
  0x41   :  { %2205 = vmatprep.subr.bf16.mxu0 %v2204_v16  ;;  %v582_v44 = vld [vmem:[#allocation6 + $0x28] sm:$0xff]  ;;  %v584_v47 = vld [vmem:[#allocation6 + $0x38] sm:$0xff]  ;;  %v577_v51 = vld [vmem:[#allocation6] sm:$0xff] }
  0x42   :  { %2175 = vmatpush1.bf16.msra.mxu1 %v2174_v19  ;;  %v3142_v46 = vpack.c.bf16 %v582_v44, %v578_v43  ;;  %v3145_v49 = vpack.c.bf16 %v584_v47, %v580_v45  ;;  %v581_v53 = vld [vmem:[#allocation6 + $0x20] sm:$0xff]  ;;  %v579_v54 = vld [vmem:[#allocation6 + $0x10] sm:$0xff]  ;;  %v586_v57 = vld [vmem:[#allocation6 + $0x48] sm:$0xff] }
  0x43   :  { %2177 = vmatprep.subr.bf16.mxu1 %v2176_v22  ;;  %v583_v55 = vld [vmem:[#allocation6 + $0x30] sm:$0xff]  ;;  %v590_v59 = vld [vmem:[#allocation6 + $0x68] sm:$0xff]  ;;  %v588_v60 = vld [vmem:[#allocation6 + $0x58] sm:$0xff]  ;;  %v3156_v62 = vpack.c.bf16 %v581_v53, %v577_v51 }
  0x44   :  { %2207 = vmatpush1.bf16.msra.mxu0 %v2206_v25  ;;  %v592_v61 = vld [vmem:[#allocation6 + $0x78] sm:$0xff]  ;;  %v3158_v63 = vpack.c.bf16 %v583_v55, %v579_v54  ;;  %v585_v0 = vld [vmem:[#allocation6 + $0x40] sm:$0xff]  ;;  %v587_v5 = vld [vmem:[#allocation6 + $0x50] sm:$0xff]  ;;  %v3161_v8 = vpack.c.bf16 %v590_v59, %v586_v57 }
  0x45   :  { %2209 = vmatprep.subr.bf16.mxu0 %v2208_v26  ;;  %v589_v4 = vld [vmem:[#allocation6 + $0x60] sm:$0xff]  ;;  %v591_v6 = vld [vmem:[#allocation6 + $0x70] sm:$0xff]  ;;  %v3163_v9 = vpack.c.bf16 %v592_v61, %v588_v60  ;;  %v594_v10 = vld [vmem:[#allocation6 + $0x88] sm:$0xff] }
  0x46   :  { %2179 = vmatpush1.bf16.msra.mxu1 %v2178_v29  ;;  %v598_v12 = vld [vmem:[#allocation6 + $0xa8] sm:$0xff]  ;;  %v596_v13 = vld [vmem:[#allocation6 + $0x98] sm:$0xff]  ;;  %v3168_v15 = vpack.c.bf16 %v589_v4, %v585_v0  ;;  %v3170_v16 = vpack.c.bf16 %v591_v6, %v587_v5  ;;  %v593_v17 = vld [vmem:[#allocation6 + $0x80] sm:$0xff] }
  0x47   :  { %2181 = vmatprep.subr.bf16.mxu1 %v2180_v34  ;;  %v600_v14 = vld [vmem:[#allocation6 + $0xb8] sm:$0xff]  ;;  %v597_v19 = vld [vmem:[#allocation6 + $0xa0] sm:$0xff]  ;;  %v595_v21 = vld [vmem:[#allocation6 + $0x90] sm:$0xff]  ;;  %v3178_v23 = vpack.c.bf16 %v598_v12, %v594_v10 }
  0x48   :  { %2211 = vmatpush1.bf16.msra.mxu0 %v2210_v30  ;;  %v599_v22 = vld [vmem:[#allocation6 + $0xb0] sm:$0xff]  ;;  %v3180_v24 = vpack.c.bf16 %v600_v14, %v596_v13  ;;  %v602_v26 = vld [vmem:[#allocation6 + $0xc8] sm:$0xff]  ;;  %v604_v29 = vld [vmem:[#allocation6 + $0xd8] sm:$0xff]  ;;  %v3184_v31 = vpack.c.bf16 %v597_v19, %v593_v17 }
  0x49   :  { %2213 = vmatprep.subr.bf16.mxu0 %v2212_v41  ;;  %v606_v28 = vld [vmem:[#allocation6 + $0xe8] sm:$0xff]  ;;  %v608_v30 = vld [vmem:[#allocation6 + $0xf8] sm:$0xff]  ;;  %v3186_v32 = vpack.c.bf16 %v599_v22, %v595_v21  ;;  %v601_v33 = vld [vmem:[#allocation6 + $0xc0] sm:$0xff] }
  0x4a   :  { %2183 = vmatpush1.bf16.msra.mxu1 %v2182_v37  ;;  %v605_v35 = vld [vmem:[#allocation6 + $0xe0] sm:$0xff]  ;;  %v603_v36 = vld [vmem:[#allocation6 + $0xd0] sm:$0xff]  ;;  %v3195_v39 = vpack.c.bf16 %v606_v28, %v602_v26  ;;  %v3197_v40 = vpack.c.bf16 %v608_v30, %v604_v29  ;;  %v610_v41 = vld [vmem:[#allocation6 + $0x108] sm:$0xff] }
  0x4b   :  { %2217 = vmatprep.subr.bf16.mxu1 %v3142_v46  ;;  %v607_v37 = vld [vmem:[#allocation6 + $0xf0] sm:$0xff]  ;;  %v614_v44 = vld [vmem:[#allocation6 + $0x128] sm:$0xff]  ;;  %v612_v45 = vld [vmem:[#allocation6 + $0x118] sm:$0xff]  ;;  %v3202_v51 = vpack.c.bf16 %v605_v35, %v601_v33 }
  0x4c   :  { %2215 = vmatpush1.bf16.msra.mxu0 %v2214_v42  ;;  %v616_v47 = vld [vmem:[#allocation6 + $0x138] sm:$0xff]  ;;  %v609_v53 = vld [vmem:[#allocation6 + $0x100] sm:$0xff]  ;;  %v615_v57 = vld [vmem:[#allocation6 + $0x130] sm:$0xff] }
  0x4d   :  { %2249 = vmatprep.subr.bf16.mxu0 %v3145_v49  ;;  %v613_v55 = vld [vmem:[#allocation6 + $0x120] sm:$0xff]  ;;  %v3212_v59 = vpack.c.bf16 %v616_v47, %v612_v45  ;;  %v618_v60 = vld [vmem:[#allocation6 + $0x148] sm:$0xff]  ;;  %v619_v10 = vld [vmem:[#allocation6 + $0x150] sm:$0xff] }
  0x4e   :  { %v622_v0 = vld [vmem:[#allocation6 + $0x168] sm:$0xff]  ;;  %v617_v5 = vld [vmem:[#allocation6 + $0x140] sm:$0xff]  ;;  %v628_v19 = vld [vmem:[#allocation6 + $0x198] sm:$0xff] }
  0x4f   :  { %v3226_v12 = vpack.c.bf16 %v622_v0, %v618_v60  ;;  %v626_v14 = vld [vmem:[#allocation6 + $0x188] sm:$0xff]  ;;  %v627_v28 = vld [vmem:[#allocation6 + $0x190] sm:$0xff]  ;;  %v637_v47 = vld [vmem:[#allocation6 + $0x1e0] sm:$0xff] }
  0x50   :  { %v631_v29 = vld [vmem:[#allocation6 + $0x1b0] sm:$0xff]  ;;  %v65_v60 = vld [vmem:[%s3616_s6] sm:$0xff] }
 0x101   :  { %v2138_v52 = vpop.f32.mrb[0].mxu0 }
 0x102   :  { %v177_v56 = vpop.f32.mrb[1].mxu0  ;;  %v183_v1 = vadd.f32 %v2138_v52, %v3153_v50  ;;  %v3204_v52 = vpack.c.bf16 %v607_v37, %v603_v36  ;;  %v638_v36 = vld [vmem:[#allocation6 + $0x1e8] sm:$0xff]  ;;  %v636_v37 = vld [vmem:[#allocation6 + $0x1d8] sm:$0xff] }
 0x103   :  { %v178_v58 = vadd.f32 %v3153_v50, %v177_v56  ;;  %v611_v56 = vld [vmem:[#allocation6 + $0x110] sm:$0xff] }
 0x104   :  { %v217_v18 = vmax.f32 %v183_v1, 0.0  ;;  %v620_v1 = vld [vmem:[#allocation6 + $0x158] sm:$0xff]  ;;  %v3218_v4 = vpack.c.bf16 %v615_v57, %v611_v56 }
 0x105   :  { %v216_v2 = vmax.f32 %v178_v58, 0.0  ;;  %v2141_v3 = vpop.f32.mrb[2].mxu0  ;;  %v3210_v58 = vpack.c.bf16 %v614_v44, %v610_v41  ;;  %v640_v41 = vld [vmem:[#allocation6 + $0x1f8] sm:$0xff]  ;;  %v633_v44 = vld [vmem:[#allocation6 + $0x1c0] sm:$0xff] }
 0x106   :  { %v187_v7 = vpop.f32.mrb[3].mxu0  ;;  %v193_v34 = vadd.f32 %v2141_v3, %v3153_v50  ;;  %v3216_v3 = vpack.c.bf16 %v613_v55, %v609_v53  ;;  %v635_v53 = vld [vmem:[#allocation6 + $0x1d0] sm:$0xff]  ;;  %v3259_v56 = vpack.c.bf16 %v640_v41, %v636_v37 }
 0x107   :  { %375 = vmatmul.mubr.f32.vlgmr.msra.gmra.mrb[0].mxu1 %v216_v2  ;;  %488 = vmatmul.mubr.f32.vlgmr.msra.gmra.mrb[8].mxu0 %v216_v2  ;;  %v188_v11 = vadd.f32 %v3153_v50, %v187_v7  ;;  %v624_v2 = vld [vmem:[#allocation6 + $0x178] sm:$0xff]  ;;  %v621_v7 = vld [vmem:[#allocation6 + $0x160] sm:$0xff] }
 0x108   :  { %2219 = vmatpush1.bf16.msra.mxu1 %v3156_v62  ;;  %2251 = vmatpush1.bf16.msra.mxu0 %v3158_v63  ;;  %v219_v54 = vmax.f32 %v193_v34, 0.0  ;;  %v3228_v13 = vpack.c.bf16 %v624_v2, %v620_v1  ;;  %v3233_v21 = vpack.c.bf16 %v621_v7, %v617_v5  ;;  %v634_v34 = vld [vmem:[#allocation6 + $0x1c8] sm:$0xff]  ;;  %v288_v2 = vld [vmem:[%s3614_s4] sm:$0xf] }
 0x109   :  { %380 = vmatprep.mubr.f32.mxu1 %v3027_v48  ;;  %493 = vmatprep.mubr.f32.mxu0 %v3027_v48  ;;  %v3174_v20 = vpop.f32.mrb[4].mxu0  ;;  %v218_v27 = vmax.f32 %v188_v11, 0.0  ;;  %v623_v11 = vld [vmem:[#allocation6 + $0x170] sm:$0xff]  ;;  %v3257_v55 = vpack.c.bf16 %v638_v36, %v634_v34 }
 0x10a   :  { %2221 = vmatprep.subr.bf16.mxu1 %v3161_v8  ;;  %2253 = vmatprep.subr.bf16.mxu0 %v3163_v9  ;;  %v197_v25 = vpop.f32.mrb[5].mxu0  ;;  %v203_v6 = vadd.f32 %v3174_v20, %v3153_v50  ;;  %v632_v20 = vld [vmem:[#allocation6 + $0x1b8] sm:$0xff]  ;;  %v3235_v22 = vpack.c.bf16 %v623_v11, %v619_v10 }
 0x10b   :  { %381 = vmatmul.mubr.f32.gmra.mrb[2].mxu1 %v217_v18  ;;  %494 = vmatmul.mubr.f32.gmra.mrb[10].mxu0 %v217_v18  ;;  %v198_v43 = vadd.f32 %v3153_v50, %v197_v25  ;;  %v630_v18 = vld [vmem:[#allocation6 + $0x1a8] sm:$0xff]  ;;  %v625_v25 = vld [vmem:[#allocation6 + $0x180] sm:$0xff]  ;;  %v3243_v33 = vpack.c.bf16 %v632_v20, %v628_v19 }
 0x10c   :  { %2223 = vmatpush1.bf16.msra.mxu1 %v3168_v15  ;;  %2255 = vmatpush1.bf16.msra.mxu0 %v3170_v16  ;;  %v221_v26 = vmax.f32 %v203_v6, 0.0  ;;  %v3241_v30 = vpack.c.bf16 %v630_v18, %v626_v14 }
 0x10d   :  { %386 = vmatprep.mubr.f32.mxu1 %v3027_v48  ;;  %499 = vmatprep.mubr.f32.mxu0 %v3027_v48  ;;  %v3191_v38 = vpop.f32.mrb[6].mxu0  ;;  %v220_v61 = vmax.f32 %v198_v43, 0.0  ;;  %v3249_v43 = vpack.c.bf16 %v631_v29, %v627_v28 }
 0x10e   :  { %2225 = vmatprep.subr.bf16.mxu1 %v3178_v23  ;;  %2257 = vmatprep.subr.bf16.mxu0 %v3180_v24  ;;  %v207_v42 = vpop.f32.mrb[7].mxu0  ;;  %v213_v45 = vadd.f32 %v3191_v38, %v3153_v50 }
 0x10f   :  { %387 = vmatmul.mubr.f32.gmra.mrb[4].mxu1 %v218_v27  ;;  %500 = vmatmul.mubr.f32.gmra.mrb[12].mxu0 %v218_v27  ;;  %v208_v17 = vadd.f32 %v3153_v50, %v207_v42  ;;  %v629_v27 = vld [vmem:[#allocation6 + $0x1a0] sm:$0xff]  ;;  %v3263_v50 = vpack.c.bf16 %v637_v47, %v633_v44 }
 0x110   :  { %2227 = vmatpush1.bf16.msra.mxu1 %v3184_v31  ;;  %2259 = vmatpush1.bf16.msra.mxu0 %v3186_v32  ;;  %v3247_v42 = vpack.c.bf16 %v629_v27, %v625_v25  ;;  %v223_v57 = vmax.f32 %v213_v45, 0.0 }
 0x111   :  { %392 = vmatprep.mubr.f32.mxu1 %v3027_v48  ;;  %505 = vmatprep.mubr.f32.mxu0 %v3027_v48  ;;  %v222_v35 = vmax.f32 %v208_v17, 0.0 }
 0x112   :  { %2229 = vmatprep.subr.bf16.mxu1 %v3195_v39  ;;  %2261 = vmatprep.subr.bf16.mxu0 %v3197_v40 }
 0x113   :  { %393 = vmatmul.mubr.f32.gmra.mrb[6].mxu1 %v219_v54  ;;  %506 = vmatmul.mubr.f32.gmra.mrb[14].mxu0 %v219_v54  ;;  %v639_v54 = vld [vmem:[#allocation6 + $0x1f0] sm:$0xff] }
 0x114   :  { %2231 = vmatpush1.bf16.msra.mxu1 %v3202_v51  ;;  %2263 = vmatpush1.bf16.msra.mxu0 %v3204_v52  ;;  %v3265_v38 = vpack.c.bf16 %v639_v54, %v635_v53  ;;  %v67_v54 = vld [vmem:[%s3617_s7] sm:$0xff]  ;;  %s3028_s7 = smov [#allocation9]  }
 0x115   :  { %398 = vmatprep.mubr.f32.mxu1 %v3027_v48  ;;  %511 = vmatprep.mubr.f32.mxu0 %v3027_v48  ;;  %s2068_s13 = sshll.u32 %s3028_s7, 4  ;;  %s2069_s13 = int_to_ptr.vmem [resolvable:$true] %s2068_s13 }
 0x116   :  { %2233 = vmatprep.subr.bf16.mxu1 %v3210_v58  ;;  %2265 = vmatprep.subr.bf16.mxu0 %v3212_v59  ;;  %s2971_s14 = scalar_lea.vmem %s2069_s13, 128  ;;  %p2976_p3 = scmp.lt.s32.totalorder %s2069_s13, %s2069_s13 }
 0x117   :  { %399 = vmatmul.mubr.f32.gmra.mrb[8].mxu1 %v220_v61  ;;  %512 = vmatmul.mubr.f32.gmra.mrb[16].mxu0 %v220_v61  ;;  %v290_v61 = vlaneseq  ;;  %p2972_p2 = scmp.ne.s32.totalorder %s2069_s13, %s2971_s14  ;;  %p2977_p4 = scmp.lt.s32.totalorder %s2971_s14, %s2971_s14 }
 0x118   :  { %2235 = vmatpush1.bf16.msra.mxu1 %v3216_v3  ;;  %2267 = vmatpush1.bf16.msra.mxu0 %v3218_v4 }
 0x119   :  { %404 = vmatprep.mubr.f32.mxu1 %v3027_v48  ;;  %517 = vmatprep.mubr.f32.mxu0 %v3027_v48  ;;  %v291_v0 = vshrl.u32 %v290_v61, 7  ;;  %p2978_p5 = por %p2977_p4, %p2976_p3 }
 0x11a   :  { %2237 = vmatprep.subr.bf16.mxu1 %v3226_v12  ;;  %2269 = vmatprep.subr.bf16.mxu0 %v3228_v13 }
 0x11b   :  { %405 = vmatmul.mubr.f32.gmra.mrb[10].mxu1 %v221_v26  ;;  %518 = vmatmul.mubr.f32.gmra.mrb[18].mxu0 %v221_v26  ;;  %v292_v1 = vsub.s32 0, %v291_v0  ;;  %v296_v5 = vsub.s32 1, %v291_v0  ;;  %v304_v14 = vsub.s32 3, %v291_v0  ;;  %v300_v28 = vsub.s32 2, %v291_v0  ;;  %p2979_p6 = pnand %p2978_p5, %p2972_p2 }
 0x11c   :  { %2239 = vmatpush1.bf16.msra.mxu1 %v3233_v21  ;;  %2271 = vmatpush1.bf16.msra.mxu0 %v3235_v22 }
 0x11d   :  { %410 = vmatprep.mubr.f32.mxu1 %v3027_v48  ;;  %523 = vmatprep.mubr.f32.mxu0 %v3027_v48  ;;  %v3317_v6 = vrot.slane %v288_v2, %v292_v1  ;;  %v3319_v7 = vrot.slane %v288_v2, %v296_v5  ;;  %v3323_v27 = vrot.slane %v288_v2, %v304_v14 }
 0x11e   :  { %2241 = vmatprep.subr.bf16.mxu1 %v3241_v30  ;;  %2273 = vmatprep.subr.bf16.mxu0 %v3243_v33  ;;  %v3326_v34 = vrot.slane %v288_v2, %v300_v28 }
 0x11f   :  { %411 = vmatmul.mubr.f32.gmra.mrb[12].mxu1 %v222_v35  ;;  %524 = vmatmul.mubr.f32.gmra.mrb[20].mxu0 %v222_v35 }
 0x120   :  { %2243 = vmatpush1.bf16.msra.mxu1 %v3247_v42  ;;  %2275 = vmatpush1.bf16.msra.mxu0 %v3249_v43 }
 0x121   :  { %416 = vmatprep.mubr.f32.mxu1 %v3027_v48  ;;  %529 = vmatprep.mubr.f32.mxu0 %v3027_v48 }
 0x122   :  { %2245 = vmatprep.subr.bf16.mxu1 %v3257_v55  ;;  %2277 = vmatprep.subr.bf16.mxu0 %v3259_v56 }
 0x123   :  { %417 = vmatmul.mubr.f32.gmra.mrb[14].mxu1 %v223_v57  ;;  %530 = vmatmul.mubr.f32.gmra.mrb[22].mxu0 %v223_v57 }
 0x124   :  { %2247 = vmatpush1.bf16.msra.mxu1 %v3263_v50  ;;  %2279 = vmatpush1.bf16.msra.mxu0 %v3265_v38 }
 0x125   :  { %705 = vmatprep.mubr.f32.mxu1 %v3027_v48  ;;  %776 = vmatprep.mubr.f32.mxu0 %v3027_v48 }
 0x126   :  { %2281 = vmatprep.subr.bf16.mxu1 %v3142_v46  ;;  %2313 = vmatprep.subr.bf16.mxu0 %v3145_v49 }
 0x127   :  { %706 = vmatmul.mubr.f32.vlgmr.msra.gmra.mrb[0].mxu1 %v65_v60  ;;  %777 = vmatmul.mubr.f32.vlgmr.msra.gmra.mrb[8].mxu0 %v65_v60 }
 0x128   :  { %2283 = vmatpush1.bf16.msra.mxu1 %v3156_v62  ;;  %2315 = vmatpush1.bf16.msra.mxu0 %v3158_v63 }
 0x129   :  { %2285 = vmatprep.subr.bf16.mxu1 %v3161_v8  ;;  %2317 = vmatprep.subr.bf16.mxu0 %v3163_v9 }
 0x12a   :  { %882 = vmatprep.mubr.f32.mxu1 %v3027_v48  ;;  %953 = vmatprep.mubr.f32.mxu0 %v3027_v48 }
 0x12c   :  { %2287 = vmatpush1.bf16.msra.mxu1 %v3168_v15  ;;  %2319 = vmatpush1.bf16.msra.mxu0 %v3170_v16 }
 0x12d   :  { %2289 = vmatprep.subr.bf16.mxu1 %v3178_v23  ;;  %2321 = vmatprep.subr.bf16.mxu0 %v3180_v24 }
 0x130   :  { %2291 = vmatpush1.bf16.msra.mxu1 %v3184_v31  ;;  %2323 = vmatpush1.bf16.msra.mxu0 %v3186_v32 }
 0x131   :  { %2293 = vmatprep.subr.bf16.mxu1 %v3195_v39  ;;  %2325 = vmatprep.subr.bf16.mxu0 %v3197_v40 }
 0x134   :  { %2295 = vmatpush1.bf16.msra.mxu1 %v3202_v51  ;;  %2327 = vmatpush1.bf16.msra.mxu0 %v3204_v52 }
 0x135   :  { %2297 = vmatprep.subr.bf16.mxu1 %v3210_v58  ;;  %2329 = vmatprep.subr.bf16.mxu0 %v3212_v59 }
 0x138   :  { %2299 = vmatpush1.bf16.msra.mxu1 %v3216_v3  ;;  %2331 = vmatpush1.bf16.msra.mxu0 %v3218_v4 }
 0x139   :  { %2301 = vmatprep.subr.bf16.mxu1 %v3226_v12  ;;  %2333 = vmatprep.subr.bf16.mxu0 %v3228_v13 }
 0x13c   :  { %2303 = vmatpush1.bf16.msra.mxu1 %v3233_v21  ;;  %2335 = vmatpush1.bf16.msra.mxu0 %v3235_v22 }
 0x13d   :  { %2305 = vmatprep.subr.bf16.mxu1 %v3241_v30  ;;  %2337 = vmatprep.subr.bf16.mxu0 %v3243_v33 }
 0x140   :  { %2307 = vmatpush1.bf16.msra.mxu1 %v3247_v42  ;;  %2339 = vmatpush1.bf16.msra.mxu0 %v3249_v43 }
 0x141   :  { %2309 = vmatprep.subr.bf16.mxu1 %v3257_v55  ;;  %2341 = vmatprep.subr.bf16.mxu0 %v3259_v56 }
 0x144   :  { %2311 = vmatpush1.bf16.msra.mxu1 %v3263_v50  ;;  %2343 = vmatpush1.bf16.msra.mxu0 %v3265_v38 }
 0x145   :  { %2345 = vmatprep.subr.bf16.mxu1 %v3142_v46  ;;  %2377 = vmatprep.subr.bf16.mxu0 %v3145_v49 }
 0x1fa   :  { %v707_v10 = vpop.f32.mrb[0].mxu1  ;;  %v778_v11 = vpop.f32.mrb[8].mxu0 }
 0x1fb   :  { %v2728_v17 = vadd.f32 %v707_v10, %v3317_v6  ;;  %v709_v18 = vpop.f32.mrb[1].mxu1  ;;  %v780_v19 = vpop.f32.mrb[9].mxu0  ;;  %v2744_v36 = vadd.f32 %v778_v11, %v3326_v34 }
 0x1fc   :  { %v2729_v20 = vadd.f32 %v709_v18, %v3319_v7  ;;  %v2745_v29 = vadd.f32 %v780_v19, %v3323_v27 }
 0x1fd   :  { %v2098_v25 = vmul.f32 -1.442695, %v2728_v17 }
 0x1fe   :  { %v2099_v26 = vmul.f32 -1.442695, %v2729_v20  ;;  %v2100_v35 = vmul.f32 -1.442695, %v2745_v29 }
 0x1ff   :  { %2799 = vpow2.f32 %v2098_v25 }
 0x200   :  { %2801 = vpow2.f32 %v2099_v26 }
 0x201   :  { %2803 = vpow2.f32 %v2100_v35 }
 0x202   :  { %2805 = vtanh.f32 %v2744_v36 }
 0x209   :  { %v2800_v37 = vpop.eup %2799 }
 0x20a   :  { %v2802_v41 = vpop.eup %2801  ;;  %v790_v44 = vadd.f32 1.0, %v2800_v37 }
 0x20b   :  { %v796_v45 = vadd.f32 1.0, %v2802_v41  ;;  %v2804_v47 = vpop.eup %2803 }
 0x20c   :  { %2807 = vrcp.f32 %v790_v44  ;;  %v2806_v53 = vpop.eup %2805  ;;  %v803_v0 = vadd.f32 1.0, %v2804_v47 }
 0x20d   :  { %2809 = vrcp.f32 %v796_v45 }
 0x20e   :  { %2811 = vrcp.f32 %v803_v0 }
 0x216   :  { %v2808_v57 = vpop.eup %2807 }
 0x217   :  { %v2810_v60 = vpop.eup %2809  ;;  %v807_v61 = vmul.f32 %v2808_v57, %v2806_v53 }
 0x218   :  { %v806_v1 = vmul.f32 %v2810_v60, %v67_v54  ;;  %v2812_v5 = vpop.eup %2811 }
 0x21a   :  { %v3332_v2 = vadd.f32 %v807_v61, %v806_v1 }
 0x21c   :  { %2813 = vtanh.f32 %v3332_v2 }
 0x226   :  { %v2814_v10 = vpop.eup %2813 }
 0x227   :  { %v810_v11 = vmul.f32 %v2814_v10, %v2812_v5 }
 0x229   :  { %883 = vmatmul.mubr.f32.vlgmr.msra.gmra.mrb[2].mxu1 %v810_v11  ;;  %954 = vmatmul.mubr.f32.vlgmr.msra.gmra.mrb[10].mxu0 %v810_v11 }
 0x22a   :  { %2347 = vmatpush1.bf16.msra.mxu1 %v3156_v62  ;;  %2379 = vmatpush1.bf16.msra.mxu0 %v3158_v63 }
 0x22b   :  { %2349 = vmatprep.subr.bf16.mxu1 %v3161_v8  ;;  %2381 = vmatprep.subr.bf16.mxu0 %v3163_v9 }
 0x22c   :  { %1059 = vmatprep.mubr.f32.mxu1 %v3027_v48  ;;  %1130 = vmatprep.mubr.f32.mxu0 %v3027_v48 }
 0x22e   :  { %2351 = vmatpush1.bf16.msra.mxu1 %v3168_v15  ;;  %2383 = vmatpush1.bf16.msra.mxu0 %v3170_v16 }
 0x22f   :  { %2353 = vmatprep.subr.bf16.mxu1 %v3178_v23  ;;  %2385 = vmatprep.subr.bf16.mxu0 %v3180_v24 }
 0x232   :  { %2355 = vmatpush1.bf16.msra.mxu1 %v3184_v31  ;;  %2387 = vmatpush1.bf16.msra.mxu0 %v3186_v32 }
 0x233   :  { %2357 = vmatprep.subr.bf16.mxu1 %v3195_v39  ;;  %2389 = vmatprep.subr.bf16.mxu0 %v3197_v40 }
 0x236   :  { %2359 = vmatpush1.bf16.msra.mxu1 %v3202_v51  ;;  %2391 = vmatpush1.bf16.msra.mxu0 %v3204_v52 }
 0x237   :  { %2361 = vmatprep.subr.bf16.mxu1 %v3210_v58  ;;  %2393 = vmatprep.subr.bf16.mxu0 %v3212_v59 }
 0x23a   :  { %2363 = vmatpush1.bf16.msra.mxu1 %v3216_v3  ;;  %2395 = vmatpush1.bf16.msra.mxu0 %v3218_v4 }
 0x23b   :  { %2365 = vmatprep.subr.bf16.mxu1 %v3226_v12  ;;  %2397 = vmatprep.subr.bf16.mxu0 %v3228_v13 }
 0x23e   :  { %2367 = vmatpush1.bf16.msra.mxu1 %v3233_v21  ;;  %2399 = vmatpush1.bf16.msra.mxu0 %v3235_v22 }
 0x23f   :  { %2369 = vmatprep.subr.bf16.mxu1 %v3241_v30  ;;  %2401 = vmatprep.subr.bf16.mxu0 %v3243_v33 }
 0x242   :  { %2371 = vmatpush1.bf16.msra.mxu1 %v3247_v42  ;;  %2403 = vmatpush1.bf16.msra.mxu0 %v3249_v43 }
 0x243   :  { %2373 = vmatprep.subr.bf16.mxu1 %v3257_v55  ;;  %2405 = vmatprep.subr.bf16.mxu0 %v3259_v56 }
 0x246   :  { %2375 = vmatpush1.bf16.msra.mxu1 %v3263_v50  ;;  %2407 = vmatpush1.bf16.msra.mxu0 %v3265_v38 }
 0x247   :  { %2409 = vmatprep.subr.bf16.mxu1 %v3142_v46  ;;  %2441 = vmatprep.subr.bf16.mxu0 %v3145_v49 }
 0x2fc   :  { %v884_v14 = vpop.f32.mrb[2].mxu1  ;;  %v955_v17 = vpop.f32.mrb[10].mxu0 }
 0x2fd   :  { %v2730_v18 = vadd.f32 %v884_v14, %v3317_v6  ;;  %v886_v19 = vpop.f32.mrb[3].mxu1  ;;  %v957_v20 = vpop.f32.mrb[11].mxu0  ;;  %v2746_v36 = vadd.f32 %v955_v17, %v3326_v34 }
 0x2fe   :  { %v2731_v25 = vadd.f32 %v886_v19, %v3319_v7  ;;  %v2747_v29 = vadd.f32 %v957_v20, %v3323_v27 }
 0x2ff   :  { %v2101_v26 = vmul.f32 -1.442695, %v2730_v18 }
 0x300   :  { %v2102_v28 = vmul.f32 -1.442695, %v2731_v25  ;;  %v2103_v35 = vmul.f32 -1.442695, %v2747_v29 }
 0x301   :  { %2815 = vpow2.f32 %v2101_v26 }
 0x302   :  { %2817 = vpow2.f32 %v2102_v28 }
 0x303   :  { %2819 = vpow2.f32 %v2103_v35 }
 0x304   :  { %2821 = vtanh.f32 %v2746_v36 }
 0x30b   :  { %v2816_v37 = vpop.eup %2815 }
 0x30c   :  { %v2818_v41 = vpop.eup %2817  ;;  %v967_v44 = vadd.f32 1.0, %v2816_v37 }
 0x30d   :  { %v973_v45 = vadd.f32 1.0, %v2818_v41  ;;  %v2820_v47 = vpop.eup %2819 }
 0x30e   :  { %2823 = vrcp.f32 %v967_v44  ;;  %v2822_v53 = vpop.eup %2821  ;;  %v980_v61 = vadd.f32 1.0, %v2820_v47 }
 0x30f   :  { %2825 = vrcp.f32 %v973_v45 }
 0x310   :  { %2827 = vrcp.f32 %v980_v61 }
 0x318   :  { %v2824_v54 = vpop.eup %2823 }
 0x319   :  { %v2826_v57 = vpop.eup %2825  ;;  %v984_v60 = vmul.f32 %v2824_v54, %v2822_v53 }
 0x31a   :  { %v983_v0 = vmul.f32 %v2826_v57, %v3332_v2  ;;  %v2828_v5 = vpop.eup %2827 }
 0x31c   :  { %v3374_v1 = vadd.f32 %v984_v60, %v983_v0 }
 0x31e   :  { %2829 = vtanh.f32 %v3374_v1 }
 0x328   :  { %v2830_v10 = vpop.eup %2829 }
 0x329   :  { %v987_v11 = vmul.f32 %v2830_v10, %v2828_v5 }
 0x32b   :  { %1060 = vmatmul.mubr.f32.vlgmr.msra.gmra.mrb[4].mxu1 %v987_v11  ;;  %1131 = vmatmul.mubr.f32.vlgmr.msra.gmra.mrb[12].mxu0 %v987_v11 }
 0x32c   :  { %2411 = vmatpush1.bf16.msra.mxu1 %v3156_v62  ;;  %2443 = vmatpush1.bf16.msra.mxu0 %v3158_v63 }
 0x32d   :  { %2413 = vmatprep.subr.bf16.mxu1 %v3161_v8  ;;  %2445 = vmatprep.subr.bf16.mxu0 %v3163_v9 }
 0x32e   :  { %1236 = vmatprep.mubr.f32.mxu1 %v3027_v48  ;;  %1307 = vmatprep.mubr.f32.mxu0 %v3027_v48 }
 0x330   :  { %2415 = vmatpush1.bf16.msra.mxu1 %v3168_v15  ;;  %2447 = vmatpush1.bf16.msra.mxu0 %v3170_v16 }
 0x331   :  { %2417 = vmatprep.subr.bf16.mxu1 %v3178_v23  ;;  %2449 = vmatprep.subr.bf16.mxu0 %v3180_v24 }
 0x334   :  { %2419 = vmatpush1.bf16.msra.mxu1 %v3184_v31  ;;  %2451 = vmatpush1.bf16.msra.mxu0 %v3186_v32 }
 0x335   :  { %2421 = vmatprep.subr.bf16.mxu1 %v3195_v39  ;;  %2453 = vmatprep.subr.bf16.mxu0 %v3197_v40 }
 0x338   :  { %2423 = vmatpush1.bf16.msra.mxu1 %v3202_v51  ;;  %2455 = vmatpush1.bf16.msra.mxu0 %v3204_v52 }
 0x339   :  { %2425 = vmatprep.subr.bf16.mxu1 %v3210_v58  ;;  %2457 = vmatprep.subr.bf16.mxu0 %v3212_v59 }
 0x33c   :  { %2427 = vmatpush1.bf16.msra.mxu1 %v3216_v3  ;;  %2459 = vmatpush1.bf16.msra.mxu0 %v3218_v4 }
 0x33d   :  { %2429 = vmatprep.subr.bf16.mxu1 %v3226_v12  ;;  %2461 = vmatprep.subr.bf16.mxu0 %v3228_v13 }
 0x340   :  { %2431 = vmatpush1.bf16.msra.mxu1 %v3233_v21  ;;  %2463 = vmatpush1.bf16.msra.mxu0 %v3235_v22 }
 0x341   :  { %2433 = vmatprep.subr.bf16.mxu1 %v3241_v30  ;;  %2465 = vmatprep.subr.bf16.mxu0 %v3243_v33 }
 0x344   :  { %2435 = vmatpush1.bf16.msra.mxu1 %v3247_v42  ;;  %2467 = vmatpush1.bf16.msra.mxu0 %v3249_v43 }
 0x345   :  { %2437 = vmatprep.subr.bf16.mxu1 %v3257_v55  ;;  %2469 = vmatprep.subr.bf16.mxu0 %v3259_v56 }
 0x348   :  { %2439 = vmatpush1.bf16.msra.mxu1 %v3263_v50  ;;  %2471 = vmatpush1.bf16.msra.mxu0 %v3265_v38 }
 0x349   :  { %2473 = vmatprep.subr.bf16.mxu1 %v3142_v46  ;;  %2505 = vmatprep.subr.bf16.mxu0 %v3145_v49 }
 0x3fe   :  { %v1061_v2 = vpop.f32.mrb[4].mxu1  ;;  %v1132_v14 = vpop.f32.mrb[12].mxu0 }
 0x3ff   :  { %v2732_v17 = vadd.f32 %v1061_v2, %v3317_v6  ;;  %v1063_v18 = vpop.f32.mrb[5].mxu1  ;;  %v1134_v19 = vpop.f32.mrb[13].mxu0  ;;  %v2748_v35 = vadd.f32 %v1132_v14, %v3326_v34 }
 0x400   :  { %v2733_v20 = vadd.f32 %v1063_v18, %v3319_v7  ;;  %v2749_v28 = vadd.f32 %v1134_v19, %v3323_v27 }
 0x401   :  { %v2104_v25 = vmul.f32 -1.442695, %v2732_v17 }
 0x402   :  { %v2105_v26 = vmul.f32 -1.442695, %v2733_v20  ;;  %v2106_v29 = vmul.f32 -1.442695, %v2749_v28 }
 0x403   :  { %2831 = vpow2.f32 %v2104_v25 }
 0x404   :  { %2833 = vpow2.f32 %v2105_v26 }
 0x405   :  { %2835 = vpow2.f32 %v2106_v29 }
 0x406   :  { %2837 = vtanh.f32 %v2748_v35 }
 0x40d   :  { %v2832_v36 = vpop.eup %2831 }
 0x40e   :  { %v2834_v37 = vpop.eup %2833  ;;  %v1144_v41 = vadd.f32 1.0, %v2832_v36 }
 0x40f   :  { %v1150_v44 = vadd.f32 1.0, %v2834_v37  ;;  %v2836_v45 = vpop.eup %2835 }
 0x410   :  { %2839 = vrcp.f32 %v1144_v41  ;;  %v2838_v47 = vpop.eup %2837  ;;  %v1157_v60 = vadd.f32 1.0, %v2836_v45 }
 0x411   :  { %2841 = vrcp.f32 %v1150_v44 }
 0x412   :  { %2843 = vrcp.f32 %v1157_v60 }
 0x41a   :  { %v2840_v53 = vpop.eup %2839 }
 0x41b   :  { %v2842_v54 = vpop.eup %2841  ;;  %v1161_v57 = vmul.f32 %v2840_v53, %v2838_v47 }
 0x41c   :  { %v1160_v61 = vmul.f32 %v2842_v54, %v3374_v1  ;;  %v2844_v5 = vpop.eup %2843 }
 0x41e   :  { %v3416_v0 = vadd.f32 %v1161_v57, %v1160_v61 }
 0x420   :  { %2845 = vtanh.f32 %v3416_v0 }
 0x42a   :  { %v2846_v10 = vpop.eup %2845 }
 0x42b   :  { %v1164_v11 = vmul.f32 %v2846_v10, %v2844_v5 }
 0x42d   :  { %1237 = vmatmul.mubr.f32.vlgmr.msra.gmra.mrb[6].mxu1 %v1164_v11  ;;  %1308 = vmatmul.mubr.f32.vlgmr.msra.gmra.mrb[14].mxu0 %v1164_v11 }
 0x42e   :  { %2475 = vmatpush1.bf16.msra.mxu1 %v3156_v62  ;;  %2507 = vmatpush1.bf16.msra.mxu0 %v3158_v63 }
 0x42f   :  { %2477 = vmatprep.subr.bf16.mxu1 %v3161_v8  ;;  %2509 = vmatprep.subr.bf16.mxu0 %v3163_v9 }
 0x430   :  { %1413 = vmatprep.mubr.f32.mxu1 %v3027_v48  ;;  %1484 = vmatprep.mubr.f32.mxu0 %v3027_v48 }
 0x432   :  { %2479 = vmatpush1.bf16.msra.mxu1 %v3168_v15  ;;  %2511 = vmatpush1.bf16.msra.mxu0 %v3170_v16 }
 0x433   :  { %2481 = vmatprep.subr.bf16.mxu1 %v3178_v23  ;;  %2513 = vmatprep.subr.bf16.mxu0 %v3180_v24 }
 0x436   :  { %2483 = vmatpush1.bf16.msra.mxu1 %v3184_v31  ;;  %2515 = vmatpush1.bf16.msra.mxu0 %v3186_v32 }
 0x437   :  { %2485 = vmatprep.subr.bf16.mxu1 %v3195_v39  ;;  %2517 = vmatprep.subr.bf16.mxu0 %v3197_v40 }
 0x43a   :  { %2487 = vmatpush1.bf16.msra.mxu1 %v3202_v51  ;;  %2519 = vmatpush1.bf16.msra.mxu0 %v3204_v52 }
 0x43b   :  { %2489 = vmatprep.subr.bf16.mxu1 %v3210_v58  ;;  %2521 = vmatprep.subr.bf16.mxu0 %v3212_v59 }
 0x43e   :  { %2491 = vmatpush1.bf16.msra.mxu1 %v3216_v3  ;;  %2523 = vmatpush1.bf16.msra.mxu0 %v3218_v4 }
 0x43f   :  { %2493 = vmatprep.subr.bf16.mxu1 %v3226_v12  ;;  %2525 = vmatprep.subr.bf16.mxu0 %v3228_v13 }
 0x442   :  { %2495 = vmatpush1.bf16.msra.mxu1 %v3233_v21  ;;  %2527 = vmatpush1.bf16.msra.mxu0 %v3235_v22 }
 0x443   :  { %2497 = vmatprep.subr.bf16.mxu1 %v3241_v30  ;;  %2529 = vmatprep.subr.bf16.mxu0 %v3243_v33 }
 0x446   :  { %2499 = vmatpush1.bf16.msra.mxu1 %v3247_v42  ;;  %2531 = vmatpush1.bf16.msra.mxu0 %v3249_v43 }
 0x447   :  { %2501 = vmatprep.subr.bf16.mxu1 %v3257_v55  ;;  %2533 = vmatprep.subr.bf16.mxu0 %v3259_v56 }
 0x44a   :  { %2503 = vmatpush1.bf16.msra.mxu1 %v3263_v50  ;;  %2535 = vmatpush1.bf16.msra.mxu0 %v3265_v38 }
 0x44b   :  { %2537 = vmatprep.subr.bf16.mxu1 %v3142_v46  ;;  %2569 = vmatprep.subr.bf16.mxu0 %v3145_v49 }
 0x500   :  { %v1238_v1 = vpop.f32.mrb[6].mxu1  ;;  %v1309_v2 = vpop.f32.mrb[14].mxu0 }
 0x501   :  { %v2734_v14 = vadd.f32 %v1238_v1, %v3317_v6  ;;  %v1240_v17 = vpop.f32.mrb[7].mxu1  ;;  %v1311_v18 = vpop.f32.mrb[15].mxu0  ;;  %v2750_v29 = vadd.f32 %v1309_v2, %v3326_v34 }
 0x502   :  { %v2735_v19 = vadd.f32 %v1240_v17, %v3319_v7  ;;  %v2751_v26 = vadd.f32 %v1311_v18, %v3323_v27 }
 0x503   :  { %v2107_v20 = vmul.f32 -1.442695, %v2734_v14 }
 0x504   :  { %v2108_v25 = vmul.f32 -1.442695, %v2735_v19  ;;  %v2109_v28 = vmul.f32 -1.442695, %v2751_v26 }
 0x505   :  { %2847 = vpow2.f32 %v2107_v20 }
 0x506   :  { %2849 = vpow2.f32 %v2108_v25 }
 0x507   :  { %2851 = vpow2.f32 %v2109_v28 }
 0x508   :  { %2853 = vtanh.f32 %v2750_v29 }
 0x50f   :  { %v2848_v35 = vpop.eup %2847 }
 0x510   :  { %v2850_v36 = vpop.eup %2849  ;;  %v1321_v37 = vadd.f32 1.0, %v2848_v35 }
 0x511   :  { %v1327_v41 = vadd.f32 1.0, %v2850_v36  ;;  %v2852_v44 = vpop.eup %2851 }
 0x512   :  { %2855 = vrcp.f32 %v1321_v37  ;;  %v2854_v45 = vpop.eup %2853  ;;  %v1334_v57 = vadd.f32 1.0, %v2852_v44 }
 0x513   :  { %2857 = vrcp.f32 %v1327_v41 }
 0x514   :  { %2859 = vrcp.f32 %v1334_v57 }
 0x51c   :  { %v2856_v47 = vpop.eup %2855 }
 0x51d   :  { %v2858_v53 = vpop.eup %2857  ;;  %v1338_v54 = vmul.f32 %v2856_v47, %v2854_v45 }
 0x51e   :  { %v1337_v60 = vmul.f32 %v2858_v53, %v3416_v0  ;;  %v2860_v5 = vpop.eup %2859 }
 0x520   :  { %v3458_v61 = vadd.f32 %v1338_v54, %v1337_v60 }
 0x522   :  { %2861 = vtanh.f32 %v3458_v61 }
 0x52c   :  { %v2862_v10 = vpop.eup %2861 }
 0x52d   :  { %v1341_v11 = vmul.f32 %v2862_v10, %v2860_v5 }
 0x52f   :  { %1414 = vmatmul.mubr.f32.vlgmr.msra.gmra.mrb[8].mxu1 %v1341_v11  ;;  %1485 = vmatmul.mubr.f32.vlgmr.msra.gmra.mrb[16].mxu0 %v1341_v11 }
 0x530   :  { %2539 = vmatpush1.bf16.msra.mxu1 %v3156_v62  ;;  %2571 = vmatpush1.bf16.msra.mxu0 %v3158_v63 }
 0x531   :  { %2541 = vmatprep.subr.bf16.mxu1 %v3161_v8  ;;  %2573 = vmatprep.subr.bf16.mxu0 %v3163_v9 }
 0x532   :  { %1590 = vmatprep.mubr.f32.mxu1 %v3027_v48  ;;  %1661 = vmatprep.mubr.f32.mxu0 %v3027_v48 }
 0x534   :  { %2543 = vmatpush1.bf16.msra.mxu1 %v3168_v15  ;;  %2575 = vmatpush1.bf16.msra.mxu0 %v3170_v16 }
 0x535   :  { %2545 = vmatprep.subr.bf16.mxu1 %v3178_v23  ;;  %2577 = vmatprep.subr.bf16.mxu0 %v3180_v24 }
 0x538   :  { %2547 = vmatpush1.bf16.msra.mxu1 %v3184_v31  ;;  %2579 = vmatpush1.bf16.msra.mxu0 %v3186_v32 }
 0x539   :  { %2549 = vmatprep.subr.bf16.mxu1 %v3195_v39  ;;  %2581 = vmatprep.subr.bf16.mxu0 %v3197_v40 }
 0x53c   :  { %2551 = vmatpush1.bf16.msra.mxu1 %v3202_v51  ;;  %2583 = vmatpush1.bf16.msra.mxu0 %v3204_v52 }
 0x53d   :  { %2553 = vmatprep.subr.bf16.mxu1 %v3210_v58  ;;  %2585 = vmatprep.subr.bf16.mxu0 %v3212_v59 }
 0x540   :  { %2555 = vmatpush1.bf16.msra.mxu1 %v3216_v3  ;;  %2587 = vmatpush1.bf16.msra.mxu0 %v3218_v4 }
 0x541   :  { %2557 = vmatprep.subr.bf16.mxu1 %v3226_v12  ;;  %2589 = vmatprep.subr.bf16.mxu0 %v3228_v13 }
 0x544   :  { %2559 = vmatpush1.bf16.msra.mxu1 %v3233_v21  ;;  %2591 = vmatpush1.bf16.msra.mxu0 %v3235_v22 }
 0x545   :  { %2561 = vmatprep.subr.bf16.mxu1 %v3241_v30  ;;  %2593 = vmatprep.subr.bf16.mxu0 %v3243_v33 }
 0x548   :  { %2563 = vmatpush1.bf16.msra.mxu1 %v3247_v42  ;;  %2595 = vmatpush1.bf16.msra.mxu0 %v3249_v43 }
 0x549   :  { %2565 = vmatprep.subr.bf16.mxu1 %v3257_v55  ;;  %2597 = vmatprep.subr.bf16.mxu0 %v3259_v56 }
 0x54c   :  { %2567 = vmatpush1.bf16.msra.mxu1 %v3263_v50  ;;  %2599 = vmatpush1.bf16.msra.mxu0 %v3265_v38 }
 0x54d   :  { %2601 = vmatprep.subr.bf16.mxu1 %v3142_v46  ;;  %2633 = vmatprep.subr.bf16.mxu0 %v3145_v49 }
 0x602   :  { %v1415_v0 = vpop.f32.mrb[8].mxu1  ;;  %v1486_v1 = vpop.f32.mrb[16].mxu0 }
 0x603   :  { %v2736_v2 = vadd.f32 %v1415_v0, %v3317_v6  ;;  %v1417_v14 = vpop.f32.mrb[9].mxu1  ;;  %v1488_v17 = vpop.f32.mrb[17].mxu0  ;;  %v2752_v28 = vadd.f32 %v1486_v1, %v3326_v34 }
 0x604   :  { %v2737_v18 = vadd.f32 %v1417_v14, %v3319_v7  ;;  %v2753_v25 = vadd.f32 %v1488_v17, %v3323_v27 }
 0x605   :  { %v2110_v19 = vmul.f32 -1.442695, %v2736_v2 }
 0x606   :  { %v2111_v20 = vmul.f32 -1.442695, %v2737_v18  ;;  %v2112_v26 = vmul.f32 -1.442695, %v2753_v25 }
 0x607   :  { %2863 = vpow2.f32 %v2110_v19 }
 0x608   :  { %2865 = vpow2.f32 %v2111_v20 }
 0x609   :  { %2867 = vpow2.f32 %v2112_v26 }
 0x60a   :  { %2869 = vtanh.f32 %v2752_v28 }
 0x611   :  { %v2864_v29 = vpop.eup %2863 }
 0x612   :  { %v2866_v35 = vpop.eup %2865  ;;  %v1498_v36 = vadd.f32 1.0, %v2864_v29 }
 0x613   :  { %v1504_v37 = vadd.f32 1.0, %v2866_v35  ;;  %v2868_v41 = vpop.eup %2867 }
 0x614   :  { %2871 = vrcp.f32 %v1498_v36  ;;  %v2870_v44 = vpop.eup %2869  ;;  %v1511_v54 = vadd.f32 1.0, %v2868_v41 }
 0x615   :  { %2873 = vrcp.f32 %v1504_v37 }
 0x616   :  { %2875 = vrcp.f32 %v1511_v54 }
 0x61e   :  { %v2872_v45 = vpop.eup %2871 }
 0x61f   :  { %v2874_v47 = vpop.eup %2873  ;;  %v1515_v53 = vmul.f32 %v2872_v45, %v2870_v44 }
 0x620   :  { %v1514_v57 = vmul.f32 %v2874_v47, %v3458_v61  ;;  %v2876_v5 = vpop.eup %2875 }
 0x622   :  { %v3500_v60 = vadd.f32 %v1515_v53, %v1514_v57 }
 0x624   :  { %2877 = vtanh.f32 %v3500_v60 }
 0x62e   :  { %v2878_v10 = vpop.eup %2877 }
 0x62f   :  { %v1518_v11 = vmul.f32 %v2878_v10, %v2876_v5 }
 0x631   :  { %1591 = vmatmul.mubr.f32.vlgmr.msra.gmra.mrb[10].mxu1 %v1518_v11  ;;  %1662 = vmatmul.mubr.f32.vlgmr.msra.gmra.mrb[18].mxu0 %v1518_v11 }
 0x632   :  { %2603 = vmatpush1.bf16.msra.mxu1 %v3156_v62  ;;  %2635 = vmatpush1.bf16.msra.mxu0 %v3158_v63 }
 0x633   :  { %2605 = vmatprep.subr.bf16.mxu1 %v3161_v8  ;;  %2637 = vmatprep.subr.bf16.mxu0 %v3163_v9 }
 0x634   :  { %1767 = vmatprep.mubr.f32.mxu1 %v3027_v48  ;;  %1838 = vmatprep.mubr.f32.mxu0 %v3027_v48 }
 0x636   :  { %2607 = vmatpush1.bf16.msra.mxu1 %v3168_v15  ;;  %2639 = vmatpush1.bf16.msra.mxu0 %v3170_v16 }
 0x637   :  { %2609 = vmatprep.subr.bf16.mxu1 %v3178_v23  ;;  %2641 = vmatprep.subr.bf16.mxu0 %v3180_v24 }
 0x63a   :  { %2611 = vmatpush1.bf16.msra.mxu1 %v3184_v31  ;;  %2643 = vmatpush1.bf16.msra.mxu0 %v3186_v32 }
 0x63b   :  { %2613 = vmatprep.subr.bf16.mxu1 %v3195_v39  ;;  %2645 = vmatprep.subr.bf16.mxu0 %v3197_v40 }
 0x63e   :  { %2615 = vmatpush1.bf16.msra.mxu1 %v3202_v51  ;;  %2647 = vmatpush1.bf16.msra.mxu0 %v3204_v52 }
 0x63f   :  { %2617 = vmatprep.subr.bf16.mxu1 %v3210_v58  ;;  %2649 = vmatprep.subr.bf16.mxu0 %v3212_v59 }
 0x642   :  { %2619 = vmatpush1.bf16.msra.mxu1 %v3216_v3  ;;  %2651 = vmatpush1.bf16.msra.mxu0 %v3218_v4 }
 0x643   :  { %2621 = vmatprep.subr.bf16.mxu1 %v3226_v12  ;;  %2653 = vmatprep.subr.bf16.mxu0 %v3228_v13 }
 0x646   :  { %2623 = vmatpush1.bf16.msra.mxu1 %v3233_v21  ;;  %2655 = vmatpush1.bf16.msra.mxu0 %v3235_v22 }
 0x647   :  { %2625 = vmatprep.subr.bf16.mxu1 %v3241_v30  ;;  %2657 = vmatprep.subr.bf16.mxu0 %v3243_v33 }
 0x64a   :  { %2627 = vmatpush1.bf16.msra.mxu1 %v3247_v42  ;;  %2659 = vmatpush1.bf16.msra.mxu0 %v3249_v43 }
 0x64b   :  { %2629 = vmatprep.subr.bf16.mxu1 %v3257_v55  ;;  %2661 = vmatprep.subr.bf16.mxu0 %v3259_v56 }
 0x64e   :  { %2631 = vmatpush1.bf16.msra.mxu1 %v3263_v50  ;;  %2663 = vmatpush1.bf16.msra.mxu0 %v3265_v38 }
 0x64f   :  { %2665 = vmatprep.subr.bf16.mxu1 %v3142_v46  ;;  %2697 = vmatprep.subr.bf16.mxu0 %v3145_v49 }
 0x704   :  { %v1592_v61 = vpop.f32.mrb[10].mxu1  ;;  %v1663_v0 = vpop.f32.mrb[18].mxu0 }
 0x705   :  { %v2738_v1 = vadd.f32 %v1592_v61, %v3317_v6  ;;  %v1594_v2 = vpop.f32.mrb[11].mxu1  ;;  %v1665_v14 = vpop.f32.mrb[19].mxu0  ;;  %v2754_v26 = vadd.f32 %v1663_v0, %v3326_v34 }
 0x706   :  { %v2739_v17 = vadd.f32 %v1594_v2, %v3319_v7  ;;  %v2755_v20 = vadd.f32 %v1665_v14, %v3323_v27 }
 0x707   :  { %v2113_v18 = vmul.f32 -1.442695, %v2738_v1 }
 0x708   :  { %v2114_v19 = vmul.f32 -1.442695, %v2739_v17  ;;  %v2115_v25 = vmul.f32 -1.442695, %v2755_v20 }
 0x709   :  { %2879 = vpow2.f32 %v2113_v18 }
 0x70a   :  { %2881 = vpow2.f32 %v2114_v19 }
 0x70b   :  { %2883 = vpow2.f32 %v2115_v25 }
 0x70c   :  { %2885 = vtanh.f32 %v2754_v26 }
 0x713   :  { %v2880_v46 = vpop.eup %2879 }
 0x714   :  { %v2882_v28 = vpop.eup %2881  ;;  %v1675_v49 = vadd.f32 1.0, %v2880_v46 }
 0x715   :  { %v1681_v29 = vadd.f32 1.0, %v2882_v28  ;;  %v2884_v35 = vpop.eup %2883 }
 0x716   :  { %2887 = vrcp.f32 %v1675_v49  ;;  %v2886_v36 = vpop.eup %2885  ;;  %v1688_v45 = vadd.f32 1.0, %v2884_v35 }
 0x717   :  { %2889 = vrcp.f32 %v1681_v29 }
 0x718   :  { %2891 = vrcp.f32 %v1688_v45 }
 0x720   :  { %v2888_v37 = vpop.eup %2887 }
 0x721   :  { %v2890_v41 = vpop.eup %2889  ;;  %v1692_v44 = vmul.f32 %v2888_v37, %v2886_v36 }
 0x722   :  { %v1691_v47 = vmul.f32 %v2890_v41, %v3500_v60  ;;  %v2892_v54 = vpop.eup %2891 }
 0x724   :  { %v3542_v53 = vadd.f32 %v1692_v44, %v1691_v47 }
 0x726   :  { %2893 = vtanh.f32 %v3542_v53 }
 0x730   :  { %v2894_v57 = vpop.eup %2893 }
 0x731   :  { %v1695_v5 = vmul.f32 %v2894_v57, %v2892_v54 }
 0x733   :  { %1768 = vmatmul.mubr.f32.vlgmr.msra.gmra.mrb[12].mxu1 %v1695_v5  ;;  %1839 = vmatmul.mubr.f32.vlgmr.msra.gmra.mrb[20].mxu0 %v1695_v5 }
 0x734   :  { %2667 = vmatpush1.bf16.msra.mxu1 %v3156_v62  ;;  %2699 = vmatpush1.bf16.msra.mxu0 %v3158_v63 }
 0x735   :  { %2669 = vmatprep.subr.bf16.mxu1 %v3161_v8  ;;  %2701 = vmatprep.subr.bf16.mxu0 %v3163_v9 }
 0x736   :  { %1944 = vmatprep.mubr.f32.mxu1 %v3027_v48  ;;  %2015 = vmatprep.mubr.f32.mxu0 %v3027_v48 }
 0x738   :  { %2671 = vmatpush1.bf16.msra.mxu1 %v3168_v15  ;;  %2703 = vmatpush1.bf16.msra.mxu0 %v3170_v16 }
 0x739   :  { %2673 = vmatprep.subr.bf16.mxu1 %v3178_v23  ;;  %2705 = vmatprep.subr.bf16.mxu0 %v3180_v24 }
 0x73c   :  { %2675 = vmatpush1.bf16.msra.mxu1 %v3184_v31  ;;  %2707 = vmatpush1.bf16.msra.mxu0 %v3186_v32 }
 0x73d   :  { %2677 = vmatprep.subr.bf16.mxu1 %v3195_v39  ;;  %2709 = vmatprep.subr.bf16.mxu0 %v3197_v40 }
 0x740   :  { %2679 = vmatpush1.bf16.msra.mxu1 %v3202_v51  ;;  %2711 = vmatpush1.bf16.msra.mxu0 %v3204_v52 }
 0x741   :  { %2681 = vmatprep.subr.bf16.mxu1 %v3210_v58  ;;  %2713 = vmatprep.subr.bf16.mxu0 %v3212_v59 }
 0x744   :  { %2683 = vmatpush1.bf16.msra.mxu1 %v3216_v3  ;;  %2715 = vmatpush1.bf16.msra.mxu0 %v3218_v4 }
 0x745   :  { %2685 = vmatprep.subr.bf16.mxu1 %v3226_v12  ;;  %2717 = vmatprep.subr.bf16.mxu0 %v3228_v13 }
 0x748   :  { %2687 = vmatpush1.bf16.msra.mxu1 %v3233_v21  ;;  %2719 = vmatpush1.bf16.msra.mxu0 %v3235_v22 }
 0x749   :  { %2689 = vmatprep.subr.bf16.mxu1 %v3241_v30  ;;  %2721 = vmatprep.subr.bf16.mxu0 %v3243_v33 }
 0x74c   :  { %2691 = vmatpush1.bf16.msra.mxu1 %v3247_v42  ;;  %2723 = vmatpush1.bf16.msra.mxu0 %v3249_v43 }
 0x74d   :  { %2693 = vmatprep.subr.bf16.mxu1 %v3257_v55  ;;  %2725 = vmatprep.subr.bf16.mxu0 %v3259_v56 }
 0x750   :  { %2695 = vmatpush1.bf16.msra.mxu1 %v3263_v50  ;;  %2727 = vmatpush1.bf16.msra.mxu0 %v3265_v38 }
 0x806   :  { %v1769_v48 = vpop.f32.mrb[12].mxu1  ;;  %v1840_v62 = vpop.f32.mrb[20].mxu0 }
 0x807   :  { %v2740_v63 = vadd.f32 %v1769_v48, %v3317_v6  ;;  %v1771_v8 = vpop.f32.mrb[13].mxu1  ;;  %v1842_v9 = vpop.f32.mrb[21].mxu0  ;;  %v2756_v32 = vadd.f32 %v1840_v62, %v3326_v34 }
 0x808   :  { %v2741_v15 = vadd.f32 %v1771_v8, %v3319_v7  ;;  %v2757_v24 = vadd.f32 %v1842_v9, %v3323_v27 }
 0x809   :  { %v2116_v16 = vmul.f32 -1.442695, %v2740_v63 }
 0x80a   :  { %v2117_v23 = vmul.f32 -1.442695, %v2741_v15  ;;  %v2118_v31 = vmul.f32 -1.442695, %v2757_v24 }
 0x80b   :  { %2895 = vpow2.f32 %v2116_v16 }
 0x80c   :  { %2897 = vpow2.f32 %v2117_v23 }
 0x80d   :  { %2899 = vpow2.f32 %v2118_v31 }
 0x80e   :  { %2901 = vtanh.f32 %v2756_v32 }
 0x815   :  { %v2896_v39 = vpop.eup %2895 }
 0x816   :  { %v2898_v40 = vpop.eup %2897  ;;  %v1852_v51 = vadd.f32 1.0, %v2896_v39 }
 0x817   :  { %v1858_v52 = vadd.f32 1.0, %v2898_v40  ;;  %v2900_v58 = vpop.eup %2899 }
 0x818   :  { %2903 = vrcp.f32 %v1852_v51  ;;  %v2902_v59 = vpop.eup %2901  ;;  %v1865_v13 = vadd.f32 1.0, %v2900_v58 }
 0x819   :  { %2905 = vrcp.f32 %v1858_v52 }
 0x81a   :  { %2907 = vrcp.f32 %v1865_v13 }
 0x822   :  { %v2904_v3 = vpop.eup %2903 }
 0x823   :  { %v2906_v4 = vpop.eup %2905  ;;  %v1869_v12 = vmul.f32 %v2904_v3, %v2902_v59 }
 0x824   :  { %v1868_v21 = vmul.f32 %v2906_v4, %v3542_v53  ;;  %v2908_v30 = vpop.eup %2907 }
 0x826   :  { %v1870_v22 = vadd.f32 %v1869_v12, %v1868_v21 }
 0x828   :  { %2909 = vtanh.f32 %v1870_v22 }
 0x832   :  { %v2910_v33 = vpop.eup %2909 }
 0x833   :  { %v1872_v42 = vmul.f32 %v2910_v33, %v2908_v30 }
 0x835   :  { %1945 = vmatmul.mubr.f32.vlgmr.msra.gmra.mrb[14].mxu1 %v1872_v42  ;;  %2016 = vmatmul.mubr.f32.vlgmr.msra.gmra.mrb[22].mxu0 %v1872_v42 }
 0x908   :  { %v1946_v43 = vpop.f32.mrb[14].mxu1  ;;  %v2017_v55 = vpop.f32.mrb[22].mxu0 }
 0x909   :  { %v2742_v56 = vadd.f32 %v1946_v43, %v3317_v6  ;;  %v1948_v50 = vpop.f32.mrb[15].mxu1  ;;  %v2019_v38 = vpop.f32.mrb[23].mxu0  ;;  %v2758_v1 = vadd.f32 %v2017_v55, %v3326_v34 }
 0x90a   :  { %v2743_v60 = vadd.f32 %v1948_v50, %v3319_v7  ;;  %v2759_v61 = vadd.f32 %v2019_v38, %v3323_v27 }
 0x90b   :  { %v2119_v10 = vmul.f32 -1.442695, %v2742_v56 }
 0x90c   :  { %v2120_v11 = vmul.f32 -1.442695, %v2743_v60  ;;  %v2121_v0 = vmul.f32 -1.442695, %v2759_v61 }
 0x90d   :  { %2911 = vpow2.f32 %v2119_v10 }
 0x90e   :  { %2913 = vpow2.f32 %v2120_v11 }
 0x90f   :  { %2915 = vpow2.f32 %v2121_v0 }
 0x910   :  { %2917 = vtanh.f32 %v2758_v1 }
 0x917   :  { %v2912_v2 = vpop.eup %2911 }
 0x918   :  { %v2914_v14 = vpop.eup %2913  ;;  %v2029_v17 = vadd.f32 1.0, %v2912_v2 }
 0x919   :  { %v2035_v18 = vadd.f32 1.0, %v2914_v14  ;;  %v2916_v6 = vpop.eup %2915 }
 0x91a   :  { %2919 = vrcp.f32 %v2029_v17  ;;  %v2918_v19 = vpop.eup %2917  ;;  %v2042_v26 = vadd.f32 1.0, %v2916_v6 }
 0x91b   :  { %2921 = vrcp.f32 %v2035_v18 }
 0x91c   :  { %2923 = vrcp.f32 %v2042_v26 }
 0x924   :  { %v2920_v7 = vpop.eup %2919 }
 0x925   :  { %v2922_v20 = vpop.eup %2921  ;;  %v2046_v25 = vmul.f32 %v2920_v7, %v2918_v19 }
 0x926   :  { %v2045_v27 = vmul.f32 %v2922_v20, %v1870_v22 }
 0x928   :  { %v2047_v46 = vadd.f32 %v2046_v25, %v2045_v27 }
 0x92a   :  { %2925 = vtanh.f32 %v2047_v46  ;;  %2051 = vst [vmem:[#allocation9] sm:$0xff] %v2047_v46 }
 0x92b   :  { %2982 = shalt.err (!%p2979_p6)
}
 0x92c   :  { %s2983_s17 = scalar_lea.hbm %s3619_s9, 128 }
 0x92d   :  { %p2984_p7 = scmp.ne.s32.totalorder %s3619_s9, %s2983_s17  ;;  %p2987_p8 = scmp.lt.u32.totalorder %s2983_s17, %s3619_s9 }
 0x92f   :  { %p2989_p9 = pnand %p2987_p8, %p2984_p7 }
 0x931   :  { %2992 = shalt.err (!%p2989_p9)
}
 0x932   :  { %2071 = dma.vmem_to_hbm [thread:$0]  %s2069_s13, 128, %s3619_s9, [#allocation10]   ;;  %v2924_v34 = vpop.eup %2923 }
 0x933   :  { %s3029_s22 = smov [#allocation8]  }
 0x934   :  { %s2058_s23 = sshll.u32 %s3029_s22, 4  ;;  %v2926_v28 = vpop.eup %2925  ;;  %s2059_s23 = int_to_ptr.vmem [resolvable:$true] %s2058_s23 }
 0x935   :  { %v2049_v49 = vmul.f32 %v2926_v28, %v2924_v34  ;;  %s2993_s24 = scalar_lea.vmem %s2059_s23, 128  ;;  %p2998_p11 = scmp.lt.s32.totalorder %s2059_s23, %s2059_s23 }
 0x936   :  { %p2994_p10 = scmp.ne.s32.totalorder %s2059_s23, %s2993_s24  ;;  %p2999_p12 = scmp.lt.s32.totalorder %s2993_s24, %s2993_s24 }
 0x937   :  { %2050 = vst [vmem:[#allocation8] sm:$0xff] %v2049_v49 }
 0x938   :  { %p3000_p13 = por %p2999_p12, %p2998_p11 }
 0x93a   :  { %p3001_p0 = pnand %p3000_p13, %p2994_p10 }
 0x93c   :  { %3004 = shalt.err (!%p3001_p0)
}
 0x93d   :  { %s3005_s27 = scalar_lea.hbm %s3618_s8, 128 }
 0x93e   :  { %p3006_p1 = scmp.ne.s32.totalorder %s3618_s8, %s3005_s27  ;;  %p3009_p2 = scmp.lt.u32.totalorder %s3005_s27, %s3618_s8 }
 0x940   :  { %p3011_p3 = pnand %p3009_p2, %p3006_p1 }
 0x942   :  { %3014 = shalt.err (!%p3011_p3)
}
 0x943   :  { %2061 = dma.vmem_to_hbm [thread:$0]  %s2059_s23, 128, %s3618_s8, [#allocation5]  }
 0x944   :  { %3019 = dma.done.wait [#allocation5], 128  }
 0x945   :  { %3020 = vsyncadd [#allocation5], 4294967168 }
 0x946   :  { %3021 = dma.done.wait [#allocation10], 128  }
 0x947   :  { %3022 = vsyncadd [#allocation10], 4294967168 }
 0x948   :  { %2078 = vsyncpa [#allocation4], 1 }
 0x949   :  { %2079 = vsyncpa [#allocation7], 1 }
 0x94a   :  { %2080 = vsyncpa [#allocation5], 1 }
 0x94b   :  { %2081 = vsyncpa [#allocation10], 1 }

// kernel: tpu_custom_call.1
= control target key start
LH: loop header
LB: loop body
LE: loop exit
PB: predicated region body
PF: predicated region fallthrough
CT: control target
= control target key end

     0   :  { %15 = vsyncpa [#allocation4], 0  ;;  %s3610_s0 = inlined_call_operand.vmem [shape: f32[64,16], index: 0, kind: input, shape index: {}]   ;;  %s3611_s1 = inlined_call_operand.vmem [shape: f32[16,128], index: 1, kind: input, shape index: {}]   ;;  %s3612_s2 = inlined_call_operand.vmem [shape: f32[1,128], index: 2, kind: input, shape index: {}]   ;;  %s3613_s3 = inlined_call_operand.hbm [shape: f32[128,512], index: 3, kind: input, shape index: {}]   ;;  %s3614_s4 = inlined_call_operand.vmem [shape: f32[1,512], index: 4, kind: input, shape index: {}]   ;;  %s3615_s5 = inlined_call_operand.hbm [shape: f32[128,512], index: 5, kind: input, shape index: {}]   ;;  %s3616_s6 = inlined_call_operand.vmem [shape: f32[8,128], index: 6, kind: input, shape index: {}]   ;;  %s3617_s7 = inlined_call_operand.vmem [shape: f32[8,128], index: 7, kind: input, shape index: {}]   ;;  %s3618_s8 = inlined_call_operand.hbm [shape: f32[8,128], index: 8, kind: output, shape index: {0}]   ;;  %s3619_s9 = inlined_call_operand.hbm [shape: f32[8,128], index: 9, kind: output, shape index: {1}]  }
   0x1   :  { %16 = vsyncpa [#allocation7], 0 }
   0x2   :  { %17 = vsyncpa [#allocation5], 0 }
   0x3   :  { %18 = vsyncpa [#allocation10], 0  ;;  %s3023_s30 = smov [#allocation3]   ;;  %s2927_s13 = scalar_lea.hbm %s3613_s3, 8192 }
   0x4   :  { %s30_s10 = sshll.u32 %s3023_s30, 4  ;;  %p2928_p0 = scmp.ne.s32.totalorder %s3613_s3, %s2927_s13  ;;  %s31_s10 = int_to_ptr.vmem [resolvable:$true] %s30_s10 }
   0x5   :  { %p2931_p1 = scmp.lt.u32.totalorder %s2927_s13, %s3613_s3 }
   0x7   :  { %p2933_p2 = pnand %p2931_p1, %p2928_p0 }
   0x9   :  { %2936 = shalt.err (!%p2933_p2)
}
   0xa   :  { %s2937_s18 = scalar_lea.vmem %s31_s10, 8192  ;;  %p2942_p4 = scmp.lt.s32.totalorder %s31_s10, %s31_s10 }
   0xb   :  { %p2938_p3 = scmp.ne.s32.totalorder %s31_s10, %s2937_s18  ;;  %p2943_p5 = scmp.lt.s32.totalorder %s2937_s18, %s2937_s18 }
   0xd   :  { %p2944_p6 = por %p2943_p5, %p2942_p4 }
   0xf   :  { %p2945_p7 = pnand %p2944_p6, %p2938_p3 }
  0x11   :  { %2948 = shalt.err (!%p2945_p7)
}
  0x12   :  { %s3024_s19 = smov 512   ;;  %s3025_s20 = smov 32  }
  0x13   :  { %36 = dma.hbm_to_vmem [thread:$0]  %s3613_s3, 8192, %s31_s10, [#allocation4], %s3024_s19, %s3024_s19, %s3025_s20  }
  0x14   :  { %s3026_s23 = smov [#allocation6]   ;;  %s2949_s27 = scalar_lea.hbm %s3615_s5, 8192 }
  0x15   :  { %s44_s24 = sshll.u32 %s3026_s23, 4  ;;  %p2950_p8 = scmp.ne.s32.totalorder %s3615_s5, %s2949_s27  ;;  %s45_s24 = int_to_ptr.vmem [resolvable:$true] %s44_s24 }
  0x16   :  { %p2953_p9 = scmp.lt.u32.totalorder %s2949_s27, %s3615_s5 }
  0x18   :  { %p2955_p10 = pnand %p2953_p9, %p2950_p8 }
  0x1a   :  { %2958 = shalt.err (!%p2955_p10)
}
  0x1b   :  { %s2959_s12 = scalar_lea.vmem %s45_s24, 8192  ;;  %p2964_p12 = scmp.lt.s32.totalorder %s45_s24, %s45_s24 }
  0x1c   :  { %p2960_p11 = scmp.ne.s32.totalorder %s45_s24, %s2959_s12  ;;  %p2965_p13 = scmp.lt.s32.totalorder %s2959_s12, %s2959_s12 }
  0x1e   :  { %p2966_p0 = por %p2965_p13, %p2964_p12 }
  0x20   :  { %p2967_p1 = pnand %p2966_p0, %p2960_p11 }
  0x22   :  { %2970 = shalt.err (!%p2967_p1)
}
  0x23   :  { %50 = dma.hbm_to_vmem [thread:$0]  %s3615_s5, 8192, %s45_s24, [#allocation7], %s3024_s19, %s3024_s19, %s3025_s20  }
  0x24   :  { %3015 = dma.done.wait [#allocation4], 8192  }
  0x25   :  { %3016 = vsyncadd [#allocation4], 4294959104 }
  0x26   :  { %3017 = dma.done.wait [#allocation7], 8192  }
  0x27   :  { %3018 = vsyncadd [#allocation7], 4294959104  ;;  %vm86_vm0 = vcmask 130048   ;;  %v77_v0 = vld [vmem:[%s3611_s1] sm:$0xff]  ;;  %v78_v1 = vld [vmem:[%s3611_s1 + $0x8] sm:$0xff] }
  0x28   :  { %v69_v2 = vld [vmem:[%s3610_s0] sm:$0xff]  ;;  %v2148_v3 = vpack.c.bf16 %v78_v1, %v77_v0  ;;  %v70_v4 = vld [vmem:[%s3610_s0 + $0x8] sm:$0xff]  ;;  %v71_v5 = vld [vmem:[%s3610_s0 + $0x10] sm:$0xff] }
  0x29   :  { %2136 = vmatprep.mubr.msk.f32.mxu0 %vm86_vm0, %v69_v2  ;;  %v225_v6 = vld [vmem:[#allocation3 + $0x8] sm:$0xff]  ;;  %v224_v9 = vld [vmem:[#allocation3] sm:$0xff]  ;;  %v227_v11 = vld [vmem:[#allocation3 + $0x18] sm:$0xff] }
  0x2a   :  { %2149 = vmatprep.subr.bf16.mxu0 %v2148_v3  ;;  %v229_v7 = vld [vmem:[#allocation3 + $0x28] sm:$0xff]  ;;  %v228_v10 = vld [vmem:[#allocation3 + $0x20] sm:$0xff]  ;;  %v231_v13 = vld [vmem:[#allocation3 + $0x38] sm:$0xff] }
  0x2b   :  { %2151 = vmatpush3.bf16.msra.mxu0 %v2148_v3  ;;  %v2152_v8 = vpack.c.bf16 %v229_v7, %v225_v6  ;;  %v2154_v12 = vpack.c.bf16 %v228_v10, %v224_v9  ;;  %v226_v14 = vld [vmem:[#allocation3 + $0x10] sm:$0xff]  ;;  %v72_v16 = vld [vmem:[%s3610_s0 + $0x18] sm:$0xff]  ;;  %v2184_v17 = vpack.c.bf16 %v231_v13, %v227_v11  ;;  %v233_v19 = vld [vmem:[#allocation3 + $0x48] sm:$0xff] }
  0x2c   :  { %v230_v15 = vld [vmem:[#allocation3 + $0x30] sm:$0xff]  ;;  %v237_v20 = vld [vmem:[#allocation3 + $0x68] sm:$0xff]  ;;  %v232_v21 = vld [vmem:[#allocation3 + $0x40] sm:$0xff] }
  0x2d   :  { %2153 = vmatprep.subr.bf16.mxu1 %v2152_v8  ;;  %v2186_v18 = vpack.c.bf16 %v230_v15, %v226_v14  ;;  %v73_v22 = vld [vmem:[%s3610_s0 + $0x20] sm:$0xff]  ;;  %v2156_v23 = vpack.c.bf16 %v237_v20, %v233_v19  ;;  %v235_v25 = vld [vmem:[#allocation3 + $0x58] sm:$0xff]  ;;  %2185 = vmatprep.subr.bf16.mxu0 %v2184_v17  ;;  %v234_v29 = vld [vmem:[#allocation3 + $0x50] sm:$0xff] }
  0x2e   :  { %2137 = vmatmul.mubr.msk.f32.vlgmr.msra.gmra.mrb[0].mxu0 %vm86_vm0, %v70_v4  ;;  %2155 = vmatpush1.bf16.msra.mxu1 %v2154_v12  ;;  %v236_v24 = vld [vmem:[#allocation3 + $0x60] sm:$0xff]  ;;  %v239_v26 = vld [vmem:[#allocation3 + $0x78] sm:$0xff]  ;;  %v238_v30 = vld [vmem:[#allocation3 + $0x70] sm:$0xff] }
  0x2f   :  { %2139 = vmatprep.mubr.msk.f32.mxu0 %vm86_vm0, %v71_v5  ;;  %v2158_v27 = vpack.c.bf16 %v236_v24, %v232_v21  ;;  %v2188_v28 = vpack.c.bf16 %v239_v26, %v235_v25  ;;  %v241_v31 = vld [vmem:[#allocation3 + $0x88] sm:$0xff]  ;;  %2187 = vmatpush1.bf16.msra.mxu0 %v2186_v18  ;;  %v2190_v32 = vpack.c.bf16 %v238_v30, %v234_v29  ;;  %v240_v34 = vld [vmem:[#allocation3 + $0x80] sm:$0xff]  ;;  %v243_v38 = vld [vmem:[#allocation3 + $0x98] sm:$0xff] }
  0x30   :  { %2157 = vmatprep.subr.bf16.mxu1 %v2156_v23  ;;  %v245_v33 = vld [vmem:[#allocation3 + $0xa8] sm:$0xff]  ;;  %v244_v35 = vld [vmem:[#allocation3 + $0xa0] sm:$0xff]  ;;  %v247_v39 = vld [vmem:[#allocation3 + $0xb8] sm:$0xff] }
  0x31   :  { %v74_v36 = vld [vmem:[%s3610_s0 + $0x28] sm:$0xff]  ;;  %2189 = vmatprep.subr.bf16.mxu0 %v2188_v28  ;;  %v2160_v37 = vpack.c.bf16 %v245_v33, %v241_v31  ;;  %v242_v40 = vld [vmem:[#allocation3 + $0x90] sm:$0xff]  ;;  %v2162_v41 = vpack.c.bf16 %v244_v35, %v240_v34  ;;  %v2192_v42 = vpack.c.bf16 %v247_v39, %v243_v38  ;;  %v248_v47 = vld [vmem:[#allocation3 + $0xc0] sm:$0xff] }
  0x32   :  { %2140 = vmatmul.mubr.msk.f32.gmra.mrb[2].mxu0 %vm86_vm0, %v72_v16  ;;  %2159 = vmatpush1.bf16.msra.mxu1 %v2158_v27  ;;  %v246_v43 = vld [vmem:[#allocation3 + $0xb0] sm:$0xff]  ;;  %v249_v44 = vld [vmem:[#allocation3 + $0xc8] sm:$0xff]  ;;  %v252_v48 = vld [vmem:[#allocation3 + $0xe0] sm:$0xff] }
  0x33   :  { %v253_v45 = vld [vmem:[#allocation3 + $0xe8] sm:$0xff]  ;;  %2142 = vmatprep.mubr.msk.f32.mxu0 %vm86_vm0, %v73_v22  ;;  %2161 = vmatprep.subr.bf16.mxu1 %v2160_v37  ;;  %v251_v49 = vld [vmem:[#allocation3 + $0xd8] sm:$0xff]  ;;  %v75_v50 = vld [vmem:[%s3610_s0 + $0x30] sm:$0xff]  ;;  %v2194_v51 = vpack.c.bf16 %v246_v43, %v242_v40  ;;  %v2166_v58 = vpack.c.bf16 %v252_v48, %v248_v47  ;;  %v3027_v48 = vmov 0.0  }
  0x34   :  { %v2164_v46 = vpack.c.bf16 %v253_v45, %v249_v44  ;;  %2191 = vmatpush1.bf16.msra.mxu0 %v2190_v32  ;;  %v255_v52 = vld [vmem:[#allocation3 + $0xf8] sm:$0xff]  ;;  %v250_v53 = vld [vmem:[#allocation3 + $0xd0] sm:$0xff]  ;;  %v257_v56 = vld [vmem:[#allocation3 + $0x108] sm:$0xff]  ;;  %374 = vmatprep.mubr.f32.mxu1 %v3027_v48 }
  0x35   :  { %2193 = vmatprep.subr.bf16.mxu0 %v2192_v42  ;;  %v2196_v54 = vpack.c.bf16 %v255_v52, %v251_v49  ;;  %v254_v55 = vld [vmem:[#allocation3 + $0xf0] sm:$0xff]  ;;  %v261_v57 = vld [vmem:[#allocation3 + $0x128] sm:$0xff]  ;;  %v259_v59 = vld [vmem:[#allocation3 + $0x118] sm:$0xff] }
  0x36   :  { %2143 = vmatmul.mubr.msk.f32.gmra.mrb[4].mxu0 %vm86_vm0, %v74_v36  ;;  %2163 = vmatpush1.bf16.msra.mxu1 %v2162_v41  ;;  %v263_v60 = vld [vmem:[#allocation3 + $0x138] sm:$0xff]  ;;  %v2168_v62 = vpack.c.bf16 %v261_v57, %v257_v56  ;;  %v256_v63 = vld [vmem:[#allocation3 + $0x100] sm:$0xff]  ;;  %v2198_v1 = vpack.c.bf16 %v254_v55, %v250_v53  ;;  %v265_v2 = vld [vmem:[#allocation3 + $0x148] sm:$0xff] }
  0x37   :  { %2145 = vmatprep.mubr.msk.f32.mxu0 %vm86_vm0, %v75_v50  ;;  %v76_v61 = vld [vmem:[%s3610_s0 + $0x38] sm:$0xff]  ;;  %2165 = vmatprep.subr.bf16.mxu1 %v2164_v46  ;;  %v260_v0 = vld [vmem:[#allocation3 + $0x120] sm:$0xff]  ;;  %v269_v3 = vld [vmem:[#allocation3 + $0x168] sm:$0xff]  ;;  %v2200_v4 = vpack.c.bf16 %v263_v60, %v259_v59 }
  0x38   :  { %2195 = vmatpush1.bf16.msra.mxu0 %v2194_v51  ;;  %v258_v5 = vld [vmem:[#allocation3 + $0x110] sm:$0xff]  ;;  %v2170_v7 = vpack.c.bf16 %v260_v0, %v256_v63  ;;  %v267_v8 = vld [vmem:[#allocation3 + $0x158] sm:$0xff]  ;;  %v2172_v10 = vpack.c.bf16 %v269_v3, %v265_v2  ;;  %v264_v11 = vld [vmem:[#allocation3 + $0x140] sm:$0xff] }
  0x39   :  { %2197 = vmatprep.subr.bf16.mxu0 %v2196_v54  ;;  %v262_v6 = vld [vmem:[#allocation3 + $0x130] sm:$0xff]  ;;  %v271_v9 = vld [vmem:[#allocation3 + $0x178] sm:$0xff]  ;;  %v268_v12 = vld [vmem:[#allocation3 + $0x160] sm:$0xff] }
  0x3a   :  { %2146 = vmatmul.mubr.msk.f32.gmra.mrb[6].mxu0 %vm86_vm0, %v76_v61  ;;  %2167 = vmatpush1.bf16.msra.mxu1 %v2166_v58  ;;  %v2202_v13 = vpack.c.bf16 %v262_v6, %v258_v5  ;;  %v273_v14 = vld [vmem:[#allocation3 + $0x188] sm:$0xff]  ;;  %v2204_v16 = vpack.c.bf16 %v271_v9, %v267_v8  ;;  %v266_v17 = vld [vmem:[#allocation3 + $0x150] sm:$0xff]  ;;  %v2174_v19 = vpack.c.bf16 %v268_v12, %v264_v11  ;;  %v275_v20 = vld [vmem:[#allocation3 + $0x198] sm:$0xff] }
  0x3b   :  { %2169 = vmatprep.subr.bf16.mxu1 %v2168_v62  ;;  %v277_v15 = vld [vmem:[#allocation3 + $0x1a8] sm:$0xff]  ;;  %v270_v18 = vld [vmem:[#allocation3 + $0x170] sm:$0xff]  ;;  %v279_v21 = vld [vmem:[#allocation3 + $0x1b8] sm:$0xff]  ;;  %487 = vmatprep.mubr.f32.mxu0 %v3027_v48 }
  0x3c   :  { %2199 = vmatpush1.bf16.msra.mxu0 %v2198_v1  ;;  %v2176_v22 = vpack.c.bf16 %v277_v15, %v273_v14  ;;  %v272_v23 = vld [vmem:[#allocation3 + $0x180] sm:$0xff]  ;;  %v2206_v25 = vpack.c.bf16 %v270_v18, %v266_v17  ;;  %v2208_v26 = vpack.c.bf16 %v279_v21, %v275_v20  ;;  %v274_v27 = vld [vmem:[#allocation3 + $0x190] sm:$0xff]  ;;  %v281_v31 = vld [vmem:[#allocation3 + $0x1c8] sm:$0xff] }
  0x3d   :  { %2201 = vmatprep.subr.bf16.mxu0 %v2200_v4  ;;  %v276_v24 = vld [vmem:[#allocation3 + $0x1a0] sm:$0xff]  ;;  %v278_v28 = vld [vmem:[#allocation3 + $0x1b0] sm:$0xff]  ;;  %v285_v32 = vld [vmem:[#allocation3 + $0x1e8] sm:$0xff] }
  0x3e   :  { %2171 = vmatpush1.bf16.msra.mxu1 %v2170_v7  ;;  %v2178_v29 = vpack.c.bf16 %v276_v24, %v272_v23  ;;  %v2210_v30 = vpack.c.bf16 %v278_v28, %v274_v27  ;;  %v283_v33 = vld [vmem:[#allocation3 + $0x1d8] sm:$0xff]  ;;  %v2180_v34 = vpack.c.bf16 %v285_v32, %v281_v31  ;;  %v280_v35 = vld [vmem:[#allocation3 + $0x1c0] sm:$0xff]  ;;  %v282_v39 = vld [vmem:[#allocation3 + $0x1d0] sm:$0xff] }
  0x3f   :  { %2173 = vmatprep.subr.bf16.mxu1 %v2172_v10  ;;  %v284_v36 = vld [vmem:[#allocation3 + $0x1e0] sm:$0xff]  ;;  %v287_v38 = vld [vmem:[#allocation3 + $0x1f8] sm:$0xff]  ;;  %v286_v40 = vld [vmem:[#allocation3 + $0x1f0] sm:$0xff] }
  0x40   :  { %2203 = vmatpush1.bf16.msra.mxu0 %v2202_v13  ;;  %v2182_v37 = vpack.c.bf16 %v284_v36, %v280_v35  ;;  %v2212_v41 = vpack.c.bf16 %v287_v38, %v283_v33  ;;  %v2214_v42 = vpack.c.bf16 %v286_v40, %v282_v39  ;;  %v578_v43 = vld [vmem:[#allocation6 + $0x8] sm:$0xff]  ;;  %v580_v45 = vld [vmem:[#allocation6 + $0x18] sm:$0xff]  ;;  %v3153_v50 = vld [vmem:[%s3612_s2] ss:$0 sm:$0xff] }
  0x41   :  { %2205 = vmatprep.subr.bf16.mxu0 %v2204_v16  ;;  %v582_v44 = vld [vmem:[#allocation6 + $0x28] sm:$0xff]  ;;  %v584_v47 = vld [vmem:[#allocation6 + $0x38] sm:$0xff]  ;;  %v577_v51 = vld [vmem:[#allocation6] sm:$0xff] }
  0x42   :  { %2175 = vmatpush1.bf16.msra.mxu1 %v2174_v19  ;;  %v3142_v46 = vpack.c.bf16 %v582_v44, %v578_v43  ;;  %v3145_v49 = vpack.c.bf16 %v584_v47, %v580_v45  ;;  %v581_v53 = vld [vmem:[#allocation6 + $0x20] sm:$0xff]  ;;  %v579_v54 = vld [vmem:[#allocation6 + $0x10] sm:$0xff]  ;;  %v586_v57 = vld [vmem:[#allocation6 + $0x48] sm:$0xff] }
  0x43   :  { %2177 = vmatprep.subr.bf16.mxu1 %v2176_v22  ;;  %v583_v55 = vld [vmem:[#allocation6 + $0x30] sm:$0xff]  ;;  %v590_v59 = vld [vmem:[#allocation6 + $0x68] sm:$0xff]  ;;  %v588_v60 = vld [vmem:[#allocation6 + $0x58] sm:$0xff]  ;;  %v3156_v62 = vpack.c.bf16 %v581_v53, %v577_v51 }
  0x44   :  { %2207 = vmatpush1.bf16.msra.mxu0 %v2206_v25  ;;  %v592_v61 = vld [vmem:[#allocation6 + $0x78] sm:$0xff]  ;;  %v3158_v63 = vpack.c.bf16 %v583_v55, %v579_v54  ;;  %v585_v0 = vld [vmem:[#allocation6 + $0x40] sm:$0xff]  ;;  %v587_v5 = vld [vmem:[#allocation6 + $0x50] sm:$0xff]  ;;  %v3161_v8 = vpack.c.bf16 %v590_v59, %v586_v57 }
  0x45   :  { %2209 = vmatprep.subr.bf16.mxu0 %v2208_v26  ;;  %v589_v4 = vld [vmem:[#allocation6 + $0x60] sm:$0xff]  ;;  %v591_v6 = vld [vmem:[#allocation6 + $0x70] sm:$0xff]  ;;  %v3163_v9 = vpack.c.bf16 %v592_v61, %v588_v60  ;;  %v594_v10 = vld [vmem:[#allocation6 + $0x88] sm:$0xff] }
  0x46   :  { %2179 = vmatpush1.bf16.msra.mxu1 %v2178_v29  ;;  %v598_v12 = vld [vmem:[#allocation6 + $0xa8] sm:$0xff]  ;;  %v596_v13 = vld [vmem:[#allocation6 + $0x98] sm:$0xff]  ;;  %v3168_v15 = vpack.c.bf16 %v589_v4, %v585_v0  ;;  %v3170_v16 = vpack.c.bf16 %v591_v6, %v587_v5  ;;  %v593_v17 = vld [vmem:[#allocation6 + $0x80] sm:$0xff] }
  0x47   :  { %2181 = vmatprep.subr.bf16.mxu1 %v2180_v34  ;;  %v600_v14 = vld [vmem:[#allocation6 + $0xb8] sm:$0xff]  ;;  %v597_v19 = vld [vmem:[#allocation6 + $0xa0] sm:$0xff]  ;;  %v595_v21 = vld [vmem:[#allocation6 + $0x90] sm:$0xff]  ;;  %v3178_v23 = vpack.c.bf16 %v598_v12, %v594_v10 }
  0x48   :  { %2211 = vmatpush1.bf16.msra.mxu0 %v2210_v30  ;;  %v599_v22 = vld [vmem:[#allocation6 + $0xb0] sm:$0xff]  ;;  %v3180_v24 = vpack.c.bf16 %v600_v14, %v596_v13  ;;  %v602_v26 = vld [vmem:[#allocation6 + $0xc8] sm:$0xff]  ;;  %v604_v29 = vld [vmem:[#allocation6 + $0xd8] sm:$0xff]  ;;  %v3184_v31 = vpack.c.bf16 %v597_v19, %v593_v17 }
  0x49   :  { %2213 = vmatprep.subr.bf16.mxu0 %v2212_v41  ;;  %v606_v28 = vld [vmem:[#allocation6 + $0xe8] sm:$0xff]  ;;  %v608_v30 = vld [vmem:[#allocation6 + $0xf8] sm:$0xff]  ;;  %v3186_v32 = vpack.c.bf16 %v599_v22, %v595_v21  ;;  %v601_v33 = vld [vmem:[#allocation6 + $0xc0] sm:$0xff] }
  0x4a   :  { %2183 = vmatpush1.bf16.msra.mxu1 %v2182_v37  ;;  %v605_v35 = vld [vmem:[#allocation6 + $0xe0] sm:$0xff]  ;;  %v603_v36 = vld [vmem:[#allocation6 + $0xd0] sm:$0xff]  ;;  %v3195_v39 = vpack.c.bf16 %v606_v28, %v602_v26  ;;  %v3197_v40 = vpack.c.bf16 %v608_v30, %v604_v29  ;;  %v610_v41 = vld [vmem:[#allocation6 + $0x108] sm:$0xff] }
  0x4b   :  { %2217 = vmatprep.subr.bf16.mxu1 %v3142_v46  ;;  %v607_v37 = vld [vmem:[#allocation6 + $0xf0] sm:$0xff]  ;;  %v614_v44 = vld [vmem:[#allocation6 + $0x128] sm:$0xff]  ;;  %v612_v45 = vld [vmem:[#allocation6 + $0x118] sm:$0xff]  ;;  %v3202_v51 = vpack.c.bf16 %v605_v35, %v601_v33 }
  0x4c   :  { %2215 = vmatpush1.bf16.msra.mxu0 %v2214_v42  ;;  %v616_v47 = vld [vmem:[#allocation6 + $0x138] sm:$0xff]  ;;  %v609_v53 = vld [vmem:[#allocation6 + $0x100] sm:$0xff]  ;;  %v615_v57 = vld [vmem:[#allocation6 + $0x130] sm:$0xff] }
  0x4d   :  { %2249 = vmatprep.subr.bf16.mxu0 %v3145_v49  ;;  %v613_v55 = vld [vmem:[#allocation6 + $0x120] sm:$0xff]  ;;  %v3212_v59 = vpack.c.bf16 %v616_v47, %v612_v45  ;;  %v618_v60 = vld [vmem:[#allocation6 + $0x148] sm:$0xff]  ;;  %v619_v10 = vld [vmem:[#allocation6 + $0x150] sm:$0xff] }
  0x4e   :  { %v622_v0 = vld [vmem:[#allocation6 + $0x168] sm:$0xff]  ;;  %v617_v5 = vld [vmem:[#allocation6 + $0x140] sm:$0xff]  ;;  %v628_v19 = vld [vmem:[#allocation6 + $0x198] sm:$0xff] }
  0x4f   :  { %v3226_v12 = vpack.c.bf16 %v622_v0, %v618_v60  ;;  %v626_v14 = vld [vmem:[#allocation6 + $0x188] sm:$0xff]  ;;  %v627_v28 = vld [vmem:[#allocation6 + $0x190] sm:$0xff]  ;;  %v637_v47 = vld [vmem:[#allocation6 + $0x1e0] sm:$0xff] }
  0x50   :  { %v631_v29 = vld [vmem:[#allocation6 + $0x1b0] sm:$0xff]  ;;  %v65_v60 = vld [vmem:[%s3616_s6] sm:$0xff] }
 0x101   :  { %v2138_v52 = vpop.f32.mrb[0].mxu0 }
 0x102   :  { %v177_v56 = vpop.f32.mrb[1].mxu0  ;;  %v183_v1 = vadd.f32 %v2138_v52, %v3153_v50  ;;  %v3204_v52 = vpack.c.bf16 %v607_v37, %v603_v36  ;;  %v638_v36 = vld [vmem:[#allocation6 + $0x1e8] sm:$0xff]  ;;  %v636_v37 = vld [vmem:[#allocation6 + $0x1d8] sm:$0xff] }
 0x103   :  { %v178_v58 = vadd.f32 %v3153_v50, %v177_v56  ;;  %v611_v56 = vld [vmem:[#allocation6 + $0x110] sm:$0xff] }
 0x104   :  { %v217_v18 = vmax.f32 %v183_v1, 0.0  ;;  %v620_v1 = vld [vmem:[#allocation6 + $0x158] sm:$0xff]  ;;  %v3218_v4 = vpack.c.bf16 %v615_v57, %v611_v56 }
 0x105   :  { %v216_v2 = vmax.f32 %v178_v58, 0.0  ;;  %v2141_v3 = vpop.f32.mrb[2].mxu0  ;;  %v3210_v58 = vpack.c.bf16 %v614_v44, %v610_v41  ;;  %v640_v41 = vld [vmem:[#allocation6 + $0x1f8] sm:$0xff]  ;;  %v633_v44 = vld [vmem:[#allocation6 + $0x1c0] sm:$0xff] }
 0x106   :  { %v187_v7 = vpop.f32.mrb[3].mxu0  ;;  %v193_v34 = vadd.f32 %v2141_v3, %v3153_v50  ;;  %v3216_v3 = vpack.c.bf16 %v613_v55, %v609_v53  ;;  %v635_v53 = vld [vmem:[#allocation6 + $0x1d0] sm:$0xff]  ;;  %v3259_v56 = vpack.c.bf16 %v640_v41, %v636_v37 }
 0x107   :  { %375 = vmatmul.mubr.f32.vlgmr.msra.gmra.mrb[0].mxu1 %v216_v2  ;;  %488 = vmatmul.mubr.f32.vlgmr.msra.gmra.mrb[8].mxu0 %v216_v2  ;;  %v188_v11 = vadd.f32 %v3153_v50, %v187_v7  ;;  %v624_v2 = vld [vmem:[#allocation6 + $0x178] sm:$0xff]  ;;  %v621_v7 = vld [vmem:[#allocation6 + $0x160] sm:$0xff] }
 0x108   :  { %2219 = vmatpush1.bf16.msra.mxu1 %v3156_v62  ;;  %2251 = vmatpush1.bf16.msra.mxu0 %v3158_v63  ;;  %v219_v54 = vmax.f32 %v193_v34, 0.0  ;;  %v3228_v13 = vpack.c.bf16 %v624_v2, %v620_v1  ;;  %v3233_v21 = vpack.c.bf16 %v621_v7, %v617_v5  ;;  %v634_v34 = vld [vmem:[#allocation6 + $0x1c8] sm:$0xff]  ;;  %v288_v2 = vld [vmem:[%s3614_s4] sm:$0xf] }
 0x109   :  { %380 = vmatprep.mubr.f32.mxu1 %v3027_v48  ;;  %493 = vmatprep.mubr.f32.mxu0 %v3027_v48  ;;  %v3174_v20 = vpop.f32.mrb[4].mxu0  ;;  %v218_v27 = vmax.f32 %v188_v11, 0.0  ;;  %v623_v11 = vld [vmem:[#allocation6 + $0x170] sm:$0xff]  ;;  %v3257_v55 = vpack.c.bf16 %v638_v36, %v634_v34 }
 0x10a   :  { %2221 = vmatprep.subr.bf16.mxu1 %v3161_v8  ;;  %2253 = vmatprep.subr.bf16.mxu0 %v3163_v9  ;;  %v197_v25 = vpop.f32.mrb[5].mxu0  ;;  %v203_v6 = vadd.f32 %v3174_v20, %v3153_v50  ;;  %v632_v20 = vld [vmem:[#allocation6 + $0x1b8] sm:$0xff]  ;;  %v3235_v22 = vpack.c.bf16 %v623_v11, %v619_v10 }
 0x10b   :  { %381 = vmatmul.mubr.f32.gmra.mrb[2].mxu1 %v217_v18  ;;  %494 = vmatmul.mubr.f32.gmra.mrb[10].mxu0 %v217_v18  ;;  %v198_v43 = vadd.f32 %v3153_v50, %v197_v25  ;;  %v630_v18 = vld [vmem:[#allocation6 + $0x1a8] sm:$0xff]  ;;  %v625_v25 = vld [vmem:[#allocation6 + $0x180] sm:$0xff]  ;;  %v3243_v33 = vpack.c.bf16 %v632_v20, %v628_v19 }
 0x10c   :  { %2223 = vmatpush1.bf16.msra.mxu1 %v3168_v15  ;;  %2255 = vmatpush1.bf16.msra.mxu0 %v3170_v16  ;;  %v221_v26 = vmax.f32 %v203_v6, 0.0  ;;  %v3241_v30 = vpack.c.bf16 %v630_v18, %v626_v14 }
 0x10d   :  { %386 = vmatprep.mubr.f32.mxu1 %v3027_v48  ;;  %499 = vmatprep.mubr.f32.mxu0 %v3027_v48  ;;  %v3191_v38 = vpop.f32.mrb[6].mxu0  ;;  %v220_v61 = vmax.f32 %v198_v43, 0.0  ;;  %v3249_v43 = vpack.c.bf16 %v631_v29, %v627_v28 }
 0x10e   :  { %2225 = vmatprep.subr.bf16.mxu1 %v3178_v23  ;;  %2257 = vmatprep.subr.bf16.mxu0 %v3180_v24  ;;  %v207_v42 = vpop.f32.mrb[7].mxu0  ;;  %v213_v45 = vadd.f32 %v3191_v38, %v3153_v50 }
 0x10f   :  { %387 = vmatmul.mubr.f32.gmra.mrb[4].mxu1 %v218_v27  ;;  %500 = vmatmul.mubr.f32.gmra.mrb[12].mxu0 %v218_v27  ;;  %v208_v17 = vadd.f32 %v3153_v50, %v207_v42  ;;  %v629_v27 = vld [vmem:[#allocation6 + $0x1a0] sm:$0xff]  ;;  %v3263_v50 = vpack.c.bf16 %v637_v47, %v633_v44 }
 0x110   :  { %2227 = vmatpush1.bf16.msra.mxu1 %v3184_v31  ;;  %2259 = vmatpush1.bf16.msra.mxu0 %v3186_v32  ;;  %v3247_v42 = vpack.c.bf16 %v629_v27, %v625_v25  ;;  %v223_v57 = vmax.f32 %v213_v45, 0.0 }
 0x111   :  { %392 = vmatprep.mubr.f32.mxu1 %v3027_v48  ;;  %505 = vmatprep.mubr.f32.mxu0 %v3027_v48  ;;  %v222_v35 = vmax.f32 %v208_v17, 0.0 }
 0x112   :  { %2229 = vmatprep.subr.bf16.mxu1 %v3195_v39  ;;  %2261 = vmatprep.subr.bf16.mxu0 %v3197_v40 }
 0x113   :  { %393 = vmatmul.mubr.f32.gmra.mrb[6].mxu1 %v219_v54  ;;  %506 = vmatmul.mubr.f32.gmra.mrb[14].mxu0 %v219_v54  ;;  %v639_v54 = vld [vmem:[#allocation6 + $0x1f0] sm:$0xff] }
 0x114   :  { %2231 = vmatpush1.bf16.msra.mxu1 %v3202_v51  ;;  %2263 = vmatpush1.bf16.msra.mxu0 %v3204_v52  ;;  %v3265_v38 = vpack.c.bf16 %v639_v54, %v635_v53  ;;  %v67_v54 = vld [vmem:[%s3617_s7] sm:$0xff]  ;;  %s3028_s7 = smov [#allocation9]  }
 0x115   :  { %398 = vmatprep.mubr.f32.mxu1 %v3027_v48  ;;  %511 = vmatprep.mubr.f32.mxu0 %v3027_v48  ;;  %s2068_s13 = sshll.u32 %s3028_s7, 4  ;;  %s2069_s13 = int_to_ptr.vmem [resolvable:$true] %s2068_s13 }
 0x116   :  { %2233 = vmatprep.subr.bf16.mxu1 %v3210_v58  ;;  %2265 = vmatprep.subr.bf16.mxu0 %v3212_v59  ;;  %s2971_s14 = scalar_lea.vmem %s2069_s13, 128  ;;  %p2976_p3 = scmp.lt.s32.totalorder %s2069_s13, %s2069_s13 }
 0x117   :  { %399 = vmatmul.mubr.f32.gmra.mrb[8].mxu1 %v220_v61  ;;  %512 = vmatmul.mubr.f32.gmra.mrb[16].mxu0 %v220_v61  ;;  %v290_v61 = vlaneseq  ;;  %p2972_p2 = scmp.ne.s32.totalorder %s2069_s13, %s2971_s14  ;;  %p2977_p4 = scmp.lt.s32.totalorder %s2971_s14, %s2971_s14 }
 0x118   :  { %2235 = vmatpush1.bf16.msra.mxu1 %v3216_v3  ;;  %2267 = vmatpush1.bf16.msra.mxu0 %v3218_v4 }
 0x119   :  { %404 = vmatprep.mubr.f32.mxu1 %v3027_v48  ;;  %517 = vmatprep.mubr.f32.mxu0 %v3027_v48  ;;  %v291_v0 = vshrl.u32 %v290_v61, 7  ;;  %p2978_p5 = por %p2977_p4, %p2976_p3 }
 0x11a   :  { %2237 = vmatprep.subr.bf16.mxu1 %v3226_v12  ;;  %2269 = vmatprep.subr.bf16.mxu0 %v3228_v13 }
 0x11b   :  { %405 = vmatmul.mubr.f32.gmra.mrb[10].mxu1 %v221_v26  ;;  %518 = vmatmul.mubr.f32.gmra.mrb[18].mxu0 %v221_v26  ;;  %v292_v1 = vsub.s32 0, %v291_v0  ;;  %v296_v5 = vsub.s32 1, %v291_v0  ;;  %v304_v14 = vsub.s32 3, %v291_v0  ;;  %v300_v28 = vsub.s32 2, %v291_v0  ;;  %p2979_p6 = pnand %p2978_p5, %p2972_p2 }
 0x11c   :  { %2239 = vmatpush1.bf16.msra.mxu1 %v3233_v21  ;;  %2271 = vmatpush1.bf16.msra.mxu0 %v3235_v22 }
 0x11d   :  { %410 = vmatprep.mubr.f32.mxu1 %v3027_v48  ;;  %523 = vmatprep.mubr.f32.mxu0 %v3027_v48  ;;  %v3317_v6 = vrot.slane %v288_v2, %v292_v1  ;;  %v3319_v7 = vrot.slane %v288_v2, %v296_v5  ;;  %v3323_v27 = vrot.slane %v288_v2, %v304_v14 }
 0x11e   :  { %2241 = vmatprep.subr.bf16.mxu1 %v3241_v30  ;;  %2273 = vmatprep.subr.bf16.mxu0 %v3243_v33  ;;  %v3326_v34 = vrot.slane %v288_v2, %v300_v28 }
 0x11f   :  { %411 = vmatmul.mubr.f32.gmra.mrb[12].mxu1 %v222_v35  ;;  %524 = vmatmul.mubr.f32.gmra.mrb[20].mxu0 %v222_v35 }
 0x120   :  { %2243 = vmatpush1.bf16.msra.mxu1 %v3247_v42  ;;  %2275 = vmatpush1.bf16.msra.mxu0 %v3249_v43 }
 0x121   :  { %416 = vmatprep.mubr.f32.mxu1 %v3027_v48  ;;  %529 = vmatprep.mubr.f32.mxu0 %v3027_v48 }
 0x122   :  { %2245 = vmatprep.subr.bf16.mxu1 %v3257_v55  ;;  %2277 = vmatprep.subr.bf16.mxu0 %v3259_v56 }
 0x123   :  { %417 = vmatmul.mubr.f32.gmra.mrb[14].mxu1 %v223_v57  ;;  %530 = vmatmul.mubr.f32.gmra.mrb[22].mxu0 %v223_v57 }
 0x124   :  { %2247 = vmatpush1.bf16.msra.mxu1 %v3263_v50  ;;  %2279 = vmatpush1.bf16.msra.mxu0 %v3265_v38 }
 0x125   :  { %705 = vmatprep.mubr.f32.mxu1 %v3027_v48  ;;  %776 = vmatprep.mubr.f32.mxu0 %v3027_v48 }
 0x126   :  { %2281 = vmatprep.subr.bf16.mxu1 %v3142_v46  ;;  %2313 = vmatprep.subr.bf16.mxu0 %v3145_v49 }
 0x127   :  { %706 = vmatmul.mubr.f32.vlgmr.msra.gmra.mrb[0].mxu1 %v65_v60  ;;  %777 = vmatmul.mubr.f32.vlgmr.msra.gmra.mrb[8].mxu0 %v65_v60 }
 0x128   :  { %2283 = vmatpush1.bf16.msra.mxu1 %v3156_v62  ;;  %2315 = vmatpush1.bf16.msra.mxu0 %v3158_v63 }
 0x129   :  { %2285 = vmatprep.subr.bf16.mxu1 %v3161_v8  ;;  %2317 = vmatprep.subr.bf16.mxu0 %v3163_v9 }
 0x12a   :  { %882 = vmatprep.mubr.f32.mxu1 %v3027_v48  ;;  %953 = vmatprep.mubr.f32.mxu0 %v3027_v48 }
 0x12c   :  { %2287 = vmatpush1.bf16.msra.mxu1 %v3168_v15  ;;  %2319 = vmatpush1.bf16.msra.mxu0 %v3170_v16 }
 0x12d   :  { %2289 = vmatprep.subr.bf16.mxu1 %v3178_v23  ;;  %2321 = vmatprep.subr.bf16.mxu0 %v3180_v24 }
 0x130   :  { %2291 = vmatpush1.bf16.msra.mxu1 %v3184_v31  ;;  %2323 = vmatpush1.bf16.msra.mxu0 %v3186_v32 }
 0x131   :  { %2293 = vmatprep.subr.bf16.mxu1 %v3195_v39  ;;  %2325 = vmatprep.subr.bf16.mxu0 %v3197_v40 }
 0x134   :  { %2295 = vmatpush1.bf16.msra.mxu1 %v3202_v51  ;;  %2327 = vmatpush1.bf16.msra.mxu0 %v3204_v52 }
 0x135   :  { %2297 = vmatprep.subr.bf16.mxu1 %v3210_v58  ;;  %2329 = vmatprep.subr.bf16.mxu0 %v3212_v59 }
 0x138   :  { %2299 = vmatpush1.bf16.msra.mxu1 %v3216_v3  ;;  %2331 = vmatpush1.bf16.msra.mxu0 %v3218_v4 }
 0x139   :  { %2301 = vmatprep.subr.bf16.mxu1 %v3226_v12  ;;  %2333 = vmatprep.subr.bf16.mxu0 %v3228_v13 }
 0x13c   :  { %2303 = vmatpush1.bf16.msra.mxu1 %v3233_v21  ;;  %2335 = vmatpush1.bf16.msra.mxu0 %v3235_v22 }
 0x13d   :  { %2305 = vmatprep.subr.bf16.mxu1 %v3241_v30  ;;  %2337 = vmatprep.subr.bf16.mxu0 %v3243_v33 }
 0x140   :  { %2307 = vmatpush1.bf16.msra.mxu1 %v3247_v42  ;;  %2339 = vmatpush1.bf16.msra.mxu0 %v3249_v43 }
 0x141   :  { %2309 = vmatprep.subr.bf16.mxu1 %v3257_v55  ;;  %2341 = vmatprep.subr.bf16.mxu0 %v3259_v56 }
 0x144   :  { %2311 = vmatpush1.bf16.msra.mxu1 %v3263_v50  ;;  %2343 = vmatpush1.bf16.msra.mxu0 %v3265_v38 }
 0x145   :  { %2345 = vmatprep.subr.bf16.mxu1 %v3142_v46  ;;  %2377 = vmatprep.subr.bf16.mxu0 %v3145_v49 }
 0x1fa   :  { %v707_v10 = vpop.f32.mrb[0].mxu1  ;;  %v778_v11 = vpop.f32.mrb[8].mxu0 }
 0x1fb   :  { %v2728_v17 = vadd.f32 %v707_v10, %v3317_v6  ;;  %v709_v18 = vpop.f32.mrb[1].mxu1  ;;  %v780_v19 = vpop.f32.mrb[9].mxu0  ;;  %v2744_v36 = vadd.f32 %v778_v11, %v3326_v34 }
 0x1fc   :  { %v2729_v20 = vadd.f32 %v709_v18, %v3319_v7  ;;  %v2745_v29 = vadd.f32 %v780_v19, %v3323_v27 }
 0x1fd   :  { %v2098_v25 = vmul.f32 -1.442695, %v2728_v17 }
 0x1fe   :  { %v2099_v26 = vmul.f32 -1.442695, %v2729_v20  ;;  %v2100_v35 = vmul.f32 -1.442695, %v2745_v29 }
 0x1ff   :  { %2799 = vpow2.f32 %v2098_v25 }
 0x200   :  { %2801 = vpow2.f32 %v2099_v26 }
 0x201   :  { %2803 = vpow2.f32 %v2100_v35 }
 0x202   :  { %2805 = vtanh.f32 %v2744_v36 }
 0x209   :  { %v2800_v37 = vpop.eup %2799 }
 0x20a   :  { %v2802_v41 = vpop.eup %2801  ;;  %v790_v44 = vadd.f32 1.0, %v2800_v37 }
 0x20b   :  { %v796_v45 = vadd.f32 1.0, %v2802_v41  ;;  %v2804_v47 = vpop.eup %2803 }
 0x20c   :  { %2807 = vrcp.f32 %v790_v44  ;;  %v2806_v53 = vpop.eup %2805  ;;  %v803_v0 = vadd.f32 1.0, %v2804_v47 }
 0x20d   :  { %2809 = vrcp.f32 %v796_v45 }
 0x20e   :  { %2811 = vrcp.f32 %v803_v0 }
 0x216   :  { %v2808_v57 = vpop.eup %2807 }
 0x217   :  { %v2810_v60 = vpop.eup %2809  ;;  %v807_v61 = vmul.f32 %v2808_v57, %v2806_v53 }
 0x218   :  { %v806_v1 = vmul.f32 %v2810_v60, %v67_v54  ;;  %v2812_v5 = vpop.eup %2811 }
 0x21a   :  { %v3332_v2 = vadd.f32 %v807_v61, %v806_v1 }
 0x21c   :  { %2813 = vtanh.f32 %v3332_v2 }
 0x226   :  { %v2814_v10 = vpop.eup %2813 }
 0x227   :  { %v810_v11 = vmul.f32 %v2814_v10, %v2812_v5 }
 0x229   :  { %883 = vmatmul.mubr.f32.vlgmr.msra.gmra.mrb[2].mxu1 %v810_v11  ;;  %954 = vmatmul.mubr.f32.vlgmr.msra.gmra.mrb[10].mxu0 %v810_v11 }
 0x22a   :  { %2347 = vmatpush1.bf16.msra.mxu1 %v3156_v62  ;;  %2379 = vmatpush1.bf16.msra.mxu0 %v3158_v63 }
 0x22b   :  { %2349 = vmatprep.subr.bf16.mxu1 %v3161_v8  ;;  %2381 = vmatprep.subr.bf16.mxu0 %v3163_v9 }
 0x22c   :  { %1059 = vmatprep.mubr.f32.mxu1 %v3027_v48  ;;  %1130 = vmatprep.mubr.f32.mxu0 %v3027_v48 }
 0x22e   :  { %2351 = vmatpush1.bf16.msra.mxu1 %v3168_v15  ;;  %2383 = vmatpush1.bf16.msra.mxu0 %v3170_v16 }
 0x22f   :  { %2353 = vmatprep.subr.bf16.mxu1 %v3178_v23  ;;  %2385 = vmatprep.subr.bf16.mxu0 %v3180_v24 }
 0x232   :  { %2355 = vmatpush1.bf16.msra.mxu1 %v3184_v31  ;;  %2387 = vmatpush1.bf16.msra.mxu0 %v3186_v32 }
 0x233   :  { %2357 = vmatprep.subr.bf16.mxu1 %v3195_v39  ;;  %2389 = vmatprep.subr.bf16.mxu0 %v3197_v40 }
 0x236   :  { %2359 = vmatpush1.bf16.msra.mxu1 %v3202_v51  ;;  %2391 = vmatpush1.bf16.msra.mxu0 %v3204_v52 }
 0x237   :  { %2361 = vmatprep.subr.bf16.mxu1 %v3210_v58  ;;  %2393 = vmatprep.subr.bf16.mxu0 %v3212_v59 }
 0x23a   :  { %2363 = vmatpush1.bf16.msra.mxu1 %v3216_v3  ;;  %2395 = vmatpush1.bf16.msra.mxu0 %v3218_v4 }
 0x23b   :  { %2365 = vmatprep.subr.bf16.mxu1 %v3226_v12  ;;  %2397 = vmatprep.subr.bf16.mxu0 %v3228_v13 }
 0x23e   :  { %2367 = vmatpush1.bf16.msra.mxu1 %v3233_v21  ;;  %2399 = vmatpush1.bf16.msra.mxu0 %v3235_v22 }
 0x23f   :  { %2369 = vmatprep.subr.bf16.mxu1 %v3241_v30  ;;  %2401 = vmatprep.subr.bf16.mxu0 %v3243_v33 }
 0x242   :  { %2371 = vmatpush1.bf16.msra.mxu1 %v3247_v42  ;;  %2403 = vmatpush1.bf16.msra.mxu0 %v3249_v43 }
 0x243   :  { %2373 = vmatprep.subr.bf16.mxu1 %v3257_v55  ;;  %2405 = vmatprep.subr.bf16.mxu0 %v3259_v56 }
 0x246   :  { %2375 = vmatpush1.bf16.msra.mxu1 %v3263_v50  ;;  %2407 = vmatpush1.bf16.msra.mxu0 %v3265_v38 }
 0x247   :  { %2409 = vmatprep.subr.bf16.mxu1 %v3142_v46  ;;  %2441 = vmatprep.subr.bf16.mxu0 %v3145_v49 }
 0x2fc   :  { %v884_v14 = vpop.f32.mrb[2].mxu1  ;;  %v955_v17 = vpop.f32.mrb[10].mxu0 }
 0x2fd   :  { %v2730_v18 = vadd.f32 %v884_v14, %v3317_v6  ;;  %v886_v19 = vpop.f32.mrb[3].mxu1  ;;  %v957_v20 = vpop.f32.mrb[11].mxu0  ;;  %v2746_v36 = vadd.f32 %v955_v17, %v3326_v34 }
 0x2fe   :  { %v2731_v25 = vadd.f32 %v886_v19, %v3319_v7  ;;  %v2747_v29 = vadd.f32 %v957_v20, %v3323_v27 }
 0x2ff   :  { %v2101_v26 = vmul.f32 -1.442695, %v2730_v18 }
 0x300   :  { %v2102_v28 = vmul.f32 -1.442695, %v2731_v25  ;;  %v2103_v35 = vmul.f32 -1.442695, %v2747_v29 }
 0x301   :  { %2815 = vpow2.f32 %v2101_v26 }
 0x302   :  { %2817 = vpow2.f32 %v2102_v28 }
 0x303   :  { %2819 = vpow2.f32 %v2103_v35 }
 0x304   :  { %2821 = vtanh.f32 %v2746_v36 }
 0x30b   :  { %v2816_v37 = vpop.eup %2815 }
 0x30c   :  { %v2818_v41 = vpop.eup %2817  ;;  %v967_v44 = vadd.f32 1.0, %v2816_v37 }
 0x30d   :  { %v973_v45 = vadd.f32 1.0, %v2818_v41  ;;  %v2820_v47 = vpop.eup %2819 }
 0x30e   :  { %2823 = vrcp.f32 %v967_v44  ;;  %v2822_v53 = vpop.eup %2821  ;;  %v980_v61 = vadd.f32 1.0, %v2820_v47 }
 0x30f   :  { %2825 = vrcp.f32 %v973_v45 }
 0x310   :  { %2827 = vrcp.f32 %v980_v61 }
 0x318   :  { %v2824_v54 = vpop.eup %2823 }
 0x319   :  { %v2826_v57 = vpop.eup %2825  ;;  %v984_v60 = vmul.f32 %v2824_v54, %v2822_v53 }
 0x31a   :  { %v983_v0 = vmul.f32 %v2826_v57, %v3332_v2  ;;  %v2828_v5 = vpop.eup %2827 }
 0x31c   :  { %v3374_v1 = vadd.f32 %v984_v60, %v983_v0 }
 0x31e   :  { %2829 = vtanh.f32 %v3374_v1 }
 0x328   :  { %v2830_v10 = vpop.eup %2829 }
 0x329   :  { %v987_v11 = vmul.f32 %v2830_v10, %v2828_v5 }
 0x32b   :  { %1060 = vmatmul.mubr.f32.vlgmr.msra.gmra.mrb[4].mxu1 %v987_v11  ;;  %1131 = vmatmul.mubr.f32.vlgmr.msra.gmra.mrb[12].mxu0 %v987_v11 }
 0x32c   :  { %2411 = vmatpush1.bf16.msra.mxu1 %v3156_v62  ;;  %2443 = vmatpush1.bf16.msra.mxu0 %v3158_v63 }
 0x32d   :  { %2413 = vmatprep.subr.bf16.mxu1 %v3161_v8  ;;  %2445 = vmatprep.subr.bf16.mxu0 %v3163_v9 }
 0x32e   :  { %1236 = vmatprep.mubr.f32.mxu1 %v3027_v48  ;;  %1307 = vmatprep.mubr.f32.mxu0 %v3027_v48 }
 0x330   :  { %2415 = vmatpush1.bf16.msra.mxu1 %v3168_v15  ;;  %2447 = vmatpush1.bf16.msra.mxu0 %v3170_v16 }
 0x331   :  { %2417 = vmatprep.subr.bf16.mxu1 %v3178_v23  ;;  %2449 = vmatprep.subr.bf16.mxu0 %v3180_v24 }
 0x334   :  { %2419 = vmatpush1.bf16.msra.mxu1 %v3184_v31  ;;  %2451 = vmatpush1.bf16.msra.mxu0 %v3186_v32 }
 0x335   :  { %2421 = vmatprep.subr.bf16.mxu1 %v3195_v39  ;;  %2453 = vmatprep.subr.bf16.mxu0 %v3197_v40 }
 0x338   :  { %2423 = vmatpush1.bf16.msra.mxu1 %v3202_v51  ;;  %2455 = vmatpush1.bf16.msra.mxu0 %v3204_v52 }
 0x339   :  { %2425 = vmatprep.subr.bf16.mxu1 %v3210_v58  ;;  %2457 = vmatprep.subr.bf16.mxu0 %v3212_v59 }
 0x33c   :  { %2427 = vmatpush1.bf16.msra.mxu1 %v3216_v3  ;;  %2459 = vmatpush1.bf16.msra.mxu0 %v3218_v4 }
 0x33d   :  { %2429 = vmatprep.subr.bf16.mxu1 %v3226_v12  ;;  %2461 = vmatprep.subr.bf16.mxu0 %v3228_v13 }
 0x340   :  { %2431 = vmatpush1.bf16.msra.mxu1 %v3233_v21  ;;  %2463 = vmatpush1.bf16.msra.mxu0 %v3235_v22 }
 0x341   :  { %2433 = vmatprep.subr.bf16.mxu1 %v3241_v30  ;;  %2465 = vmatprep.subr.bf16.mxu0 %v3243_v33 }
 0x344   :  { %2435 = vmatpush1.bf16.msra.mxu1 %v3247_v42  ;;  %2467 = vmatpush1.bf16.msra.mxu0 %v3249_v43 }
 0x345   :  { %2437 = vmatprep.subr.bf16.mxu1 %v3257_v55  ;;  %2469 = vmatprep.subr.bf16.mxu0 %v3259_v56 }
 0x348   :  { %2439 = vmatpush1.bf16.msra.mxu1 %v3263_v50  ;;  %2471 = vmatpush1.bf16.msra.mxu0 %v3265_v38 }
 0x349   :  { %2473 = vmatprep.subr.bf16.mxu1 %v3142_v46  ;;  %2505 = vmatprep.subr.bf16.mxu0 %v3145_v49 }
 0x3fe   :  { %v1061_v2 = vpop.f32.mrb[4].mxu1  ;;  %v1132_v14 = vpop.f32.mrb[12].mxu0 }
 0x3ff   :  { %v2732_v17 = vadd.f32 %v1061_v2, %v3317_v6  ;;  %v1063_v18 = vpop.f32.mrb[5].mxu1  ;;  %v1134_v19 = vpop.f32.mrb[13].mxu0  ;;  %v2748_v35 = vadd.f32 %v1132_v14, %v3326_v34 }
 0x400   :  { %v2733_v20 = vadd.f32 %v1063_v18, %v3319_v7  ;;  %v2749_v28 = vadd.f32 %v1134_v19, %v3323_v27 }
 0x401   :  { %v2104_v25 = vmul.f32 -1.442695, %v2732_v17 }
 0x402   :  { %v2105_v26 = vmul.f32 -1.442695, %v2733_v20  ;;  %v2106_v29 = vmul.f32 -1.442695, %v2749_v28 }
 0x403   :  { %2831 = vpow2.f32 %v2104_v25 }
 0x404   :  { %2833 = vpow2.f32 %v2105_v26 }
 0x405   :  { %2835 = vpow2.f32 %v2106_v29 }
 0x406   :  { %2837 = vtanh.f32 %v2748_v35 }
 0x40d   :  { %v2832_v36 = vpop.eup %2831 }
 0x40e   :  { %v2834_v37 = vpop.eup %2833  ;;  %v1144_v41 = vadd.f32 1.0, %v2832_v36 }
 0x40f   :  { %v1150_v44 = vadd.f32 1.0, %v2834_v37  ;;  %v2836_v45 = vpop.eup %2835 }
 0x410   :  { %2839 = vrcp.f32 %v1144_v41  ;;  %v2838_v47 = vpop.eup %2837  ;;  %v1157_v60 = vadd.f32 1.0, %v2836_v45 }
 0x411   :  { %2841 = vrcp.f32 %v1150_v44 }
 0x412   :  { %2843 = vrcp.f32 %v1157_v60 }
 0x41a   :  { %v2840_v53 = vpop.eup %2839 }
 0x41b   :  { %v2842_v54 = vpop.eup %2841  ;;  %v1161_v57 = vmul.f32 %v2840_v53, %v2838_v47 }
 0x41c   :  { %v1160_v61 = vmul.f32 %v2842_v54, %v3374_v1  ;;  %v2844_v5 = vpop.eup %2843 }
 0x41e   :  { %v3416_v0 = vadd.f32 %v1161_v57, %v1160_v61 }
 0x420   :  { %2845 = vtanh.f32 %v3416_v0 }
 0x42a   :  { %v2846_v10 = vpop.eup %2845 }
 0x42b   :  { %v1164_v11 = vmul.f32 %v2846_v10, %v2844_v5 }
 0x42d   :  { %1237 = vmatmul.mubr.f32.vlgmr.msra.gmra.mrb[6].mxu1 %v1164_v11  ;;  %1308 = vmatmul.mubr.f32.vlgmr.msra.gmra.mrb[14].mxu0 %v1164_v11 }
 0x42e   :  { %2475 = vmatpush1.bf16.msra.mxu1 %v3156_v62  ;;  %2507 = vmatpush1.bf16.msra.mxu0 %v3158_v63 }
 0x42f   :  { %2477 = vmatprep.subr.bf16.mxu1 %v3161_v8  ;;  %2509 = vmatprep.subr.bf16.mxu0 %v3163_v9 }
 0x430   :  { %1413 = vmatprep.mubr.f32.mxu1 %v3027_v48  ;;  %1484 = vmatprep.mubr.f32.mxu0 %v3027_v48 }
 0x432   :  { %2479 = vmatpush1.bf16.msra.mxu1 %v3168_v15  ;;  %2511 = vmatpush1.bf16.msra.mxu0 %v3170_v16 }
 0x433   :  { %2481 = vmatprep.subr.bf16.mxu1 %v3178_v23  ;;  %2513 = vmatprep.subr.bf16.mxu0 %v3180_v24 }
 0x436   :  { %2483 = vmatpush1.bf16.msra.mxu1 %v3184_v31  ;;  %2515 = vmatpush1.bf16.msra.mxu0 %v3186_v32 }
 0x437   :  { %2485 = vmatprep.subr.bf16.mxu1 %v3195_v39  ;;  %2517 = vmatprep.subr.bf16.mxu0 %v3197_v40 }
 0x43a   :  { %2487 = vmatpush1.bf16.msra.mxu1 %v3202_v51  ;;  %2519 = vmatpush1.bf16.msra.mxu0 %v3204_v52 }
 0x43b   :  { %2489 = vmatprep.subr.bf16.mxu1 %v3210_v58  ;;  %2521 = vmatprep.subr.bf16.mxu0 %v3212_v59 }
 0x43e   :  { %2491 = vmatpush1.bf16.msra.mxu1 %v3216_v3  ;;  %2523 = vmatpush1.bf16.msra.mxu0 %v3218_v4 }
 0x43f   :  { %2493 = vmatprep.subr.bf16.mxu1 %v3226_v12  ;;  %2525 = vmatprep.subr.bf16.mxu0 %v3228_v13 }
 0x442   :  { %2495 = vmatpush1.bf16.msra.mxu1 %v3233_v21  ;;  %2527 = vmatpush1.bf16.msra.mxu0 %v3235_v22 }
 0x443   :  { %2497 = vmatprep.subr.bf16.mxu1 %v3241_v30  ;;  %2529 = vmatprep.subr.bf16.mxu0 %v3243_v33 }
 0x446   :  { %2499 = vmatpush1.bf16.msra.mxu1 %v3247_v42  ;;  %2531 = vmatpush1.bf16.msra.mxu0 %v3249_v43 }
 0x447   :  { %2501 = vmatprep.subr.bf16.mxu1 %v3257_v55  ;;  %2533 = vmatprep.subr.bf16.mxu0 %v3259_v56 }
 0x44a   :  { %2503 = vmatpush1.bf16.msra.mxu1 %v3263_v50  ;;  %2535 = vmatpush1.bf16.msra.mxu0 %v3265_v38 }
 0x44b   :  { %2537 = vmatprep.subr.bf16.mxu1 %v3142_v46  ;;  %2569 = vmatprep.subr.bf16.mxu0 %v3145_v49 }
 0x500   :  { %v1238_v1 = vpop.f32.mrb[6].mxu1  ;;  %v1309_v2 = vpop.f32.mrb[14].mxu0 }
 0x501   :  { %v2734_v14 = vadd.f32 %v1238_v1, %v3317_v6  ;;  %v1240_v17 = vpop.f32.mrb[7].mxu1  ;;  %v1311_v18 = vpop.f32.mrb[15].mxu0  ;;  %v2750_v29 = vadd.f32 %v1309_v2, %v3326_v34 }
 0x502   :  { %v2735_v19 = vadd.f32 %v1240_v17, %v3319_v7  ;;  %v2751_v26 = vadd.f32 %v1311_v18, %v3323_v27 }
 0x503   :  { %v2107_v20 = vmul.f32 -1.442695, %v2734_v14 }
 0x504   :  { %v2108_v25 = vmul.f32 -1.442695, %v2735_v19  ;;  %v2109_v28 = vmul.f32 -1.442695, %v2751_v26 }
 0x505   :  { %2847 = vpow2.f32 %v2107_v20 }
 0x506   :  { %2849 = vpow2.f32 %v2108_v25 }
 0x507   :  { %2851 = vpow2.f32 %v2109_v28 }
 0x508   :  { %2853 = vtanh.f32 %v2750_v29 }
 0x50f   :  { %v2848_v35 = vpop.eup %2847 }
 0x510   :  { %v2850_v36 = vpop.eup %2849  ;;  %v1321_v37 = vadd.f32 1.0, %v2848_v35 }
 0x511   :  { %v1327_v41 = vadd.f32 1.0, %v2850_v36  ;;  %v2852_v44 = vpop.eup %2851 }
 0x512   :  { %2855 = vrcp.f32 %v1321_v37  ;;  %v2854_v45 = vpop.eup %2853  ;;  %v1334_v57 = vadd.f32 1.0, %v2852_v44 }
 0x513   :  { %2857 = vrcp.f32 %v1327_v41 }
 0x514   :  { %2859 = vrcp.f32 %v1334_v57 }
 0x51c   :  { %v2856_v47 = vpop.eup %2855 }
 0x51d   :  { %v2858_v53 = vpop.eup %2857  ;;  %v1338_v54 = vmul.f32 %v2856_v47, %v2854_v45 }
 0x51e   :  { %v1337_v60 = vmul.f32 %v2858_v53, %v3416_v0  ;;  %v2860_v5 = vpop.eup %2859 }
 0x520   :  { %v3458_v61 = vadd.f32 %v1338_v54, %v1337_v60 }
 0x522   :  { %2861 = vtanh.f32 %v3458_v61 }
 0x52c   :  { %v2862_v10 = vpop.eup %2861 }
 0x52d   :  { %v1341_v11 = vmul.f32 %v2862_v10, %v2860_v5 }
 0x52f   :  { %1414 = vmatmul.mubr.f32.vlgmr.msra.gmra.mrb[8].mxu1 %v1341_v11  ;;  %1485 = vmatmul.mubr.f32.vlgmr.msra.gmra.mrb[16].mxu0 %v1341_v11 }
 0x530   :  { %2539 = vmatpush1.bf16.msra.mxu1 %v3156_v62  ;;  %2571 = vmatpush1.bf16.msra.mxu0 %v3158_v63 }
 0x531   :  { %2541 = vmatprep.subr.bf16.mxu1 %v3161_v8  ;;  %2573 = vmatprep.subr.bf16.mxu0 %v3163_v9 }
 0x532   :  { %1590 = vmatprep.mubr.f32.mxu1 %v3027_v48  ;;  %1661 = vmatprep.mubr.f32.mxu0 %v3027_v48 }
 0x534   :  { %2543 = vmatpush1.bf16.msra.mxu1 %v3168_v15  ;;  %2575 = vmatpush1.bf16.msra.mxu0 %v3170_v16 }
 0x535   :  { %2545 = vmatprep.subr.bf16.mxu1 %v3178_v23  ;;  %2577 = vmatprep.subr.bf16.mxu0 %v3180_v24 }
 0x538   :  { %2547 = vmatpush1.bf16.msra.mxu1 %v3184_v31  ;;  %2579 = vmatpush1.bf16.msra.mxu0 %v3186_v32 }
 0x539   :  { %2549 = vmatprep.subr.bf16.mxu1 %v3195_v39  ;;  %2581 = vmatprep.subr.bf16.mxu0 %v3197_v40 }
 0x53c   :  { %2551 = vmatpush1.bf16.msra.mxu1 %v3202_v51  ;;  %2583 = vmatpush1.bf16.msra.mxu0 %v3204_v52 }
 0x53d   :  { %2553 = vmatprep.subr.bf16.mxu1 %v3210_v58  ;;  %2585 = vmatprep.subr.bf16.mxu0 %v3212_v59 }
 0x540   :  { %2555 = vmatpush1.bf16.msra.mxu1 %v3216_v3  ;;  %2587 = vmatpush1.bf16.msra.mxu0 %v3218_v4 }
 0x541   :  { %2557 = vmatprep.subr.bf16.mxu1 %v3226_v12  ;;  %2589 = vmatprep.subr.bf16.mxu0 %v3228_v13 }
 0x544   :  { %2559 = vmatpush1.bf16.msra.mxu1 %v3233_v21  ;;  %2591 = vmatpush1.bf16.msra.mxu0 %v3235_v22 }
 0x545   :  { %2561 = vmatprep.subr.bf16.mxu1 %v3241_v30  ;;  %2593 = vmatprep.subr.bf16.mxu0 %v3243_v33 }
 0x548   :  { %2563 = vmatpush1.bf16.msra.mxu1 %v3247_v42  ;;  %2595 = vmatpush1.bf16.msra.mxu0 %v3249_v43 }
 0x549   :  { %2565 = vmatprep.subr.bf16.mxu1 %v3257_v55  ;;  %2597 = vmatprep.subr.bf16.mxu0 %v3259_v56 }
 0x54c   :  { %2567 = vmatpush1.bf16.msra.mxu1 %v3263_v50  ;;  %2599 = vmatpush1.bf16.msra.mxu0 %v3265_v38 }
 0x54d   :  { %2601 = vmatprep.subr.bf16.mxu1 %v3142_v46  ;;  %2633 = vmatprep.subr.bf16.mxu0 %v3145_v49 }
 0x602   :  { %v1415_v0 = vpop.f32.mrb[8].mxu1  ;;  %v1486_v1 = vpop.f32.mrb[16].mxu0 }
 0x603   :  { %v2736_v2 = vadd.f32 %v1415_v0, %v3317_v6  ;;  %v1417_v14 = vpop.f32.mrb[9].mxu1  ;;  %v1488_v17 = vpop.f32.mrb[17].mxu0  ;;  %v2752_v28 = vadd.f32 %v1486_v1, %v3326_v34 }
 0x604   :  { %v2737_v18 = vadd.f32 %v1417_v14, %v3319_v7  ;;  %v2753_v25 = vadd.f32 %v1488_v17, %v3323_v27 }
 0x605   :  { %v2110_v19 = vmul.f32 -1.442695, %v2736_v2 }
 0x606   :  { %v2111_v20 = vmul.f32 -1.442695, %v2737_v18  ;;  %v2112_v26 = vmul.f32 -1.442695, %v2753_v25 }
 0x607   :  { %2863 = vpow2.f32 %v2110_v19 }
 0x608   :  { %2865 = vpow2.f32 %v2111_v20 }
 0x609   :  { %2867 = vpow2.f32 %v2112_v26 }
 0x60a   :  { %2869 = vtanh.f32 %v2752_v28 }
 0x611   :  { %v2864_v29 = vpop.eup %2863 }
 0x612   :  { %v2866_v35 = vpop.eup %2865  ;;  %v1498_v36 = vadd.f32 1.0, %v2864_v29 }
 0x613   :  { %v1504_v37 = vadd.f32 1.0, %v2866_v35  ;;  %v2868_v41 = vpop.eup %2867 }
 0x614   :  { %2871 = vrcp.f32 %v1498_v36  ;;  %v2870_v44 = vpop.eup %2869  ;;  %v1511_v54 = vadd.f32 1.0, %v2868_v41 }
 0x615   :  { %2873 = vrcp.f32 %v1504_v37 }
 0x616   :  { %2875 = vrcp.f32 %v1511_v54 }
 0x61e   :  { %v2872_v45 = vpop.eup %2871 }
 0x61f   :  { %v2874_v47 = vpop.eup %2873  ;;  %v1515_v53 = vmul.f32 %v2872_v45, %v2870_v44 }
 0x620   :  { %v1514_v57 = vmul.f32 %v2874_v47, %v3458_v61  ;;  %v2876_v5 = vpop.eup %2875 }
 0x622   :  { %v3500_v60 = vadd.f32 %v1515_v53, %v1514_v57 }
 0x624   :  { %2877 = vtanh.f32 %v3500_v60 }
 0x62e   :  { %v2878_v10 = vpop.eup %2877 }
 0x62f   :  { %v1518_v11 = vmul.f32 %v2878_v10, %v2876_v5 }
 0x631   :  { %1591 = vmatmul.mubr.f32.vlgmr.msra.gmra.mrb[10].mxu1 %v1518_v11  ;;  %1662 = vmatmul.mubr.f32.vlgmr.msra.gmra.mrb[18].mxu0 %v1518_v11 }
 0x632   :  { %2603 = vmatpush1.bf16.msra.mxu1 %v3156_v62  ;;  %2635 = vmatpush1.bf16.msra.mxu0 %v3158_v63 }
 0x633   :  { %2605 = vmatprep.subr.bf16.mxu1 %v3161_v8  ;;  %2637 = vmatprep.subr.bf16.mxu0 %v3163_v9 }
 0x634   :  { %1767 = vmatprep.mubr.f32.mxu1 %v3027_v48  ;;  %1838 = vmatprep.mubr.f32.mxu0 %v3027_v48 }
 0x636   :  { %2607 = vmatpush1.bf16.msra.mxu1 %v3168_v15  ;;  %2639 = vmatpush1.bf16.msra.mxu0 %v3170_v16 }
 0x637   :  { %2609 = vmatprep.subr.bf16.mxu1 %v3178_v23  ;;  %2641 = vmatprep.subr.bf16.mxu0 %v3180_v24 }
 0x63a   :  { %2611 = vmatpush1.bf16.msra.mxu1 %v3184_v31  ;;  %2643 = vmatpush1.bf16.msra.mxu0 %v3186_v32 }
 0x63b   :  { %2613 = vmatprep.subr.bf16.mxu1 %v3195_v39  ;;  %2645 = vmatprep.subr.bf16.mxu0 %v3197_v40 }
 0x63e   :  { %2615 = vmatpush1.bf16.msra.mxu1 %v3202_v51  ;;  %2647 = vmatpush1.bf16.msra.mxu0 %v3204_v52 }
 0x63f   :  { %2617 = vmatprep.subr.bf16.mxu1 %v3210_v58  ;;  %2649 = vmatprep.subr.bf16.mxu0 %v3212_v59 }
 0x642   :  { %2619 = vmatpush1.bf16.msra.mxu1 %v3216_v3  ;;  %2651 = vmatpush1.bf16.msra.mxu0 %v3218_v4 }
 0x643   :  { %2621 = vmatprep.subr.bf16.mxu1 %v3226_v12  ;;  %2653 = vmatprep.subr.bf16.mxu0 %v3228_v13 }
 0x646   :  { %2623 = vmatpush1.bf16.msra.mxu1 %v3233_v21  ;;  %2655 = vmatpush1.bf16.msra.mxu0 %v3235_v22 }
 0x647   :  { %2625 = vmatprep.subr.bf16.mxu1 %v3241_v30  ;;  %2657 = vmatprep.subr.bf16.mxu0 %v3243_v33 }
 0x64a   :  { %2627 = vmatpush1.bf16.msra.mxu1 %v3247_v42  ;;  %2659 = vmatpush1.bf16.msra.mxu0 %v3249_v43 }
 0x64b   :  { %2629 = vmatprep.subr.bf16.mxu1 %v3257_v55  ;;  %2661 = vmatprep.subr.bf16.mxu0 %v3259_v56 }
 0x64e   :  { %2631 = vmatpush1.bf16.msra.mxu1 %v3263_v50  ;;  %2663 = vmatpush1.bf16.msra.mxu0 %v3265_v38 }
 0x64f   :  { %2665 = vmatprep.subr.bf16.mxu1 %v3142_v46  ;;  %2697 = vmatprep.subr.bf16.mxu0 %v3145_v49 }
 0x704   :  { %v1592_v61 = vpop.f32.mrb[10].mxu1  ;;  %v1663_v0 = vpop.f32.mrb[18].mxu0 }
 0x705   :  { %v2738_v1 = vadd.f32 %v1592_v61, %v3317_v6  ;;  %v1594_v2 = vpop.f32.mrb[11].mxu1  ;;  %v1665_v14 = vpop.f32.mrb[19].mxu0  ;;  %v2754_v26 = vadd.f32 %v1663_v0, %v3326_v34 }
 0x706   :  { %v2739_v17 = vadd.f32 %v1594_v2, %v3319_v7  ;;  %v2755_v20 = vadd.f32 %v1665_v14, %v3323_v27 }
 0x707   :  { %v2113_v18 = vmul.f32 -1.442695, %v2738_v1 }
 0x708   :  { %v2114_v19 = vmul.f32 -1.442695, %v2739_v17  ;;  %v2115_v25 = vmul.f32 -1.442695, %v2755_v20 }
 0x709   :  { %2879 = vpow2.f32 %v2113_v18 }
 0x70a   :  { %2881 = vpow2.f32 %v2114_v19 }
 0x70b   :  { %2883 = vpow2.f32 %v2115_v25 }
 0x70c   :  { %2885 = vtanh.f32 %v2754_v26 }
 0x713   :  { %v2880_v46 = vpop.eup %2879 }
 0x714   :  { %v2882_v28 = vpop.eup %2881  ;;  %v1675_v49 = vadd.f32 1.0, %v2880_v46 }
 0x715   :  { %v1681_v29 = vadd.f32 1.0, %v2882_v28  ;;  %v2884_v35 = vpop.eup %2883 }
 0x716   :  { %2887 = vrcp.f32 %v1675_v49  ;;  %v2886_v36 = vpop.eup %2885  ;;  %v1688_v45 = vadd.f32 1.0, %v2884_v35 }
 0x717   :  { %2889 = vrcp.f32 %v1681_v29 }
 0x718   :  { %2891 = vrcp.f32 %v1688_v45 }
 0x720   :  { %v2888_v37 = vpop.eup %2887 }
 0x721   :  { %v2890_v41 = vpop.eup %2889  ;;  %v1692_v44 = vmul.f32 %v2888_v37, %v2886_v36 }
 0x722   :  { %v1691_v47 = vmul.f32 %v2890_v41, %v3500_v60  ;;  %v2892_v54 = vpop.eup %2891 }
 0x724   :  { %v3542_v53 = vadd.f32 %v1692_v44, %v1691_v47 }
 0x726   :  { %2893 = vtanh.f32 %v3542_v53 }
 0x730   :  { %v2894_v57 = vpop.eup %2893 }
 0x731   :  { %v1695_v5 = vmul.f32 %v2894_v57, %v2892_v54 }
 0x733   :  { %1768 = vmatmul.mubr.f32.vlgmr.msra.gmra.mrb[12].mxu1 %v1695_v5  ;;  %1839 = vmatmul.mubr.f32.vlgmr.msra.gmra.mrb[20].mxu0 %v1695_v5 }
 0x734   :  { %2667 = vmatpush1.bf16.msra.mxu1 %v3156_v62  ;;  %2699 = vmatpush1.bf16.msra.mxu0 %v3158_v63 }
 0x735   :  { %2669 = vmatprep.subr.bf16.mxu1 %v3161_v8  ;;  %2701 = vmatprep.subr.bf16.mxu0 %v3163_v9 }
 0x736   :  { %1944 = vmatprep.mubr.f32.mxu1 %v3027_v48  ;;  %2015 = vmatprep.mubr.f32.mxu0 %v3027_v48 }
 0x738   :  { %2671 = vmatpush1.bf16.msra.mxu1 %v3168_v15  ;;  %2703 = vmatpush1.bf16.msra.mxu0 %v3170_v16 }
 0x739   :  { %2673 = vmatprep.subr.bf16.mxu1 %v3178_v23  ;;  %2705 = vmatprep.subr.bf16.mxu0 %v3180_v24 }
 0x73c   :  { %2675 = vmatpush1.bf16.msra.mxu1 %v3184_v31  ;;  %2707 = vmatpush1.bf16.msra.mxu0 %v3186_v32 }
 0x73d   :  { %2677 = vmatprep.subr.bf16.mxu1 %v3195_v39  ;;  %2709 = vmatprep.subr.bf16.mxu0 %v3197_v40 }
 0x740   :  { %2679 = vmatpush1.bf16.msra.mxu1 %v3202_v51  ;;  %2711 = vmatpush1.bf16.msra.mxu0 %v3204_v52 }
 0x741   :  { %2681 = vmatprep.subr.bf16.mxu1 %v3210_v58  ;;  %2713 = vmatprep.subr.bf16.mxu0 %v3212_v59 }
 0x744   :  { %2683 = vmatpush1.bf16.msra.mxu1 %v3216_v3  ;;  %2715 = vmatpush1.bf16.msra.mxu0 %v3218_v4 }
 0x745   :  { %2685 = vmatprep.subr.bf16.mxu1 %v3226_v12  ;;  %2717 = vmatprep.subr.bf16.mxu0 %v3228_v13 }
 0x748   :  { %2687 = vmatpush1.bf16.msra.mxu1 %v3233_v21  ;;  %2719 = vmatpush1.bf16.msra.mxu0 %v3235_v22 }
 0x749   :  { %2689 = vmatprep.subr.bf16.mxu1 %v3241_v30  ;;  %2721 = vmatprep.subr.bf16.mxu0 %v3243_v33 }
 0x74c   :  { %2691 = vmatpush1.bf16.msra.mxu1 %v3247_v42  ;;  %2723 = vmatpush1.bf16.msra.mxu0 %v3249_v43 }
 0x74d   :  { %2693 = vmatprep.subr.bf16.mxu1 %v3257_v55  ;;  %2725 = vmatprep.subr.bf16.mxu0 %v3259_v56 }
 0x750   :  { %2695 = vmatpush1.bf16.msra.mxu1 %v3263_v50  ;;  %2727 = vmatpush1.bf16.msra.mxu0 %v3265_v38 }
 0x806   :  { %v1769_v48 = vpop.f32.mrb[12].mxu1  ;;  %v1840_v62 = vpop.f32.mrb[20].mxu0 }
 0x807   :  { %v2740_v63 = vadd.f32 %v1769_v48, %v3317_v6  ;;  %v1771_v8 = vpop.f32.mrb[13].mxu1  ;;  %v1842_v9 = vpop.f32.mrb[21].mxu0  ;;  %v2756_v32 = vadd.f32 %v1840_v62, %v3326_v34 }
 0x808   :  { %v2741_v15 = vadd.f32 %v1771_v8, %v3319_v7  ;;  %v2757_v24 = vadd.f32 %v1842_v9, %v3323_v27 }
 0x809   :  { %v2116_v16 = vmul.f32 -1.442695, %v2740_v63 }
 0x80a   :  { %v2117_v23 = vmul.f32 -1.442695, %v2741_v15  ;;  %v2118_v31 = vmul.f32 -1.442695, %v2757_v24 }
 0x80b   :  { %2895 = vpow2.f32 %v2116_v16 }
 0x80c   :  { %2897 = vpow2.f32 %v2117_v23 }
 0x80d   :  { %2899 = vpow2.f32 %v2118_v31 }
 0x80e   :  { %2901 = vtanh.f32 %v2756_v32 }
 0x815   :  { %v2896_v39 = vpop.eup %2895 }
 0x816   :  { %v2898_v40 = vpop.eup %2897  ;;  %v1852_v51 = vadd.f32 1.0, %v2896_v39 }
 0x817   :  { %v1858_v52 = vadd.f32 1.0, %v2898_v40  ;;  %v2900_v58 = vpop.eup %2899 }
 0x818   :  { %2903 = vrcp.f32 %v1852_v51  ;;  %v2902_v59 = vpop.eup %2901  ;;  %v1865_v13 = vadd.f32 1.0, %v2900_v58 }
 0x819   :  { %2905 = vrcp.f32 %v1858_v52 }
 0x81a   :  { %2907 = vrcp.f32 %v1865_v13 }
 0x822   :  { %v2904_v3 = vpop.eup %2903 }
 0x823   :  { %v2906_v4 = vpop.eup %2905  ;;  %v1869_v12 = vmul.f32 %v2904_v3, %v2902_v59 }
 0x824   :  { %v1868_v21 = vmul.f32 %v2906_v4, %v3542_v53  ;;  %v2908_v30 = vpop.eup %2907 }
 0x826   :  { %v1870_v22 = vadd.f32 %v1869_v12, %v1868_v21 }
 0x828   :  { %2909 = vtanh.f32 %v1870_v22 }
 0x832   :  { %v2910_v33 = vpop.eup %2909 }
 0x833   :  { %v1872_v42 = vmul.f32 %v2910_v33, %v2908_v30 }
 0x835   :  { %1945 = vmatmul.mubr.f32.vlgmr.msra.gmra.mrb[14].mxu1 %v1872_v42  ;;  %2016 = vmatmul.mubr.f32.vlgmr.msra.gmra.mrb[22].mxu0 %v1872_v42 }
 0x908   :  { %v1946_v43 = vpop.f32.mrb[14].mxu1  ;;  %v2017_v55 = vpop.f32.mrb[22].mxu0 }
 0x909   :  { %v2742_v56 = vadd.f32 %v1946_v43, %v3317_v6  ;;  %v1948_v50 = vpop.f32.mrb[15].mxu1  ;;  %v2019_v38 = vpop.f32.mrb[23].mxu0  ;;  %v2758_v1 = vadd.f32 %v2017_v55, %v3326_v34 }
 0x90a   :  { %v2743_v60 = vadd.f32 %v1948_v50, %v3319_v7  ;;  %v2759_v61 = vadd.f32 %v2019_v38, %v3323_v27 }
 0x90b   :  { %v2119_v10 = vmul.f32 -1.442695, %v2742_v56 }
 0x90c   :  { %v2120_v11 = vmul.f32 -1.442695, %v2743_v60  ;;  %v2121_v0 = vmul.f32 -1.442695, %v2759_v61 }
 0x90d   :  { %2911 = vpow2.f32 %v2119_v10 }
 0x90e   :  { %2913 = vpow2.f32 %v2120_v11 }
 0x90f   :  { %2915 = vpow2.f32 %v2121_v0 }
 0x910   :  { %2917 = vtanh.f32 %v2758_v1 }
 0x917   :  { %v2912_v2 = vpop.eup %2911 }
 0x918   :  { %v2914_v14 = vpop.eup %2913  ;;  %v2029_v17 = vadd.f32 1.0, %v2912_v2 }
 0x919   :  { %v2035_v18 = vadd.f32 1.0, %v2914_v14  ;;  %v2916_v6 = vpop.eup %2915 }
 0x91a   :  { %2919 = vrcp.f32 %v2029_v17  ;;  %v2918_v19 = vpop.eup %2917  ;;  %v2042_v26 = vadd.f32 1.0, %v2916_v6 }
 0x91b   :  { %2921 = vrcp.f32 %v2035_v18 }
 0x91c   :  { %2923 = vrcp.f32 %v2042_v26 }
 0x924   :  { %v2920_v7 = vpop.eup %2919 }
 0x925   :  { %v2922_v20 = vpop.eup %2921  ;;  %v2046_v25 = vmul.f32 %v2920_v7, %v2918_v19 }
 0x926   :  { %v2045_v27 = vmul.f32 %v2922_v20, %v1870_v22 }
 0x928   :  { %v2047_v46 = vadd.f32 %v2046_v25, %v2045_v27 }
 0x92a   :  { %2925 = vtanh.f32 %v2047_v46  ;;  %2051 = vst [vmem:[#allocation9] sm:$0xff] %v2047_v46 }
 0x92b   :  { %2982 = shalt.err (!%p2979_p6)
}
 0x92c   :  { %s2983_s17 = scalar_lea.hbm %s3619_s9, 128 }
 0x92d   :  { %p2984_p7 = scmp.ne.s32.totalorder %s3619_s9, %s2983_s17  ;;  %p2987_p8 = scmp.lt.u32.totalorder %s2983_s17, %s3619_s9 }
 0x92f   :  { %p2989_p9 = pnand %p2987_p8, %p2984_p7 }
 0x931   :  { %2992 = shalt.err (!%p2989_p9)
}
 0x932   :  { %2071 = dma.vmem_to_hbm [thread:$0]  %s2069_s13, 128, %s3619_s9, [#allocation10]   ;;  %v2924_v34 = vpop.eup %2923 }
 0x933   :  { %s3029_s22 = smov [#allocation8]  }
 0x934   :  { %s2058_s23 = sshll.u32 %s3029_s22, 4  ;;  %v2926_v28 = vpop.eup %2925  ;;  %s2059_s23 = int_to_ptr.vmem [resolvable:$true] %s2058_s23 }
 0x935   :  { %v2049_v49 = vmul.f32 %v2926_v28, %v2924_v34  ;;  %s2993_s24 = scalar_lea.vmem %s2059_s23, 128  ;;  %p2998_p11 = scmp.lt.s32.totalorder %s2059_s23, %s2059_s23 }
 0x936   :  { %p2994_p10 = scmp.ne.s32.totalorder %s2059_s23, %s2993_s24  ;;  %p2999_p12 = scmp.lt.s32.totalorder %s2993_s24, %s2993_s24 }
 0x937   :  { %2050 = vst [vmem:[#allocation8] sm:$0xff] %v2049_v49 }
 0x938   :  { %p3000_p13 = por %p2999_p12, %p2998_p11 }
 0x93a   :  { %p3001_p0 = pnand %p3000_p13, %p2994_p10 }
 0x93c   :  { %3004 = shalt.err (!%p3001_p0)
}
 0x93d   :  { %s3005_s27 = scalar_lea.hbm %s3618_s8, 128 }
 0x93e   :  { %p3006_p1 = scmp.ne.s32.totalorder %s3618_s8, %s3005_s27  ;;  %p3009_p2 = scmp.lt.u32.totalorder %s3005_s27, %s3618_s8 }
 0x940   :  { %p3011_p3 = pnand %p3009_p2, %p3006_p1 }
 0x942   :  { %3014 = shalt.err (!%p3011_p3)
}
 0x943   :  { %2061 = dma.vmem_to_hbm [thread:$0]  %s2059_s23, 128, %s3618_s8, [#allocation5]  }
 0x944   :  { %3019 = dma.done.wait [#allocation5], 128  }
 0x945   :  { %3020 = vsyncadd [#allocation5], 4294967168 }
 0x946   :  { %3021 = dma.done.wait [#allocation10], 128  }
 0x947   :  { %3022 = vsyncadd [#allocation10], 4294967168 }
 0x948   :  { %2078 = vsyncpa [#allocation4], 1 }
 0x949   :  { %2079 = vsyncpa [#allocation7], 1 }
 0x94a   :  { %2080 = vsyncpa [#allocation5], 1 }
 0x94b   :  { %2081 = vsyncpa [#allocation10], 1 }

</bundles_post_ra>
